<compile_context>
chip_gen: v7x
topology: tpu7x:2x2x1
jax: 0.10.0
libtpu: 0.0.40
codegen_flags: <defaults>
</compile_context>

<pallas_src>
import jax
import jax.numpy as jnp
from jax.experimental import pallas as pl
from jax.experimental.pallas import tpu as pltpu

# ---- Config (mirrors SongRNN.__init__) --------------------------------------
VOCAB = 50        # input_size  (embedding num_embeddings)
OUTPUT = 64       # output_size
HIDDEN = 32       # config['hidden_size']
LAYERS = 2        # config['no_layers']  (wavefront kernel is specialized to 2)
SEQ = 8           # sequence length fed to forward()
MODEL_TYPE = "LSTM"
DROPOUT_P = 0.1   # inference semantics -> identity

MXU_PRECISION = jax.lax.Precision.HIGHEST   # all matmuls are tiny (K<=32)
REF_PRECISION = jax.lax.Precision.HIGHEST


def songrnn_kernel(seq_ref, emb_ref, w0ih_ref, w0hh_ref, b0_ref,
                   w1ih_ref, w1hh_ref, b1_ref, wout_ref, bout_ref,
                   logits_ref, act_ref, xin_ref):
    """Fused SongRNN forward for one sequence.

    seq_ref  : (S,) int32        token ids (SMEM)
    emb_ref  : (VOCAB, 1, H)     embedding table (leading-dim indexable)
    w0ih_ref : (H, 4H)           layer-0 input->gates (transposed, i/f/o * 0.5)
    w0hh_ref : (H, 4H)           layer-0 hidden->gates (transposed, scaled)
    b0_ref   : (1, 4H)           layer-0 combined bias (scaled)
    w1ih_ref : (H, 4H)           layer-1 input->gates (transposed, scaled)
    w1hh_ref : (H, 4H)           layer-1 hidden->gates (transposed, scaled)
    b1_ref   : (1, 4H)           layer-1 combined bias (scaled)
    wout_ref : (H, O)            output projection (transposed)
    bout_ref : (1, O)            output projection bias
    logits_ref : (S, O)          linear-layer output
    act_ref    : (S, H)          post-dropout(=identity) LSTM activations
    xin_ref    : (S, H) scratch  gathered embeddings
    """
    S, H = act_ref.shape

    # ---- (i) embedding gather: SMEM indices into the VMEM-resident table ----
    for t in range(S):
        xin_ref[pl.ds(t, 1), :] = emb_ref[seq_ref[t]]          # (1, H)

    # ---- layer-0 input projection, batched over all timesteps (off-chain) ---
    xproj0 = jnp.dot(xin_ref[...], w0ih_ref[...],
                     preferred_element_type=jnp.float32,
                     precision=MXU_PRECISION) + b0_ref[...]     # (S, 4H)

    w0hh = w0hh_ref[...]
    w1ih = w1ih_ref[...]
    w1hh = w1hh_ref[...]
    b1 = b1_ref[...]

    def cell(gates, c):
        # i/f/o gate columns of W/b pre-scaled by 0.5 offline -> a single tanh
        # over the full (1,4H) vreg yields tanh(x/2) for i/f/o (sigmoid
        # recovered on the VPU as 0.5*t+0.5) and tanh(x) for g: one EUP push
        # per cell on the chain; only tanh(c_new) remains as the second push.
        th = jnp.tanh(gates)
        sg = 0.5 * th + 0.5
        i_g = sg[:, 0:H]
        f_g = sg[:, H:2 * H]
        g_g = th[:, 2 * H:3 * H]
        o_g = sg[:, 3 * H:4 * H]
        c_new = f_g * c + i_g * g_g
        h_new = o_g * jnp.tanh(c_new)
        return h_new, c_new

    h0 = jnp.zeros((1, H), jnp.float32)
    c0 = jnp.zeros((1, H), jnp.float32)
    h1 = jnp.zeros((1, H), jnp.float32)
    c1 = jnp.zeros((1, H), jnp.float32)
    h0_prev = h0

    # ---- wavefront: layer-1 step (w-1) interleaved with layer-0 step w ------
    # Both per-wave cells depend only on the previous wave's state, giving the
    # scheduler two independent MXU/EUP chains to overlap each wave.
    for w in range(S + 1):
        if w >= 1:
            t1 = w - 1
            # Layer-1: input projection fused into the cell (input = h0_prev).
            # Two independent MXU pushes (pipeline back-to-back) + bias add.
            gates1 = (jnp.dot(h0_prev, w1ih,
                              preferred_element_type=jnp.float32,
                              precision=MXU_PRECISION)
                      + jnp.dot(h1, w1hh,
                                preferred_element_type=jnp.float32,
                                precision=MXU_PRECISION)
                      + b1)                                      # (1, 4H)
            h1, c1 = cell(gates1, c1)
            act_ref[pl.ds(t1, 1), :] = h1        # direct row store (vst slot)
        if w < S:
            gates0 = xproj0[w:w + 1, :] + jnp.dot(
                h0, w0hh, preferred_element_type=jnp.float32,
                precision=MXU_PRECISION)                          # (1, 4H)
            h0, c0 = cell(gates0, c0)
        h0_prev = h0

    # ---- output head hoisted out of the time loop ---------------------------
    # Last dims of 64/32 (<128 lanes) -> masked stores; accepted (8 rows only).
    logits_ref[...] = (jnp.dot(act_ref[...], wout_ref[...],
                               preferred_element_type=jnp.float32,
                               precision=MXU_PRECISION)
                       + bout_ref[...])


def prepare_params(params):
    """One-time weight re-layout (hoisted out of the per-call forward)."""
    H = HIDDEN
    gate_scale = jnp.concatenate([
        jnp.full((H,), 0.5, jnp.float32),    # i  (sigmoid via tanh(x/2))
        jnp.full((H,), 0.5, jnp.float32),    # f
        jnp.ones((H,), jnp.float32),         # g  (tanh, unscaled)
        jnp.full((H,), 0.5, jnp.float32),    # o
    ])
    w_ih_t = jnp.transpose(params["w_ih"], (0, 2, 1)) * gate_scale   # (L,H,4H)
    w_hh_t = jnp.transpose(params["w_hh"], (0, 2, 1)) * gate_scale   # (L,H,4H)
    b = (params["b_ih"] + params["b_hh"]) * gate_scale               # (L,4H)
    return {
        "emb3d": params["embedding"][:, None, :],      # (VOCAB, 1, H)
        "w0_ih_t": w_ih_t[0], "w0_hh_t": w_hh_t[0], "b0": b[0:1],
        "w1_ih_t": w_ih_t[1], "w1_hh_t": w_hh_t[1], "b1": b[1:2],
        "w_out_t": params["w_out"].T,                  # (H, O)
        "b_out": params["b_out"][None, :],             # (1, O)
    }


@jax.jit
def songrnn_forward(seq, prep):
    S = seq.shape[0]
    H = prep["w0_hh_t"].shape[0]
    O = prep["w_out_t"].shape[1]
    vmem = pl.BlockSpec(memory_space=pltpu.MemorySpace.VMEM)
    smem = pl.BlockSpec(memory_space=pltpu.MemorySpace.SMEM)
    logits, act = pl.pallas_call(
        songrnn_kernel,
        out_shape=(
            jax.ShapeDtypeStruct((S, O), jnp.float32),
            jax.ShapeDtypeStruct((S, H), jnp.float32),
        ),
        in_specs=[smem] + [vmem] * 9,
        out_specs=(vmem, vmem),
        scratch_shapes=[pltpu.VMEM((S, H), jnp.float32)],
    )(seq, prep["emb3d"],
      prep["w0_ih_t"], prep["w0_hh_t"], prep["b0"],
      prep["w1_ih_t"], prep["w1_hh_t"], prep["b1"],
      prep["w_out_t"], prep["b_out"])
    return logits, act


def init_params(key):
    """Deterministic synthetic parameters (PyTorch-like init ranges)."""
    ks = jax.random.split(key, 7)
    s = 1.0 / (HIDDEN ** 0.5)
    return {
        "embedding": jax.random.normal(ks[0], (VOCAB, HIDDEN), jnp.float32),
        "w_ih": jax.random.uniform(ks[1], (LAYERS, 4 * HIDDEN, HIDDEN),
                                   jnp.float32, -s, s),
        "w_hh": jax.random.uniform(ks[2], (LAYERS, 4 * HIDDEN, HIDDEN),
                                   jnp.float32, -s, s),
        "b_ih": jax.random.uniform(ks[3], (LAYERS, 4 * HIDDEN), jnp.float32, -s, s),
        "b_hh": jax.random.uniform(ks[4], (LAYERS, 4 * HIDDEN), jnp.float32, -s, s),
        "w_out": jax.random.uniform(ks[5], (OUTPUT, HIDDEN), jnp.float32, -s, s),
        "b_out": jax.random.uniform(ks[6], (OUTPUT,), jnp.float32, -s, s),
    }


def reference_forward(seq, params):
    """Pure-JAX reference matching PyTorch nn.LSTM (unbatched) semantics."""
    emb = params["embedding"][seq]
    h = jnp.zeros((LAYERS, HIDDEN), jnp.float32)
    c = jnp.zeros((LAYERS, HIDDEN), jnp.float32)
    outs = []
    Hh = HIDDEN
    for t in range(SEQ):
        x = emb[t]
        h_new, c_new = [], []
        for l in range(LAYERS):
            gates = (jnp.dot(params["w_ih"][l], x, precision=REF_PRECISION)
                     + params["b_ih"][l]
                     + jnp.dot(params["w_hh"][l], h[l], precision=REF_PRECISION)
                     + params["b_hh"][l])
            i = jax.nn.sigmoid(gates[0:Hh])
            f = jax.nn.sigmoid(gates[Hh:2 * Hh])
            g = jnp.tanh(gates[2 * Hh:3 * Hh])
            o = jax.nn.sigmoid(gates[3 * Hh:4 * Hh])
            cl = f * c[l] + i * g
            hl = o * jnp.tanh(cl)
            h_new.append(hl)
            c_new.append(cl)
            x = hl
        h = jnp.stack(h_new)
        c = jnp.stack(c_new)
        outs.append(x)
    act = jnp.stack(outs)                                # (S, H)
    logits = jnp.dot(act, params["w_out"].T, precision=REF_PRECISION) + params["b_out"]
    return logits, act


if __name__ == "__main__":
    assert LAYERS == 2, "wavefront kernel is specialized to 2 LSTM layers"
    key = jax.random.PRNGKey(0)
    pkey, skey = jax.random.split(key)
    params = init_params(pkey)
    seq = jax.random.randint(skey, (SEQ,), 0, VOCAB, dtype=jnp.int32)

    prep = prepare_params(params)        # one-time re-layout, not per-call
    prep = jax.tree.map(jax.block_until_ready, prep)

    logits, act = songrnn_forward(seq, prep)
    jax.block_until_ready((logits, act))

    ref_logits, ref_act = reference_forward(seq, params)
    assert logits.shape == (SEQ, OUTPUT) and act.shape == (SEQ, HIDDEN)
    # With HIGHEST precision on the chain matmuls the observed error is ~1e-5;
    # tolerance kept conservative (covers EUP approximation differences).
    assert jnp.allclose(logits, ref_logits, rtol=2e-2, atol=2e-2)
    assert jnp.allclose(act, ref_act, rtol=2e-2, atol=2e-2)

    print("KERNEL_OK")
</pallas_src>

<mosaic_0001>
module attributes {stable_mosaic.version = 11 : i64} {
  func.func @songrnn_kernel(%arg0: memref<8xi32, #tpu.memory_space<smem>>, %arg1: memref<50x1x32xf32, #tpu.memory_space<vmem>>, %arg2: memref<32x128xf32, #tpu.memory_space<vmem>>, %arg3: memref<32x128xf32, #tpu.memory_space<vmem>>, %arg4: memref<1x128xf32, #tpu.memory_space<vmem>>, %arg5: memref<32x128xf32, #tpu.memory_space<vmem>>, %arg6: memref<32x128xf32, #tpu.memory_space<vmem>>, %arg7: memref<1x128xf32, #tpu.memory_space<vmem>>, %arg8: memref<32x64xf32, #tpu.memory_space<vmem>>, %arg9: memref<1x64xf32, #tpu.memory_space<vmem>>, %arg10: memref<8x64xf32, #tpu.memory_space<vmem>>, %arg11: memref<8x32xf32, #tpu.memory_space<vmem>>, %arg12: memref<8x32xf32, #tpu.memory_space<vmem>>) attributes {dimension_semantics = [], scalar_prefetch = 0 : i64, scratch_operands = 1 : i64, tpu.core_type = #tpu.core_type<tc>} {
    %c0 = arith.constant 0 : index
    %0 = memref.load %arg0[%c0] : memref<8xi32, #tpu.memory_space<smem>>
    %1 = arith.index_cast %0 : i32 to index
    %c0_0 = arith.constant 0 : index
    %c0_1 = arith.constant 0 : index
    %2 = vector.load %arg1[%1, %c0_0, %c0_1] : memref<50x1x32xf32, #tpu.memory_space<vmem>>, vector<1x1x32xf32>
    %3 = vector.shape_cast %2 : vector<1x1x32xf32> to vector<1x32xf32>
    %c0_2 = arith.constant 0 : index
    %c0_3 = arith.constant 0 : index
    %4 = vector.load %arg12[%c0_2, %c0_3] : memref<8x32xf32, #tpu.memory_space<vmem>>, vector<1x32xf32>
    tpu.vector_store %arg12[%c0_2, %c0_3], %3 {strides = array<i32>} : memref<8x32xf32, #tpu.memory_space<vmem>>, vector<1x32xf32>,
    %c1 = arith.constant 1 : index
    %5 = memref.load %arg0[%c1] : memref<8xi32, #tpu.memory_space<smem>>
    %6 = arith.index_cast %5 : i32 to index
    %c0_4 = arith.constant 0 : index
    %c0_5 = arith.constant 0 : index
    %7 = vector.load %arg1[%6, %c0_4, %c0_5] : memref<50x1x32xf32, #tpu.memory_space<vmem>>, vector<1x1x32xf32>
    %8 = vector.shape_cast %7 : vector<1x1x32xf32> to vector<1x32xf32>
    %c1_6 = arith.constant 1 : index
    %c0_7 = arith.constant 0 : index
    %9 = vector.load %arg12[%c1_6, %c0_7] : memref<8x32xf32, #tpu.memory_space<vmem>>, vector<1x32xf32>
    tpu.vector_store %arg12[%c1_6, %c0_7], %8 {strides = array<i32>} : memref<8x32xf32, #tpu.memory_space<vmem>>, vector<1x32xf32>,
    %c2 = arith.constant 2 : index
    %10 = memref.load %arg0[%c2] : memref<8xi32, #tpu.memory_space<smem>>
    %11 = arith.index_cast %10 : i32 to index
    %c0_8 = arith.constant 0 : index
    %c0_9 = arith.constant 0 : index
    %12 = vector.load %arg1[%11, %c0_8, %c0_9] : memref<50x1x32xf32, #tpu.memory_space<vmem>>, vector<1x1x32xf32>
    %13 = vector.shape_cast %12 : vector<1x1x32xf32> to vector<1x32xf32>
    %c2_10 = arith.constant 2 : index
    %c0_11 = arith.constant 0 : index
    %14 = vector.load %arg12[%c2_10, %c0_11] : memref<8x32xf32, #tpu.memory_space<vmem>>, vector<1x32xf32>
    tpu.vector_store %arg12[%c2_10, %c0_11], %13 {strides = array<i32>} : memref<8x32xf32, #tpu.memory_space<vmem>>, vector<1x32xf32>,
    %c3 = arith.constant 3 : index
    %15 = memref.load %arg0[%c3] : memref<8xi32, #tpu.memory_space<smem>>
    %16 = arith.index_cast %15 : i32 to index
    %c0_12 = arith.constant 0 : index
    %c0_13 = arith.constant 0 : index
    %17 = vector.load %arg1[%16, %c0_12, %c0_13] : memref<50x1x32xf32, #tpu.memory_space<vmem>>, vector<1x1x32xf32>
    %18 = vector.shape_cast %17 : vector<1x1x32xf32> to vector<1x32xf32>
    %c3_14 = arith.constant 3 : index
    %c0_15 = arith.constant 0 : index
    %19 = vector.load %arg12[%c3_14, %c0_15] : memref<8x32xf32, #tpu.memory_space<vmem>>, vector<1x32xf32>
    tpu.vector_store %arg12[%c3_14, %c0_15], %18 {strides = array<i32>} : memref<8x32xf32, #tpu.memory_space<vmem>>, vector<1x32xf32>,
    %c4 = arith.constant 4 : index
    %20 = memref.load %arg0[%c4] : memref<8xi32, #tpu.memory_space<smem>>
    %21 = arith.index_cast %20 : i32 to index
    %c0_16 = arith.constant 0 : index
    %c0_17 = arith.constant 0 : index
    %22 = vector.load %arg1[%21, %c0_16, %c0_17] : memref<50x1x32xf32, #tpu.memory_space<vmem>>, vector<1x1x32xf32>
    %23 = vector.shape_cast %22 : vector<1x1x32xf32> to vector<1x32xf32>
    %c4_18 = arith.constant 4 : index
    %c0_19 = arith.constant 0 : index
    %24 = vector.load %arg12[%c4_18, %c0_19] : memref<8x32xf32, #tpu.memory_space<vmem>>, vector<1x32xf32>
    tpu.vector_store %arg12[%c4_18, %c0_19], %23 {strides = array<i32>} : memref<8x32xf32, #tpu.memory_space<vmem>>, vector<1x32xf32>,
    %c5 = arith.constant 5 : index
    %25 = memref.load %arg0[%c5] : memref<8xi32, #tpu.memory_space<smem>>
    %26 = arith.index_cast %25 : i32 to index
    %c0_20 = arith.constant 0 : index
    %c0_21 = arith.constant 0 : index
    %27 = vector.load %arg1[%26, %c0_20, %c0_21] : memref<50x1x32xf32, #tpu.memory_space<vmem>>, vector<1x1x32xf32>
    %28 = vector.shape_cast %27 : vector<1x1x32xf32> to vector<1x32xf32>
    %c5_22 = arith.constant 5 : index
    %c0_23 = arith.constant 0 : index
    %29 = vector.load %arg12[%c5_22, %c0_23] : memref<8x32xf32, #tpu.memory_space<vmem>>, vector<1x32xf32>
    tpu.vector_store %arg12[%c5_22, %c0_23], %28 {strides = array<i32>} : memref<8x32xf32, #tpu.memory_space<vmem>>, vector<1x32xf32>,
    %c6 = arith.constant 6 : index
    %30 = memref.load %arg0[%c6] : memref<8xi32, #tpu.memory_space<smem>>
    %31 = arith.index_cast %30 : i32 to index
    %c0_24 = arith.constant 0 : index
    %c0_25 = arith.constant 0 : index
    %32 = vector.load %arg1[%31, %c0_24, %c0_25] : memref<50x1x32xf32, #tpu.memory_space<vmem>>, vector<1x1x32xf32>
    %33 = vector.shape_cast %32 : vector<1x1x32xf32> to vector<1x32xf32>
    %c6_26 = arith.constant 6 : index
    %c0_27 = arith.constant 0 : index
    %34 = vector.load %arg12[%c6_26, %c0_27] : memref<8x32xf32, #tpu.memory_space<vmem>>, vector<1x32xf32>
    tpu.vector_store %arg12[%c6_26, %c0_27], %33 {strides = array<i32>} : memref<8x32xf32, #tpu.memory_space<vmem>>, vector<1x32xf32>,
    %c7 = arith.constant 7 : index
    %35 = memref.load %arg0[%c7] : memref<8xi32, #tpu.memory_space<smem>>
    %36 = arith.index_cast %35 : i32 to index
    %c0_28 = arith.constant 0 : index
    %c0_29 = arith.constant 0 : index
    %37 = vector.load %arg1[%36, %c0_28, %c0_29] : memref<50x1x32xf32, #tpu.memory_space<vmem>>, vector<1x1x32xf32>
    %38 = vector.shape_cast %37 : vector<1x1x32xf32> to vector<1x32xf32>
    %c7_30 = arith.constant 7 : index
    %c0_31 = arith.constant 0 : index
    %39 = vector.load %arg12[%c7_30, %c0_31] : memref<8x32xf32, #tpu.memory_space<vmem>>, vector<1x32xf32>
    tpu.vector_store %arg12[%c7_30, %c0_31], %38 {strides = array<i32>} : memref<8x32xf32, #tpu.memory_space<vmem>>, vector<1x32xf32>,
    %c0_32 = arith.constant 0 : index
    %c0_33 = arith.constant 0 : index
    %40 = vector.load %arg12[%c0_32, %c0_33] : memref<8x32xf32, #tpu.memory_space<vmem>>, vector<8x32xf32>
    %c0_34 = arith.constant 0 : index
    %c0_35 = arith.constant 0 : index
    %41 = vector.load %arg2[%c0_34, %c0_35] : memref<32x128xf32, #tpu.memory_space<vmem>>, vector<32x128xf32>
    %cst = arith.constant dense<0.000000e+00> : vector<8x128xf32>
    %42 = tpu.matmul %40, %41, %cst {dimension_numbers = #tpu.dot_dimension_numbers<[1], [0], [0], [1], [0, 0, 1, 1], [], []>, precision = #tpu.contract_precision<fp32>} : vector<8x32xf32>, vector<32x128xf32>, vector<8x128xf32> -> vector<8x128xf32>
    %c0_36 = arith.constant 0 : index
    %c0_37 = arith.constant 0 : index
    %43 = vector.load %arg4[%c0_36, %c0_37] : memref<1x128xf32, #tpu.memory_space<vmem>>, vector<1x128xf32>
    %44 = vector.broadcast %43 : vector<1x128xf32> to vector<8x128xf32>
    %45 = arith.addf %42, %44 : vector<8x128xf32>
    %c0_38 = arith.constant 0 : index
    %c0_39 = arith.constant 0 : index
    %46 = vector.load %arg3[%c0_38, %c0_39] : memref<32x128xf32, #tpu.memory_space<vmem>>, vector<32x128xf32>
    %c0_40 = arith.constant 0 : index
    %c0_41 = arith.constant 0 : index
    %47 = vector.load %arg5[%c0_40, %c0_41] : memref<32x128xf32, #tpu.memory_space<vmem>>, vector<32x128xf32>
    %c0_42 = arith.constant 0 : index
    %c0_43 = arith.constant 0 : index
    %48 = vector.load %arg6[%c0_42, %c0_43] : memref<32x128xf32, #tpu.memory_space<vmem>>, vector<32x128xf32>
    %c0_44 = arith.constant 0 : index
    %c0_45 = arith.constant 0 : index
    %49 = vector.load %arg7[%c0_44, %c0_45] : memref<1x128xf32, #tpu.memory_space<vmem>>, vector<1x128xf32>
    %cst_46 = arith.constant 0.000000e+00 : f32
    %50 = vector.broadcast %cst_46 : f32 to vector<1x32xf32>
    %cst_47 = arith.constant 0.000000e+00 : f32
    %51 = vector.broadcast %cst_47 : f32 to vector<1x32xf32>
    %cst_48 = arith.constant 0.000000e+00 : f32
    %52 = vector.broadcast %cst_48 : f32 to vector<1x32xf32>
    %cst_49 = arith.constant 0.000000e+00 : f32
    %53 = vector.broadcast %cst_49 : f32 to vector<1x32xf32>
    %54 = vector.extract_strided_slice %45 {offsets = [0, 0], sizes = [1, 128], strides = [1, 1]} : vector<8x128xf32> to vector<1x128xf32>
    %cst_50 = arith.constant dense<0.000000e+00> : vector<1x128xf32>
    %55 = tpu.matmul %50, %46, %cst_50 {dimension_numbers = #tpu.dot_dimension_numbers<[1], [0], [0], [1], [0, 0, 1, 1], [], []>, precision = #tpu.contract_precision<fp32>} : vector<1x32xf32>, vector<32x128xf32>, vector<1x128xf32> -> vector<1x128xf32>
    %56 = arith.addf %54, %55 : vector<1x128xf32>
    %57 = math.tanh %56 : vector<1x128xf32>
    %cst_51 = arith.constant 5.000000e-01 : f32
    %58 = vector.broadcast %cst_51 : f32 to vector<1x128xf32>
    %59 = arith.mulf %58, %57 : vector<1x128xf32>
    %cst_52 = arith.constant 5.000000e-01 : f32
    %60 = vector.broadcast %cst_52 : f32 to vector<1x128xf32>
    %61 = arith.addf %59, %60 : vector<1x128xf32>
    %62 = vector.extract_strided_slice %61 {offsets = [0, 0], sizes = [1, 32], strides = [1, 1]} : vector<1x128xf32> to vector<1x32xf32>
    %63 = vector.extract_strided_slice %61 {offsets = [0, 32], sizes = [1, 32], strides = [1, 1]} : vector<1x128xf32> to vector<1x32xf32>
    %64 = vector.extract_strided_slice %57 {offsets = [0, 64], sizes = [1, 32], strides = [1, 1]} : vector<1x128xf32> to vector<1x32xf32>
    %65 = vector.extract_strided_slice %61 {offsets = [0, 96], sizes = [1, 32], strides = [1, 1]} : vector<1x128xf32> to vector<1x32xf32>
    %66 = arith.mulf %63, %51 : vector<1x32xf32>
    %67 = arith.mulf %62, %64 : vector<1x32xf32>
    %68 = arith.addf %66, %67 : vector<1x32xf32>
    %69 = math.tanh %68 : vector<1x32xf32>
    %70 = arith.mulf %65, %69 : vector<1x32xf32>
    %cst_53 = arith.constant dense<0.000000e+00> : vector<1x128xf32>
    %71 = tpu.matmul %70, %47, %cst_53 {dimension_numbers = #tpu.dot_dimension_numbers<[1], [0], [0], [1], [0, 0, 1, 1], [], []>, precision = #tpu.contract_precision<fp32>} : vector<1x32xf32>, vector<32x128xf32>, vector<1x128xf32> -> vector<1x128xf32>
    %cst_54 = arith.constant dense<0.000000e+00> : vector<1x128xf32>
    %72 = tpu.matmul %52, %48, %cst_54 {dimension_numbers = #tpu.dot_dimension_numbers<[1], [0], [0], [1], [0, 0, 1, 1], [], []>, precision = #tpu.contract_precision<fp32>} : vector<1x32xf32>, vector<32x128xf32>, vector<1x128xf32> -> vector<1x128xf32>
    %73 = arith.addf %71, %72 : vector<1x128xf32>
    %74 = arith.addf %73, %49 : vector<1x128xf32>
    %75 = math.tanh %74 : vector<1x128xf32>
    %cst_55 = arith.constant 5.000000e-01 : f32
    %76 = vector.broadcast %cst_55 : f32 to vector<1x128xf32>
    %77 = arith.mulf %76, %75 : vector<1x128xf32>
    %cst_56 = arith.constant 5.000000e-01 : f32
    %78 = vector.broadcast %cst_56 : f32 to vector<1x128xf32>
    %79 = arith.addf %77, %78 : vector<1x128xf32>
    %80 = vector.extract_strided_slice %79 {offsets = [0, 0], sizes = [1, 32], strides = [1, 1]} : vector<1x128xf32> to vector<1x32xf32>
    %81 = vector.extract_strided_slice %79 {offsets = [0, 32], sizes = [1, 32], strides = [1, 1]} : vector<1x128xf32> to vector<1x32xf32>
    %82 = vector.extract_strided_slice %75 {offsets = [0, 64], sizes = [1, 32], strides = [1, 1]} : vector<1x128xf32> to vector<1x32xf32>
    %83 = vector.extract_strided_slice %79 {offsets = [0, 96], sizes = [1, 32], strides = [1, 1]} : vector<1x128xf32> to vector<1x32xf32>
    %84 = arith.mulf %81, %53 : vector<1x32xf32>
    %85 = arith.mulf %80, %82 : vector<1x32xf32>
    %86 = arith.addf %84, %85 : vector<1x32xf32>
    %87 = math.tanh %86 : vector<1x32xf32>
    %88 = arith.mulf %83, %87 : vector<1x32xf32>
    %c0_57 = arith.constant 0 : index
    %c0_58 = arith.constant 0 : index
    %89 = vector.load %arg11[%c0_57, %c0_58] : memref<8x32xf32, #tpu.memory_space<vmem>>, vector<1x32xf32>
    tpu.vector_store %arg11[%c0_57, %c0_58], %88 {strides = array<i32>} : memref<8x32xf32, #tpu.memory_space<vmem>>, vector<1x32xf32>,
    %90 = vector.extract_strided_slice %45 {offsets = [1, 0], sizes = [1, 128], strides = [1, 1]} : vector<8x128xf32> to vector<1x128xf32>
    %cst_59 = arith.constant dense<0.000000e+00> : vector<1x128xf32>
    %91 = tpu.matmul %70, %46, %cst_59 {dimension_numbers = #tpu.dot_dimension_numbers<[1], [0], [0], [1], [0, 0, 1, 1], [], []>, precision = #tpu.contract_precision<fp32>} : vector<1x32xf32>, vector<32x128xf32>, vector<1x128xf32> -> vector<1x128xf32>
    %92 = arith.addf %90, %91 : vector<1x128xf32>
    %93 = math.tanh %92 : vector<1x128xf32>
    %cst_60 = arith.constant 5.000000e-01 : f32
    %94 = vector.broadcast %cst_60 : f32 to vector<1x128xf32>
    %95 = arith.mulf %94, %93 : vector<1x128xf32>
    %cst_61 = arith.constant 5.000000e-01 : f32
    %96 = vector.broadcast %cst_61 : f32 to vector<1x128xf32>
    %97 = arith.addf %95, %96 : vector<1x128xf32>
    %98 = vector.extract_strided_slice %97 {offsets = [0, 0], sizes = [1, 32], strides = [1, 1]} : vector<1x128xf32> to vector<1x32xf32>
    %99 = vector.extract_strided_slice %97 {offsets = [0, 32], sizes = [1, 32], strides = [1, 1]} : vector<1x128xf32> to vector<1x32xf32>
    %100 = vector.extract_strided_slice %93 {offsets = [0, 64], sizes = [1, 32], strides = [1, 1]} : vector<1x128xf32> to vector<1x32xf32>
    %101 = vector.extract_strided_slice %97 {offsets = [0, 96], sizes = [1, 32], strides = [1, 1]} : vector<1x128xf32> to vector<1x32xf32>
    %102 = arith.mulf %99, %68 : vector<1x32xf32>
    %103 = arith.mulf %98, %100 : vector<1x32xf32>
    %104 = arith.addf %102, %103 : vector<1x32xf32>
    %105 = math.tanh %104 : vector<1x32xf32>
    %106 = arith.mulf %101, %105 : vector<1x32xf32>
    %cst_62 = arith.constant dense<0.000000e+00> : vector<1x128xf32>
    %107 = tpu.matmul %106, %47, %cst_62 {dimension_numbers = #tpu.dot_dimension_numbers<[1], [0], [0], [1], [0, 0, 1, 1], [], []>, precision = #tpu.contract_precision<fp32>} : vector<1x32xf32>, vector<32x128xf32>, vector<1x128xf32> -> vector<1x128xf32>
    %cst_63 = arith.constant dense<0.000000e+00> : vector<1x128xf32>
    %108 = tpu.matmul %88, %48, %cst_63 {dimension_numbers = #tpu.dot_dimension_numbers<[1], [0], [0], [1], [0, 0, 1, 1], [], []>, precision = #tpu.contract_precision<fp32>} : vector<1x32xf32>, vector<32x128xf32>, vector<1x128xf32> -> vector<1x128xf32>
    %109 = arith.addf %107, %108 : vector<1x128xf32>
    %110 = arith.addf %109, %49 : vector<1x128xf32>
    %111 = math.tanh %110 : vector<1x128xf32>
    %cst_64 = arith.constant 5.000000e-01 : f32
    %112 = vector.broadcast %cst_64 : f32 to vector<1x128xf32>
    %113 = arith.mulf %112, %111 : vector<1x128xf32>
    %cst_65 = arith.constant 5.000000e-01 : f32
    %114 = vector.broadcast %cst_65 : f32 to vector<1x128xf32>
    %115 = arith.addf %113, %114 : vector<1x128xf32>
    %116 = vector.extract_strided_slice %115 {offsets = [0, 0], sizes = [1, 32], strides = [1, 1]} : vector<1x128xf32> to vector<1x32xf32>
    %117 = vector.extract_strided_slice %115 {offsets = [0, 32], sizes = [1, 32], strides = [1, 1]} : vector<1x128xf32> to vector<1x32xf32>
    %118 = vector.extract_strided_slice %111 {offsets = [0, 64], sizes = [1, 32], strides = [1, 1]} : vector<1x128xf32> to vector<1x32xf32>
    %119 = vector.extract_strided_slice %115 {offsets = [0, 96], sizes = [1, 32], strides = [1, 1]} : vector<1x128xf32> to vector<1x32xf32>
    %120 = arith.mulf %117, %86 : vector<1x32xf32>
    %121 = arith.mulf %116, %118 : vector<1x32xf32>
    %122 = arith.addf %120, %121 : vector<1x32xf32>
    %123 = math.tanh %122 : vector<1x32xf32>
    %124 = arith.mulf %119, %123 : vector<1x32xf32>
    %c1_66 = arith.constant 1 : index
    %c0_67 = arith.constant 0 : index
    %125 = vector.load %arg11[%c1_66, %c0_67] : memref<8x32xf32, #tpu.memory_space<vmem>>, vector<1x32xf32>
    tpu.vector_store %arg11[%c1_66, %c0_67], %124 {strides = array<i32>} : memref<8x32xf32, #tpu.memory_space<vmem>>, vector<1x32xf32>,
    %126 = vector.extract_strided_slice %45 {offsets = [2, 0], sizes = [1, 128], strides = [1, 1]} : vector<8x128xf32> to vector<1x128xf32>
    %cst_68 = arith.constant dense<0.000000e+00> : vector<1x128xf32>
    %127 = tpu.matmul %106, %46, %cst_68 {dimension_numbers = #tpu.dot_dimension_numbers<[1], [0], [0], [1], [0, 0, 1, 1], [], []>, precision = #tpu.contract_precision<fp32>} : vector<1x32xf32>, vector<32x128xf32>, vector<1x128xf32> -> vector<1x128xf32>
    %128 = arith.addf %126, %127 : vector<1x128xf32>
    %129 = math.tanh %128 : vector<1x128xf32>
    %cst_69 = arith.constant 5.000000e-01 : f32
    %130 = vector.broadcast %cst_69 : f32 to vector<1x128xf32>
    %131 = arith.mulf %130, %129 : vector<1x128xf32>
    %cst_70 = arith.constant 5.000000e-01 : f32
    %132 = vector.broadcast %cst_70 : f32 to vector<1x128xf32>
    %133 = arith.addf %131, %132 : vector<1x128xf32>
    %134 = vector.extract_strided_slice %133 {offsets = [0, 0], sizes = [1, 32], strides = [1, 1]} : vector<1x128xf32> to vector<1x32xf32>
    %135 = vector.extract_strided_slice %133 {offsets = [0, 32], sizes = [1, 32], strides = [1, 1]} : vector<1x128xf32> to vector<1x32xf32>
    %136 = vector.extract_strided_slice %129 {offsets = [0, 64], sizes = [1, 32], strides = [1, 1]} : vector<1x128xf32> to vector<1x32xf32>
    %137 = vector.extract_strided_slice %133 {offsets = [0, 96], sizes = [1, 32], strides = [1, 1]} : vector<1x128xf32> to vector<1x32xf32>
    %138 = arith.mulf %135, %104 : vector<1x32xf32>
    %139 = arith.mulf %134, %136 : vector<1x32xf32>
    %140 = arith.addf %138, %139 : vector<1x32xf32>
    %141 = math.tanh %140 : vector<1x32xf32>
    %142 = arith.mulf %137, %141 : vector<1x32xf32>
    %cst_71 = arith.constant dense<0.000000e+00> : vector<1x128xf32>
    %143 = tpu.matmul %142, %47, %cst_71 {dimension_numbers = #tpu.dot_dimension_numbers<[1], [0], [0], [1], [0, 0, 1, 1], [], []>, precision = #tpu.contract_precision<fp32>} : vector<1x32xf32>, vector<32x128xf32>, vector<1x128xf32> -> vector<1x128xf32>
    %cst_72 = arith.constant dense<0.000000e+00> : vector<1x128xf32>
    %144 = tpu.matmul %124, %48, %cst_72 {dimension_numbers = #tpu.dot_dimension_numbers<[1], [0], [0], [1], [0, 0, 1, 1], [], []>, precision = #tpu.contract_precision<fp32>} : vector<1x32xf32>, vector<32x128xf32>, vector<1x128xf32> -> vector<1x128xf32>
    %145 = arith.addf %143, %144 : vector<1x128xf32>
    %146 = arith.addf %145, %49 : vector<1x128xf32>
    %147 = math.tanh %146 : vector<1x128xf32>
    %cst_73 = arith.constant 5.000000e-01 : f32
    %148 = vector.broadcast %cst_73 : f32 to vector<1x128xf32>
    %149 = arith.mulf %148, %147 : vector<1x128xf32>
    %cst_74 = arith.constant 5.000000e-01 : f32
    %150 = vector.broadcast %cst_74 : f32 to vector<1x128xf32>
    %151 = arith.addf %149, %150 : vector<1x128xf32>
    %152 = vector.extract_strided_slice %151 {offsets = [0, 0], sizes = [1, 32], strides = [1, 1]} : vector<1x128xf32> to vector<1x32xf32>
    %153 = vector.extract_strided_slice %151 {offsets = [0, 32], sizes = [1, 32], strides = [1, 1]} : vector<1x128xf32> to vector<1x32xf32>
    %154 = vector.extract_strided_slice %147 {offsets = [0, 64], sizes = [1, 32], strides = [1, 1]} : vector<1x128xf32> to vector<1x32xf32>
    %155 = vector.extract_strided_slice %151 {offsets = [0, 96], sizes = [1, 32], strides = [1, 1]} : vector<1x128xf32> to vector<1x32xf32>
    %156 = arith.mulf %153, %122 : vector<1x32xf32>
    %157 = arith.mulf %152, %154 : vector<1x32xf32>
    %158 = arith.addf %156, %157 : vector<1x32xf32>
    %159 = math.tanh %158 : vector<1x32xf32>
    %160 = arith.mulf %155, %159 : vector<1x32xf32>
    %c2_75 = arith.constant 2 : index
    %c0_76 = arith.constant 0 : index
    %161 = vector.load %arg11[%c2_75, %c0_76] : memref<8x32xf32, #tpu.memory_space<vmem>>, vector<1x32xf32>
    tpu.vector_store %arg11[%c2_75, %c0_76], %160 {strides = array<i32>} : memref<8x32xf32, #tpu.memory_space<vmem>>, vector<1x32xf32>,
    %162 = vector.extract_strided_slice %45 {offsets = [3, 0], sizes = [1, 128], strides = [1, 1]} : vector<8x128xf32> to vector<1x128xf32>
    %cst_77 = arith.constant dense<0.000000e+00> : vector<1x128xf32>
    %163 = tpu.matmul %142, %46, %cst_77 {dimension_numbers = #tpu.dot_dimension_numbers<[1], [0], [0], [1], [0, 0, 1, 1], [], []>, precision = #tpu.contract_precision<fp32>} : vector<1x32xf32>, vector<32x128xf32>, vector<1x128xf32> -> vector<1x128xf32>
    %164 = arith.addf %162, %163 : vector<1x128xf32>
    %165 = math.tanh %164 : vector<1x128xf32>
    %cst_78 = arith.constant 5.000000e-01 : f32
    %166 = vector.broadcast %cst_78 : f32 to vector<1x128xf32>
    %167 = arith.mulf %166, %165 : vector<1x128xf32>
    %cst_79 = arith.constant 5.000000e-01 : f32
    %168 = vector.broadcast %cst_79 : f32 to vector<1x128xf32>
    %169 = arith.addf %167, %168 : vector<1x128xf32>
    %170 = vector.extract_strided_slice %169 {offsets = [0, 0], sizes = [1, 32], strides = [1, 1]} : vector<1x128xf32> to vector<1x32xf32>
    %171 = vector.extract_strided_slice %169 {offsets = [0, 32], sizes = [1, 32], strides = [1, 1]} : vector<1x128xf32> to vector<1x32xf32>
    %172 = vector.extract_strided_slice %165 {offsets = [0, 64], sizes = [1, 32], strides = [1, 1]} : vector<1x128xf32> to vector<1x32xf32>
    %173 = vector.extract_strided_slice %169 {offsets = [0, 96], sizes = [1, 32], strides = [1, 1]} : vector<1x128xf32> to vector<1x32xf32>
    %174 = arith.mulf %171, %140 : vector<1x32xf32>
    %175 = arith.mulf %170, %172 : vector<1x32xf32>
    %176 = arith.addf %174, %175 : vector<1x32xf32>
    %177 = math.tanh %176 : vector<1x32xf32>
    %178 = arith.mulf %173, %177 : vector<1x32xf32>
    %cst_80 = arith.constant dense<0.000000e+00> : vector<1x128xf32>
    %179 = tpu.matmul %178, %47, %cst_80 {dimension_numbers = #tpu.dot_dimension_numbers<[1], [0], [0], [1], [0, 0, 1, 1], [], []>, precision = #tpu.contract_precision<fp32>} : vector<1x32xf32>, vector<32x128xf32>, vector<1x128xf32> -> vector<1x128xf32>
    %cst_81 = arith.constant dense<0.000000e+00> : vector<1x128xf32>
    %180 = tpu.matmul %160, %48, %cst_81 {dimension_numbers = #tpu.dot_dimension_numbers<[1], [0], [0], [1], [0, 0, 1, 1], [], []>, precision = #tpu.contract_precision<fp32>} : vector<1x32xf32>, vector<32x128xf32>, vector<1x128xf32> -> vector<1x128xf32>
    %181 = arith.addf %179, %180 : vector<1x128xf32>
    %182 = arith.addf %181, %49 : vector<1x128xf32>
    %183 = math.tanh %182 : vector<1x128xf32>
    %cst_82 = arith.constant 5.000000e-01 : f32
    %184 = vector.broadcast %cst_82 : f32 to vector<1x128xf32>
    %185 = arith.mulf %184, %183 : vector<1x128xf32>
    %cst_83 = arith.constant 5.000000e-01 : f32
    %186 = vector.broadcast %cst_83 : f32 to vector<1x128xf32>
    %187 = arith.addf %185, %186 : vector<1x128xf32>
    %188 = vector.extract_strided_slice %187 {offsets = [0, 0], sizes = [1, 32], strides = [1, 1]} : vector<1x128xf32> to vector<1x32xf32>
    %189 = vector.extract_strided_slice %187 {offsets = [0, 32], sizes = [1, 32], strides = [1, 1]} : vector<1x128xf32> to vector<1x32xf32>
    %190 = vector.extract_strided_slice %183 {offsets = [0, 64], sizes = [1, 32], strides = [1, 1]} : vector<1x128xf32> to vector<1x32xf32>
    %191 = vector.extract_strided_slice %187 {offsets = [0, 96], sizes = [1, 32], strides = [1, 1]} : vector<1x128xf32> to vector<1x32xf32>
    %192 = arith.mulf %189, %158 : vector<1x32xf32>
    %193 = arith.mulf %188, %190 : vector<1x32xf32>
    %194 = arith.addf %192, %193 : vector<1x32xf32>
    %195 = math.tanh %194 : vector<1x32xf32>
    %196 = arith.mulf %191, %195 : vector<1x32xf32>
    %c3_84 = arith.constant 3 : index
    %c0_85 = arith.constant 0 : index
    %197 = vector.load %arg11[%c3_84, %c0_85] : memref<8x32xf32, #tpu.memory_space<vmem>>, vector<1x32xf32>
    tpu.vector_store %arg11[%c3_84, %c0_85], %196 {strides = array<i32>} : memref<8x32xf32, #tpu.memory_space<vmem>>, vector<1x32xf32>,
    %198 = vector.extract_strided_slice %45 {offsets = [4, 0], sizes = [1, 128], strides = [1, 1]} : vector<8x128xf32> to vector<1x128xf32>
    %cst_86 = arith.constant dense<0.000000e+00> : vector<1x128xf32>
    %199 = tpu.matmul %178, %46, %cst_86 {dimension_numbers = #tpu.dot_dimension_numbers<[1], [0], [0], [1], [0, 0, 1, 1], [], []>, precision = #tpu.contract_precision<fp32>} : vector<1x32xf32>, vector<32x128xf32>, vector<1x128xf32> -> vector<1x128xf32>
    %200 = arith.addf %198, %199 : vector<1x128xf32>
    %201 = math.tanh %200 : vector<1x128xf32>
    %cst_87 = arith.constant 5.000000e-01 : f32
    %202 = vector.broadcast %cst_87 : f32 to vector<1x128xf32>
    %203 = arith.mulf %202, %201 : vector<1x128xf32>
    %cst_88 = arith.constant 5.000000e-01 : f32
    %204 = vector.broadcast %cst_88 : f32 to vector<1x128xf32>
    %205 = arith.addf %203, %204 : vector<1x128xf32>
    %206 = vector.extract_strided_slice %205 {offsets = [0, 0], sizes = [1, 32], strides = [1, 1]} : vector<1x128xf32> to vector<1x32xf32>
    %207 = vector.extract_strided_slice %205 {offsets = [0, 32], sizes = [1, 32], strides = [1, 1]} : vector<1x128xf32> to vector<1x32xf32>
    %208 = vector.extract_strided_slice %201 {offsets = [0, 64], sizes = [1, 32], strides = [1, 1]} : vector<1x128xf32> to vector<1x32xf32>
    %209 = vector.extract_strided_slice %205 {offsets = [0, 96], sizes = [1, 32], strides = [1, 1]} : vector<1x128xf32> to vector<1x32xf32>
    %210 = arith.mulf %207, %176 : vector<1x32xf32>
    %211 = arith.mulf %206, %208 : vector<1x32xf32>
    %212 = arith.addf %210, %211 : vector<1x32xf32>
    %213 = math.tanh %212 : vector<1x32xf32>
    %214 = arith.mulf %209, %213 : vector<1x32xf32>
    %cst_89 = arith.constant dense<0.000000e+00> : vector<1x128xf32>
    %215 = tpu.matmul %214, %47, %cst_89 {dimension_numbers = #tpu.dot_dimension_numbers<[1], [0], [0], [1], [0, 0, 1, 1], [], []>, precision = #tpu.contract_precision<fp32>} : vector<1x32xf32>, vector<32x128xf32>, vector<1x128xf32> -> vector<1x128xf32>
    %cst_90 = arith.constant dense<0.000000e+00> : vector<1x128xf32>
    %216 = tpu.matmul %196, %48, %cst_90 {dimension_numbers = #tpu.dot_dimension_numbers<[1], [0], [0], [1], [0, 0, 1, 1], [], []>, precision = #tpu.contract_precision<fp32>} : vector<1x32xf32>, vector<32x128xf32>, vector<1x128xf32> -> vector<1x128xf32>
    %217 = arith.addf %215, %216 : vector<1x128xf32>
    %218 = arith.addf %217, %49 : vector<1x128xf32>
    %219 = math.tanh %218 : vector<1x128xf32>
    %cst_91 = arith.constant 5.000000e-01 : f32
    %220 = vector.broadcast %cst_91 : f32 to vector<1x128xf32>
    %221 = arith.mulf %220, %219 : vector<1x128xf32>
    %cst_92 = arith.constant 5.000000e-01 : f32
    %222 = vector.broadcast %cst_92 : f32 to vector<1x128xf32>
    %223 = arith.addf %221, %222 : vector<1x128xf32>
    %224 = vector.extract_strided_slice %223 {offsets = [0, 0], sizes = [1, 32], strides = [1, 1]} : vector<1x128xf32> to vector<1x32xf32>
    %225 = vector.extract_strided_slice %223 {offsets = [0, 32], sizes = [1, 32], strides = [1, 1]} : vector<1x128xf32> to vector<1x32xf32>
    %226 = vector.extract_strided_slice %219 {offsets = [0, 64], sizes = [1, 32], strides = [1, 1]} : vector<1x128xf32> to vector<1x32xf32>
    %227 = vector.extract_strided_slice %223 {offsets = [0, 96], sizes = [1, 32], strides = [1, 1]} : vector<1x128xf32> to vector<1x32xf32>
    %228 = arith.mulf %225, %194 : vector<1x32xf32>
    %229 = arith.mulf %224, %226 : vector<1x32xf32>
    %230 = arith.addf %228, %229 : vector<1x32xf32>
    %231 = math.tanh %230 : vector<1x32xf32>
    %232 = arith.mulf %227, %231 : vector<1x32xf32>
    %c4_93 = arith.constant 4 : index
    %c0_94 = arith.constant 0 : index
    %233 = vector.load %arg11[%c4_93, %c0_94] : memref<8x32xf32, #tpu.memory_space<vmem>>, vector<1x32xf32>
    tpu.vector_store %arg11[%c4_93, %c0_94], %232 {strides = array<i32>} : memref<8x32xf32, #tpu.memory_space<vmem>>, vector<1x32xf32>,
    %234 = vector.extract_strided_slice %45 {offsets = [5, 0], sizes = [1, 128], strides = [1, 1]} : vector<8x128xf32> to vector<1x128xf32>
    %cst_95 = arith.constant dense<0.000000e+00> : vector<1x128xf32>
    %235 = tpu.matmul %214, %46, %cst_95 {dimension_numbers = #tpu.dot_dimension_numbers<[1], [0], [0], [1], [0, 0, 1, 1], [], []>, precision = #tpu.contract_precision<fp32>} : vector<1x32xf32>, vector<32x128xf32>, vector<1x128xf32> -> vector<1x128xf32>
    %236 = arith.addf %234, %235 : vector<1x128xf32>
    %237 = math.tanh %236 : vector<1x128xf32>
    %cst_96 = arith.constant 5.000000e-01 : f32
    %238 = vector.broadcast %cst_96 : f32 to vector<1x128xf32>
    %239 = arith.mulf %238, %237 : vector<1x128xf32>
    %cst_97 = arith.constant 5.000000e-01 : f32
    %240 = vector.broadcast %cst_97 : f32 to vector<1x128xf32>
    %241 = arith.addf %239, %240 : vector<1x128xf32>
    %242 = vector.extract_strided_slice %241 {offsets = [0, 0], sizes = [1, 32], strides = [1, 1]} : vector<1x128xf32> to vector<1x32xf32>
    %243 = vector.extract_strided_slice %241 {offsets = [0, 32], sizes = [1, 32], strides = [1, 1]} : vector<1x128xf32> to vector<1x32xf32>
    %244 = vector.extract_strided_slice %237 {offsets = [0, 64], sizes = [1, 32], strides = [1, 1]} : vector<1x128xf32> to vector<1x32xf32>
    %245 = vector.extract_strided_slice %241 {offsets = [0, 96], sizes = [1, 32], strides = [1, 1]} : vector<1x128xf32> to vector<1x32xf32>
    %246 = arith.mulf %243, %212 : vector<1x32xf32>
    %247 = arith.mulf %242, %244 : vector<1x32xf32>
    %248 = arith.addf %246, %247 : vector<1x32xf32>
    %249 = math.tanh %248 : vector<1x32xf32>
    %250 = arith.mulf %245, %249 : vector<1x32xf32>
    %cst_98 = arith.constant dense<0.000000e+00> : vector<1x128xf32>
    %251 = tpu.matmul %250, %47, %cst_98 {dimension_numbers = #tpu.dot_dimension_numbers<[1], [0], [0], [1], [0, 0, 1, 1], [], []>, precision = #tpu.contract_precision<fp32>} : vector<1x32xf32>, vector<32x128xf32>, vector<1x128xf32> -> vector<1x128xf32>
    %cst_99 = arith.constant dense<0.000000e+00> : vector<1x128xf32>
    %252 = tpu.matmul %232, %48, %cst_99 {dimension_numbers = #tpu.dot_dimension_numbers<[1], [0], [0], [1], [0, 0, 1, 1], [], []>, precision = #tpu.contract_precision<fp32>} : vector<1x32xf32>, vector<32x128xf32>, vector<1x128xf32> -> vector<1x128xf32>
    %253 = arith.addf %251, %252 : vector<1x128xf32>
    %254 = arith.addf %253, %49 : vector<1x128xf32>
    %255 = math.tanh %254 : vector<1x128xf32>
    %cst_100 = arith.constant 5.000000e-01 : f32
    %256 = vector.broadcast %cst_100 : f32 to vector<1x128xf32>
    %257 = arith.mulf %256, %255 : vector<1x128xf32>
    %cst_101 = arith.constant 5.000000e-01 : f32
    %258 = vector.broadcast %cst_101 : f32 to vector<1x128xf32>
    %259 = arith.addf %257, %258 : vector<1x128xf32>
    %260 = vector.extract_strided_slice %259 {offsets = [0, 0], sizes = [1, 32], strides = [1, 1]} : vector<1x128xf32> to vector<1x32xf32>
    %261 = vector.extract_strided_slice %259 {offsets = [0, 32], sizes = [1, 32], strides = [1, 1]} : vector<1x128xf32> to vector<1x32xf32>
    %262 = vector.extract_strided_slice %255 {offsets = [0, 64], sizes = [1, 32], strides = [1, 1]} : vector<1x128xf32> to vector<1x32xf32>
    %263 = vector.extract_strided_slice %259 {offsets = [0, 96], sizes = [1, 32], strides = [1, 1]} : vector<1x128xf32> to vector<1x32xf32>
    %264 = arith.mulf %261, %230 : vector<1x32xf32>
    %265 = arith.mulf %260, %262 : vector<1x32xf32>
    %266 = arith.addf %264, %265 : vector<1x32xf32>
    %267 = math.tanh %266 : vector<1x32xf32>
    %268 = arith.mulf %263, %267 : vector<1x32xf32>
    %c5_102 = arith.constant 5 : index
    %c0_103 = arith.constant 0 : index
    %269 = vector.load %arg11[%c5_102, %c0_103] : memref<8x32xf32, #tpu.memory_space<vmem>>, vector<1x32xf32>
    tpu.vector_store %arg11[%c5_102, %c0_103], %268 {strides = array<i32>} : memref<8x32xf32, #tpu.memory_space<vmem>>, vector<1x32xf32>,
    %270 = vector.extract_strided_slice %45 {offsets = [6, 0], sizes = [1, 128], strides = [1, 1]} : vector<8x128xf32> to vector<1x128xf32>
    %cst_104 = arith.constant dense<0.000000e+00> : vector<1x128xf32>
    %271 = tpu.matmul %250, %46, %cst_104 {dimension_numbers = #tpu.dot_dimension_numbers<[1], [0], [0], [1], [0, 0, 1, 1], [], []>, precision = #tpu.contract_precision<fp32>} : vector<1x32xf32>, vector<32x128xf32>, vector<1x128xf32> -> vector<1x128xf32>
    %272 = arith.addf %270, %271 : vector<1x128xf32>
    %273 = math.tanh %272 : vector<1x128xf32>
    %cst_105 = arith.constant 5.000000e-01 : f32
    %274 = vector.broadcast %cst_105 : f32 to vector<1x128xf32>
    %275 = arith.mulf %274, %273 : vector<1x128xf32>
    %cst_106 = arith.constant 5.000000e-01 : f32
    %276 = vector.broadcast %cst_106 : f32 to vector<1x128xf32>
    %277 = arith.addf %275, %276 : vector<1x128xf32>
    %278 = vector.extract_strided_slice %277 {offsets = [0, 0], sizes = [1, 32], strides = [1, 1]} : vector<1x128xf32> to vector<1x32xf32>
    %279 = vector.extract_strided_slice %277 {offsets = [0, 32], sizes = [1, 32], strides = [1, 1]} : vector<1x128xf32> to vector<1x32xf32>
    %280 = vector.extract_strided_slice %273 {offsets = [0, 64], sizes = [1, 32], strides = [1, 1]} : vector<1x128xf32> to vector<1x32xf32>
    %281 = vector.extract_strided_slice %277 {offsets = [0, 96], sizes = [1, 32], strides = [1, 1]} : vector<1x128xf32> to vector<1x32xf32>
    %282 = arith.mulf %279, %248 : vector<1x32xf32>
    %283 = arith.mulf %278, %280 : vector<1x32xf32>
    %284 = arith.addf %282, %283 : vector<1x32xf32>
    %285 = math.tanh %284 : vector<1x32xf32>
    %286 = arith.mulf %281, %285 : vector<1x32xf32>
    %cst_107 = arith.constant dense<0.000000e+00> : vector<1x128xf32>
    %287 = tpu.matmul %286, %47, %cst_107 {dimension_numbers = #tpu.dot_dimension_numbers<[1], [0], [0], [1], [0, 0, 1, 1], [], []>, precision = #tpu.contract_precision<fp32>} : vector<1x32xf32>, vector<32x128xf32>, vector<1x128xf32> -> vector<1x128xf32>
    %cst_108 = arith.constant dense<0.000000e+00> : vector<1x128xf32>
    %288 = tpu.matmul %268, %48, %cst_108 {dimension_numbers = #tpu.dot_dimension_numbers<[1], [0], [0], [1], [0, 0, 1, 1], [], []>, precision = #tpu.contract_precision<fp32>} : vector<1x32xf32>, vector<32x128xf32>, vector<1x128xf32> -> vector<1x128xf32>
    %289 = arith.addf %287, %288 : vector<1x128xf32>
    %290 = arith.addf %289, %49 : vector<1x128xf32>
    %291 = math.tanh %290 : vector<1x128xf32>
    %cst_109 = arith.constant 5.000000e-01 : f32
    %292 = vector.broadcast %cst_109 : f32 to vector<1x128xf32>
    %293 = arith.mulf %292, %291 : vector<1x128xf32>
    %cst_110 = arith.constant 5.000000e-01 : f32
    %294 = vector.broadcast %cst_110 : f32 to vector<1x128xf32>
    %295 = arith.addf %293, %294 : vector<1x128xf32>
    %296 = vector.extract_strided_slice %295 {offsets = [0, 0], sizes = [1, 32], strides = [1, 1]} : vector<1x128xf32> to vector<1x32xf32>
    %297 = vector.extract_strided_slice %295 {offsets = [0, 32], sizes = [1, 32], strides = [1, 1]} : vector<1x128xf32> to vector<1x32xf32>
    %298 = vector.extract_strided_slice %291 {offsets = [0, 64], sizes = [1, 32], strides = [1, 1]} : vector<1x128xf32> to vector<1x32xf32>
    %299 = vector.extract_strided_slice %295 {offsets = [0, 96], sizes = [1, 32], strides = [1, 1]} : vector<1x128xf32> to vector<1x32xf32>
    %300 = arith.mulf %297, %266 : vector<1x32xf32>
    %301 = arith.mulf %296, %298 : vector<1x32xf32>
    %302 = arith.addf %300, %301 : vector<1x32xf32>
    %303 = math.tanh %302 : vector<1x32xf32>
    %304 = arith.mulf %299, %303 : vector<1x32xf32>
    %c6_111 = arith.constant 6 : index
    %c0_112 = arith.constant 0 : index
    %305 = vector.load %arg11[%c6_111, %c0_112] : memref<8x32xf32, #tpu.memory_space<vmem>>, vector<1x32xf32>
    tpu.vector_store %arg11[%c6_111, %c0_112], %304 {strides = array<i32>} : memref<8x32xf32, #tpu.memory_space<vmem>>, vector<1x32xf32>,
    %306 = vector.extract_strided_slice %45 {offsets = [7, 0], sizes = [1, 128], strides = [1, 1]} : vector<8x128xf32> to vector<1x128xf32>
    %cst_113 = arith.constant dense<0.000000e+00> : vector<1x128xf32>
    %307 = tpu.matmul %286, %46, %cst_113 {dimension_numbers = #tpu.dot_dimension_numbers<[1], [0], [0], [1], [0, 0, 1, 1], [], []>, precision = #tpu.contract_precision<fp32>} : vector<1x32xf32>, vector<32x128xf32>, vector<1x128xf32> -> vector<1x128xf32>
    %308 = arith.addf %306, %307 : vector<1x128xf32>
    %309 = math.tanh %308 : vector<1x128xf32>
    %cst_114 = arith.constant 5.000000e-01 : f32
    %310 = vector.broadcast %cst_114 : f32 to vector<1x128xf32>
    %311 = arith.mulf %310, %309 : vector<1x128xf32>
    %cst_115 = arith.constant 5.000000e-01 : f32
    %312 = vector.broadcast %cst_115 : f32 to vector<1x128xf32>
    %313 = arith.addf %311, %312 : vector<1x128xf32>
    %314 = vector.extract_strided_slice %313 {offsets = [0, 0], sizes = [1, 32], strides = [1, 1]} : vector<1x128xf32> to vector<1x32xf32>
    %315 = vector.extract_strided_slice %313 {offsets = [0, 32], sizes = [1, 32], strides = [1, 1]} : vector<1x128xf32> to vector<1x32xf32>
    %316 = vector.extract_strided_slice %309 {offsets = [0, 64], sizes = [1, 32], strides = [1, 1]} : vector<1x128xf32> to vector<1x32xf32>
    %317 = vector.extract_strided_slice %313 {offsets = [0, 96], sizes = [1, 32], strides = [1, 1]} : vector<1x128xf32> to vector<1x32xf32>
    %318 = arith.mulf %315, %284 : vector<1x32xf32>
    %319 = arith.mulf %314, %316 : vector<1x32xf32>
    %320 = arith.addf %318, %319 : vector<1x32xf32>
    %321 = math.tanh %320 : vector<1x32xf32>
    %322 = arith.mulf %317, %321 : vector<1x32xf32>
    %cst_116 = arith.constant dense<0.000000e+00> : vector<1x128xf32>
    %323 = tpu.matmul %322, %47, %cst_116 {dimension_numbers = #tpu.dot_dimension_numbers<[1], [0], [0], [1], [0, 0, 1, 1], [], []>, precision = #tpu.contract_precision<fp32>} : vector<1x32xf32>, vector<32x128xf32>, vector<1x128xf32> -> vector<1x128xf32>
    %cst_117 = arith.constant dense<0.000000e+00> : vector<1x128xf32>
    %324 = tpu.matmul %304, %48, %cst_117 {dimension_numbers = #tpu.dot_dimension_numbers<[1], [0], [0], [1], [0, 0, 1, 1], [], []>, precision = #tpu.contract_precision<fp32>} : vector<1x32xf32>, vector<32x128xf32>, vector<1x128xf32> -> vector<1x128xf32>
    %325 = arith.addf %323, %324 : vector<1x128xf32>
    %326 = arith.addf %325, %49 : vector<1x128xf32>
    %327 = math.tanh %326 : vector<1x128xf32>
    %cst_118 = arith.constant 5.000000e-01 : f32
    %328 = vector.broadcast %cst_118 : f32 to vector<1x128xf32>
    %329 = arith.mulf %328, %327 : vector<1x128xf32>
    %cst_119 = arith.constant 5.000000e-01 : f32
    %330 = vector.broadcast %cst_119 : f32 to vector<1x128xf32>
    %331 = arith.addf %329, %330 : vector<1x128xf32>
    %332 = vector.extract_strided_slice %331 {offsets = [0, 0], sizes = [1, 32], strides = [1, 1]} : vector<1x128xf32> to vector<1x32xf32>
    %333 = vector.extract_strided_slice %331 {offsets = [0, 32], sizes = [1, 32], strides = [1, 1]} : vector<1x128xf32> to vector<1x32xf32>
    %334 = vector.extract_strided_slice %327 {offsets = [0, 64], sizes = [1, 32], strides = [1, 1]} : vector<1x128xf32> to vector<1x32xf32>
    %335 = vector.extract_strided_slice %331 {offsets = [0, 96], sizes = [1, 32], strides = [1, 1]} : vector<1x128xf32> to vector<1x32xf32>
    %336 = arith.mulf %333, %302 : vector<1x32xf32>
    %337 = arith.mulf %332, %334 : vector<1x32xf32>
    %338 = arith.addf %336, %337 : vector<1x32xf32>
    %339 = math.tanh %338 : vector<1x32xf32>
    %340 = arith.mulf %335, %339 : vector<1x32xf32>
    %c7_120 = arith.constant 7 : index
    %c0_121 = arith.constant 0 : index
    %341 = vector.load %arg11[%c7_120, %c0_121] : memref<8x32xf32, #tpu.memory_space<vmem>>, vector<1x32xf32>
    tpu.vector_store %arg11[%c7_120, %c0_121], %340 {strides = array<i32>} : memref<8x32xf32, #tpu.memory_space<vmem>>, vector<1x32xf32>,
    %c0_122 = arith.constant 0 : index
    %c0_123 = arith.constant 0 : index
    %342 = vector.load %arg11[%c0_122, %c0_123] : memref<8x32xf32, #tpu.memory_space<vmem>>, vector<8x32xf32>
    %c0_124 = arith.constant 0 : index
    %c0_125 = arith.constant 0 : index
    %343 = vector.load %arg8[%c0_124, %c0_125] : memref<32x64xf32, #tpu.memory_space<vmem>>, vector<32x64xf32>
    %cst_126 = arith.constant dense<0.000000e+00> : vector<8x64xf32>
    %344 = tpu.matmul %342, %343, %cst_126 {dimension_numbers = #tpu.dot_dimension_numbers<[1], [0], [0], [1], [0, 0, 1, 1], [], []>, precision = #tpu.contract_precision<fp32>} : vector<8x32xf32>, vector<32x64xf32>, vector<8x64xf32> -> vector<8x64xf32>
    %c0_127 = arith.constant 0 : index
    %c0_128 = arith.constant 0 : index
    %345 = vector.load %arg9[%c0_127, %c0_128] : memref<1x64xf32, #tpu.memory_space<vmem>>, vector<1x64xf32>
    %346 = vector.broadcast %345 : vector<1x64xf32> to vector<8x64xf32>
    %347 = arith.addf %344, %346 : vector<8x64xf32>
    %c0_129 = arith.constant 0 : index
    %c0_130 = arith.constant 0 : index
    %348 = vector.load %arg10[%c0_129, %c0_130] : memref<8x64xf32, #tpu.memory_space<vmem>>, vector<8x64xf32>
    tpu.vector_store %arg10[%c0_129, %c0_130], %347 {strides = array<i32>} : memref<8x64xf32, #tpu.memory_space<vmem>>, vector<8x64xf32>,
    return
  }
}

</mosaic_0001>

<bundles_post_ra>
// kernel: songrnn_forward.1
= control target key start
LH: loop header
LB: loop body
LE: loop exit
PB: predicated region body
PF: predicated region fallthrough
CT: control target
= control target key end

     0   :  { %17 = vsyncpa [#allocation6], 0  ;;  %s18628_s0 = inlined_call_operand.vmem [shape: s32[8], index: 0, kind: input, shape index: {}]   ;;  %s18629_s1 = inlined_call_operand.vmem [shape: f32[50,1,32], index: 1, kind: input, shape index: {}]   ;;  %s18630_s2 = inlined_call_operand.vmem [shape: f32[32,128], index: 2, kind: input, shape index: {}]   ;;  %s18631_s3 = inlined_call_operand.vmem [shape: f32[32,128], index: 3, kind: input, shape index: {}]   ;;  %s18632_s4 = inlined_call_operand.hbm [shape: f32[1,128], index: 4, kind: input, shape index: {}]   ;;  %s18633_s5 = inlined_call_operand.vmem [shape: f32[32,128], index: 5, kind: input, shape index: {}]   ;;  %s18634_s6 = inlined_call_operand.hbm [shape: f32[32,128], index: 6, kind: input, shape index: {}]   ;;  %s18635_s7 = inlined_call_operand.hbm [shape: f32[1,128], index: 7, kind: input, shape index: {}]   ;;  %s18636_s8 = inlined_call_operand.hbm [shape: f32[32,64], index: 8, kind: input, shape index: {}]   ;;  %s18637_s9 = inlined_call_operand.hbm [shape: f32[1,64], index: 9, kind: input, shape index: {}]   ;;  %s18638_s10 = inlined_call_operand.hbm [shape: f32[8,64], index: 10, kind: output, shape index: {0}]   ;;  %s18639_s11 = inlined_call_operand.hbm [shape: f32[8,32], index: 11, kind: output, shape index: {1}]  }
   0x1   :  { %18 = vsyncpa [#allocation4], 0 }
   0x2   :  { %19 = vsyncpa [#allocation9], 0 }
   0x3   :  { %20 = vsyncpa [#allocation12], 0 }
   0x4   :  { %21 = vsyncpa [#allocation5], 0 }
   0x5   :  { %22 = vsyncpa [#allocation16], 0  ;;  %s17116_s17 = smov [#allocation8]   ;;  %s16938_s21 = scalar_lea.hbm %s18634_s6, 512 }
   0x6   :  { %s56_s18 = sshll.u32 %s17116_s17, 4  ;;  %p16939_p0 = scmp.ne.s32.totalorder %s18634_s6, %s16938_s21  ;;  %s57_s18 = int_to_ptr.vmem [resolvable:$true] %s56_s18 }
   0x7   :  { %p16942_p1 = scmp.lt.u32.totalorder %s16938_s21, %s18634_s6 }
   0x9   :  { %p16944_p2 = pnand %p16942_p1, %p16939_p0 }
   0xb   :  { %16947 = shalt.err (!%p16944_p2)
}
   0xc   :  { %s16948_s26 = scalar_lea.vmem %s57_s18, 512  ;;  %p16953_p4 = scmp.lt.s32.totalorder %s57_s18, %s57_s18 }
   0xd   :  { %p16949_p3 = scmp.ne.s32.totalorder %s57_s18, %s16948_s26  ;;  %p16954_p5 = scmp.lt.s32.totalorder %s16948_s26, %s16948_s26 }
   0xf   :  { %p16955_p6 = por %p16954_p5, %p16953_p4 }
  0x11   :  { %p16956_p7 = pnand %p16955_p6, %p16949_p3 }
  0x13   :  { %16959 = shalt.err (!%p16956_p7)
}
  0x14   :  { %s17117_s27 = smov 128   ;;  %s17118_s28 = smov 8  }
  0x15   :  { %62 = dma.hbm_to_vmem [thread:$0]  %s18634_s6, 512, %s57_s18, [#allocation9], %s17117_s27, %s17117_s27, %s17118_s28  }
  0x16   :  { %s17119_s12 = smov [#allocation11]   ;;  %s29_s16 = sshll.u32 %s18628_s0, 4  ;;  %s30_s16 = int_to_ptr.vmem [resolvable:$true] %s29_s16 }
  0x17   :  { %s78_s13 = sshll.u32 %s17119_s12, 4  ;;  %s16960_s20 = scalar_lea.hbm %s18636_s8, 512  ;;  %s79_s13 = int_to_ptr.vmem [resolvable:$true] %s78_s13 }
  0x18   :  { %p16961_p8 = scmp.ne.s32.totalorder %s18636_s8, %s16960_s20  ;;  %p16964_p9 = scmp.lt.u32.totalorder %s16960_s20, %s18636_s8 }
  0x1a   :  { %p16966_p10 = pnand %p16964_p9, %p16961_p8 }
  0x1c   :  { %16969 = shalt.err (!%p16966_p10)
}
  0x1d   :  { %s16970_s6 = scalar_lea.vmem %s79_s13, 512  ;;  %p16975_p12 = scmp.lt.s32.totalorder %s79_s13, %s79_s13 }
  0x1e   :  { %p16971_p11 = scmp.ne.s32.totalorder %s79_s13, %s16970_s6  ;;  %p16976_p13 = scmp.lt.s32.totalorder %s16970_s6, %s16970_s6 }
  0x20   :  { %p16977_p0 = por %p16976_p13, %p16975_p12 }
  0x22   :  { %p16978_p1 = pnand %p16977_p0, %p16971_p11 }
  0x24   :  { %16981 = shalt.err (!%p16978_p1)
}
  0x25   :  { %84 = dma.hbm_to_vmem [thread:$0]  %s18636_s8, 512, %s79_s13, [#allocation12], %s17117_s27, %s17117_s27, %s17118_s28  }
  0x26   :  { %s16982_s25 = scalar_lea.vmem %s30_s16, 16  ;;  %p16987_p3 = scmp.lt.s32.totalorder %s30_s16, %s30_s16 }
  0x27   :  { %p16983_p2 = scmp.ne.s32.totalorder %s30_s16, %s16982_s25  ;;  %p16988_p4 = scmp.lt.s32.totalorder %s16982_s25, %s16982_s25 }
  0x29   :  { %p16989_p5 = por %p16988_p4, %p16987_p3 }
  0x2b   :  { %p16990_p6 = pnand %p16989_p5, %p16983_p2 }
  0x2d   :  { %16993 = shalt.err (!%p16990_p6)
}
  0x2e   :  { %s17120_s26 = smov [#allocation3]   ;;  %s17121_s29 = smov [#allocation7]  }
  0x2f   :  { %32 = dma.vmem_to_smem %s30_s16, 16, %s17120_s26, [#allocation6]  }
  0x30   :  { %s45_s30 = sshll.u32 %s17121_s29, 4  ;;  %s17122_s12 = smov [#allocation10]   ;;  %s46_s30 = int_to_ptr.vmem [resolvable:$true] %s45_s30 }
  0x31   :  { %s69_s14 = sshll.u32 %s17122_s12, 4  ;;  %s16994_s19 = scalar_lea.hbm %s18632_s4, 16  ;;  %s70_s14 = int_to_ptr.vmem [resolvable:$true] %s69_s14 }
  0x32   :  { %p16995_p7 = scmp.ne.s32.totalorder %s18632_s4, %s16994_s19  ;;  %p16998_p8 = scmp.lt.u32.totalorder %s16994_s19, %s18632_s4 }
  0x34   :  { %p17000_p9 = pnand %p16998_p8, %p16995_p7 }
  0x36   :  { %17003 = shalt.err (!%p17000_p9)
}
  0x37   :  { %s17004_s13 = scalar_lea.vmem %s46_s30, 16  ;;  %s17008_s16 = scalar_lea.vmem %s46_s30, 32 }
  0x38   :  { %p17005_p10 = scmp.ne.s32.totalorder %s46_s30, %s17004_s13  ;;  %p17009_p11 = scmp.lt.s32.totalorder %s46_s30, %s46_s30 }
  0x39   :  { %p17010_p12 = scmp.lt.s32.totalorder %s17008_s16, %s17004_s13 }
  0x3b   :  { %p17011_p13 = por %p17010_p12, %p17009_p11 }
  0x3d   :  { %p17012_p0 = pnand %p17011_p13, %p17005_p10 }
  0x3f   :  { %17015 = shalt.err (!%p17012_p0)
}
  0x40   :  { %48 = dma.hbm_to_vmem [thread:$0]  %s18632_s4, 16, %s46_s30, [#allocation4]  }
  0x41   :  { %s17016_s6 = scalar_lea.hbm %s18635_s7, 16 }
  0x42   :  { %p17017_p1 = scmp.ne.s32.totalorder %s18635_s7, %s17016_s6  ;;  %p17020_p2 = scmp.lt.u32.totalorder %s17016_s6, %s18635_s7 }
  0x44   :  { %p17022_p3 = pnand %p17020_p2, %p17017_p1 }
  0x46   :  { %17025 = shalt.err (!%p17022_p3)
}
  0x47   :  { %s17026_s29 = scalar_lea.vmem %s70_s14, 16  ;;  %s17030_s12 = scalar_lea.vmem %s70_s14, 32 }
  0x48   :  { %p17027_p4 = scmp.ne.s32.totalorder %s70_s14, %s17026_s29  ;;  %p17031_p5 = scmp.lt.s32.totalorder %s70_s14, %s70_s14 }
  0x49   :  { %p17032_p6 = scmp.lt.s32.totalorder %s17030_s12, %s17026_s29 }
  0x4b   :  { %p17033_p7 = por %p17032_p6, %p17031_p5 }
  0x4d   :  { %p17034_p8 = pnand %p17033_p7, %p17027_p4 }
  0x4f   :  { %17037 = shalt.err (!%p17034_p8)
}
  0x50   :  { %72 = dma.hbm_to_vmem [thread:$0]  %s18635_s7, 16, %s70_s14, [#allocation9]  }
  0x51   :  { %s17123_s15 = smov [#allocation13]   ;;  %s17038_s8 = scalar_lea.hbm %s18637_s9, 16 }
  0x52   :  { %s91_s17 = sshll.u32 %s17123_s15, 4  ;;  %p17039_p9 = scmp.ne.s32.totalorder %s18637_s9, %s17038_s8  ;;  %s92_s17 = int_to_ptr.vmem [resolvable:$true] %s91_s17 }
  0x53   :  { %p17042_p10 = scmp.lt.u32.totalorder %s17038_s8, %s18637_s9 }
  0x55   :  { %p17044_p11 = pnand %p17042_p10, %p17039_p9 }
  0x57   :  { %17047 = shalt.err (!%p17044_p11)
}
  0x58   :  { %s17048_s21 = scalar_lea.vmem %s92_s17, 16  ;;  %s17052_s7 = scalar_lea.vmem %s92_s17, 32 }
  0x59   :  { %p17049_p12 = scmp.ne.s32.totalorder %s92_s17, %s17048_s21  ;;  %p17053_p13 = scmp.lt.s32.totalorder %s92_s17, %s92_s17 }
  0x5a   :  { %p17054_p0 = scmp.lt.s32.totalorder %s17052_s7, %s17048_s21 }
  0x5c   :  { %p17055_p1 = por %p17054_p0, %p17053_p13 }
  0x5e   :  { %p17056_p2 = pnand %p17055_p1, %p17049_p12 }
  0x60   :  { %17059 = shalt.err (!%p17056_p2)
}
  0x61   :  { %94 = dma.hbm_to_vmem [thread:$0]  %s18637_s9, 16, %s92_s17, [#allocation12]  }
  0x62   :  { %17104 = dma.done.wait [#allocation6], 16  }
  0x63   :  { %17105 = vsyncadd [#allocation6], 4294967280 }
  0x64   :  { %17106 = dma.done.wait [#allocation4], 16  }
  0x65   :  { %17107 = vsyncadd [#allocation4], 4294967280 }
  0x66   :  { %17108 = dma.done.wait [#allocation9], 528  }
  0x67   :  { %17109 = vsyncadd [#allocation9], 4294966768 }
  0x68   :  { %17110 = dma.done.wait [#allocation12], 528  }
  0x69   :  { %17111 = vsyncadd [#allocation12], 4294966768 }
  0x6a   :  { %113 = sfence }
  0x6b   :  { %v148_v0 = vld [vmem:[%s18630_s2] sm:$0xff]  ;;  %v149_v1 = vld [vmem:[%s18630_s2 + $0x8] sm:$0xff]  ;;  %v150_v2 = vld [vmem:[%s18630_s2 + $0x10] sm:$0xff]  ;;  %v17124_v3 = vmov 0.0|0.0   ;;  %s114_s29 = sld [smem:[#allocation3]]  ;;  %vm17125_vm0 = vmmov 0  }
  0x6c   :  { %15830 = vmatprep.subr.bf16.mxu1 %v17124_v3  ;;  %v164_v4 = vand.u32 4294901760, %v148_v0  ;;  %v167_v5 = vand.u32 4294901760, %v149_v1  ;;  %15848 = vmatprep.subr.bf16.mxu0 %v17124_v3  ;;  %v151_v6 = vld [vmem:[%s18630_s2 + $0x18] sm:$0xff]  ;;  %v170_v7 = vand.u32 4294901760, %v150_v2  ;;  %v17126_v9 = vmov 0.0   ;;  %s13325_s12 = sld [smem:[#allocation3 + $0x1]] }
  0x6d   :  { %v173_v8 = vand.u32 4294901760, %v151_v6  ;;  %14122 = vmatprep.mubr.msk.f32.mxu1 %vm17125_vm0, %v17126_v9  ;;  %s13326_s4 = sld [smem:[#allocation3 + $0x2]]  ;;  %14155 = vmatprep.mubr.msk.f32.mxu0 %vm17125_vm0, %v17126_v9  ;;  %s13327_s30 = sld [smem:[#allocation3 + $0x3]]  ;;  %vm117_vm1 = vcmask 253952   ;;  %vm159_vm2 = vcmask 261120   ;;  %v648_v46 = vld [vmem:[%s18631_s3] sm:$0xff] }
  0x6e   :  { %v17272_v10 = vpack.c.bf16 %v167_v5, %v164_v4  ;;  %s13328_s15 = sld [smem:[#allocation3 + $0x4]]  ;;  %s17274_s17 = sld [smem:[#allocation3 + $0x5]]  ;;  %v244_v20 = vsub.f32 %v148_v0, %v164_v4  ;;  %v251_v21 = vsub.f32 %v149_v1, %v167_v5  ;;  %v17325_v22 = vsub.f32 %v150_v2, %v170_v7  ;;  %v649_v47 = vld [vmem:[%s18631_s3 + $0x8] sm:$0xff]  ;;  %v650_v51 = vld [vmem:[%s18631_s3 + $0x10] sm:$0xff]  ;;  %v651_v52 = vld [vmem:[%s18631_s3 + $0x18] sm:$0xff] }
  0x6f   :  { %s17276_s2 = sld [smem:[#allocation3 + $0x6]]  ;;  %v17280_v11 = vpack.c.bf16 %v173_v8, %v170_v7  ;;  %s17282_s19 = sld [smem:[#allocation3 + $0x7]]  ;;  %v17327_v23 = vsub.f32 %v151_v6, %v173_v8  ;;  %v665_v49 = vand.u32 4294901760, %v648_v46  ;;  %v668_v50 = vand.u32 4294901760, %v649_v47 }
  0x70   :  { %15832 = vmatpush3.bf16.msra.mxu1 %v17272_v10  ;;  %15850 = vmatpush3.bf16.msra.mxu0 %v17272_v10  ;;  %v245_v24 = vand.u32 4294901760, %v244_v20  ;;  %v252_v25 = vand.u32 4294901760, %v251_v21  ;;  %v259_v27 = vand.u32 4294901760, %v17325_v22  ;;  %v15843_v53 = vpack.c.bf16 %v251_v21, %v244_v20  ;;  %s17127_s3 = smov 64  }
  0x71   :  { %15833 = vmatprep.subr.bf16.mxu1 %v17124_v3  ;;  %15851 = vmatprep.subr.bf16.mxu0 %v17124_v3  ;;  %s115_s27 = scalar_lea.vmem %s18629_s1, %s114_s29  ;;  %v266_v31 = vand.u32 4294901760, %v17327_v23  ;;  %v671_v54 = vand.u32 4294901760, %v650_v51  ;;  %v674_v55 = vand.u32 4294901760, %v651_v52  ;;  %v745_v56 = vsub.f32 %v648_v46, %v665_v49 }
  0x72   :  { %v116_v12 = vld [vmem:[%s115_s27] sm:$0x1]  ;;  %s120_s16 = scalar_lea.vmem %s18629_s1, %s13325_s12  ;;  %v246_v29 = vsub.f32 %v244_v20, %v245_v24  ;;  %v253_v30 = vsub.f32 %v251_v21, %v252_v25  ;;  %v15855_v34 = vpack.c.bf16 %v252_v25, %v245_v24  ;;  %v260_v37 = vsub.f32 %v17325_v22, %v259_v27  ;;  %v13332_v20 = vld [vmem:[#allocation7] ss:$0 sm:$0xff] }
  0x73   :  { %s124_s14 = scalar_lea.vmem %s18629_s1, %s13326_s4  ;;  %118 = vst.msk [vmem:[#allocation2] sm:$0x1] %vm117_vm1, %v116_v12  ;;  %v121_v13 = vld [vmem:[%s120_s16] sm:$0x1]  ;;  %s128_s24 = scalar_lea.vmem %s18629_s1, %s13327_s30  ;;  %v267_v38 = vsub.f32 %v17327_v23, %v266_v31  ;;  %v15858_v45 = vpack.c.bf16 %v266_v31, %v259_v27  ;;  %v752_v57 = vsub.f32 %v649_v47, %v668_v50  ;;  %v15846_v58 = vpack.c.bf16 %v17327_v23, %v17325_v22 }
  0x74   :  { %15835 = vmatpush3.bf16.msra.mxu1 %v17280_v11  ;;  %15853 = vmatpush3.bf16.msra.mxu0 %v17280_v11  ;;  %v125_v14 = vld [vmem:[%s124_s14] sm:$0x1]  ;;  %s132_s18 = scalar_lea.vmem %s18629_s1, %s13328_s15  ;;  %122 = vst.msk [vmem:[#allocation2 + $0x1] sm:$0x1] %vm117_vm1, %v121_v13  ;;  %s136_s26 = scalar_lea.vmem %s18629_s1, %s17274_s17  ;;  %v247_v35 = vand.u32 4294901760, %v246_v29  ;;  %v254_v36 = vand.u32 4294901760, %v253_v30  ;;  %v759_v61 = vsub.f32 %v650_v51, %v671_v54  ;;  %v766_v62 = vsub.f32 %v651_v52, %v674_v55 }
  0x75   :  { %15836 = vmatprep.subr.bf16.mxu1 %v17124_v3  ;;  %126 = vst.msk [vmem:[#allocation2 + $0x2] sm:$0x1] %vm117_vm1, %v125_v14  ;;  %v129_v15 = vld [vmem:[%s128_s24] sm:$0x1]  ;;  %s140_s4 = scalar_lea.vmem %s18629_s1, %s17276_s2  ;;  %15854 = vmatprep.subr.bf16.mxu0 %v17124_v3  ;;  %s144_s20 = scalar_lea.vmem %s18629_s1, %s17282_s19  ;;  %v261_v42 = vand.u32 4294901760, %v260_v37  ;;  %v268_v43 = vand.u32 4294901760, %v267_v38  ;;  %v17365_v63 = vpack.c.bf16 %v668_v50, %v665_v49  ;;  %v17370_v5 = vpack.c.bf16 %v674_v55, %v671_v54 }
  0x76   :  { %v133_v16 = vld [vmem:[%s132_s18] sm:$0x1]  ;;  %130 = vst.msk [vmem:[#allocation2 + $0x3] sm:$0x1] %vm117_vm1, %v129_v15  ;;  %v15837_v41 = vpack.c.bf16 %v254_v36, %v247_v35  ;;  %v746_v59 = vand.u32 4294901760, %v745_v56  ;;  %v753_v60 = vand.u32 4294901760, %v752_v57  ;;  %v17388_v15 = vpack.c.bf16 %v752_v57, %v745_v56 }
  0x77   :  { %134 = vst.msk [vmem:[#allocation2 + $0x4] sm:$0x1] %vm117_vm1, %v133_v16  ;;  %v137_v17 = vld [vmem:[%s136_s26] sm:$0x1]  ;;  %v15840_v48 = vpack.c.bf16 %v268_v43, %v261_v42  ;;  %v760_v2 = vand.u32 4294901760, %v759_v61  ;;  %v767_v4 = vand.u32 4294901760, %v766_v62  ;;  %v17393_v16 = vpack.c.bf16 %v766_v62, %v759_v61 }
  0x78   :  { %v141_v18 = vld [vmem:[%s140_s4] sm:$0x1]  ;;  %138 = vst.msk [vmem:[#allocation2 + $0x5] sm:$0x1] %vm117_vm1, %v137_v17  ;;  %v747_v0 = vsub.f32 %v745_v56, %v746_v59  ;;  %v754_v1 = vsub.f32 %v752_v57, %v753_v60  ;;  %v17406_v17 = vpack.c.bf16 %v753_v60, %v746_v59  ;;  %s17128_s16 = smov 32   ;;  %v656_v52 = vld [vmem:[#allocation8] sm:$0xff] }
  0x79   :  { %142 = vst.msk [vmem:[#allocation2 + $0x6] sm:$0x1] %vm117_vm1, %v141_v18  ;;  %v145_v19 = vld [vmem:[%s144_s20] sm:$0x1]  ;;  %v761_v8 = vsub.f32 %v759_v61, %v760_v2  ;;  %v17411_v18 = vpack.c.bf16 %v767_v4, %v760_v2  ;;  %v1171_v55 = vand.u32 4294901760, %v656_v52  ;;  %v659_v57 = vld [vmem:[#allocation8 + $0x18] sm:$0xff] }
  0x7a   :  { %146 = vst.msk [vmem:[#allocation2 + $0x7] sm:$0x1] %vm117_vm1, %v145_v19  ;;  %v748_v6 = vand.u32 4294901760, %v747_v0  ;;  %v755_v7 = vand.u32 4294901760, %v754_v1  ;;  %v658_v54 = vld [vmem:[#allocation8 + $0x10] sm:$0xff]  ;;  %v1180_v59 = vand.u32 4294901760, %v659_v57 }
  0x7b   :  { %v762_v12 = vand.u32 4294901760, %v761_v8  ;;  %v1251_v61 = vsub.f32 %v656_v52, %v1171_v55 }
  0x7c   :  { %v1272_v1 = vsub.f32 %v659_v57, %v1180_v59 }
  0x7d   :  { %v1252_v2 = vand.u32 4294901760, %v1251_v61 }
  0x7e   :  { %v1273_v8 = vand.u32 4294901760, %v1272_v1 }
  0x81   :  { %v147_v26 = vld [vmem:[#allocation2] sm:$0xff] }
  0x82   :  { %v161_v28 = vsel %vm159_vm2, %v147_v26, 0 }
  0x83   :  { %v232_v32 = vand.u32 4294901760, %v161_v28 }
  0x85   :  { %v233_v33 = vsub.f32 %v161_v28, %v232_v32 }
  0x87   :  { %v234_v39 = vand.u32 4294901760, %v233_v33 }
  0x89   :  { %v235_v40 = vsub.f32 %v233_v33, %v234_v39  ;;  %14156 = vmatmul.mubr.f32.vlgmr.msra.gmra.mrb[0].mxu0 %v234_v39 }
  0x8a   :  { %15856 = vmatpush3.bf16.msra.mxu0 %v15855_v34  ;;  %14166 = vmatprep.mubr.msk.f32.mxu0 %vm17125_vm0, %v17126_v9 }
  0x8b   :  { %v236_v44 = vand.u32 4294901760, %v235_v40  ;;  %15857 = vmatprep.subr.bf16.mxu0 %v17124_v3 }
  0x8d   :  { %14123 = vmatmul.mubr.f32.vlgmr.msra.gmra.mrb[0].mxu1 %v236_v44 }
  0x8e   :  { %15838 = vmatpush3.bf16.msra.mxu1 %v15837_v41  ;;  %14133 = vmatprep.mubr.msk.f32.mxu1 %vm17125_vm0, %v17126_v9 }
  0x8f   :  { %15839 = vmatprep.subr.bf16.mxu1 %v17124_v3  ;;  %15859 = vmatpush3.bf16.msra.mxu0 %v15858_v45 }
  0x90   :  { %15860 = vmatprep.subr.bf16.mxu0 %v17124_v3 }
  0x92   :  { %15841 = vmatpush3.bf16.msra.mxu1 %v15840_v48  ;;  %14167 = vmatmul.mubr.f32.vlgmr.msra.gmra.mrb[0].mxu0 %v232_v32 }
  0x93   :  { %15842 = vmatprep.subr.bf16.mxu1 %v17124_v3  ;;  %15862 = vmatpush3.bf16.msra.mxu0 %v17272_v10  ;;  %v768_v10 = vsub.f32 %v766_v62, %v767_v4 }
  0x94   :  { %15863 = vmatprep.subr.bf16.mxu0 %v17124_v3  ;;  %14177 = vmatprep.mubr.msk.f32.mxu0 %vm17125_vm0, %v17126_v9 }
  0x95   :  { %14134 = vmatmul.mubr.f32.vlgmr.msra.gmra.mrb[0].mxu1 %v232_v32  ;;  %v769_v13 = vand.u32 4294901760, %v768_v10  ;;  %v1253_v10 = vsub.f32 %v1251_v61, %v1252_v2 }
  0x96   :  { %15844 = vmatpush3.bf16.msra.mxu1 %v15843_v53  ;;  %14144 = vmatprep.mubr.msk.f32.mxu1 %vm17125_vm0, %v17126_v9  ;;  %v657_v53 = vld [vmem:[#allocation8 + $0x8] sm:$0xff] }
  0x97   :  { %15845 = vmatprep.subr.bf16.mxu1 %v17124_v3  ;;  %15865 = vmatpush3.bf16.msra.mxu0 %v17280_v11  ;;  %v17377_v11 = vpack.c.bf16 %v755_v7, %v748_v6  ;;  %v17382_v14 = vpack.c.bf16 %v769_v13, %v762_v12  ;;  %v1174_v56 = vand.u32 4294901760, %v657_v53 }
  0x98   :  { %15902 = vmatprep.subr.bf16.mxu0 %v17124_v3 }
  0x99   :  { %v17440_v60 = vpack.c.bf16 %v1174_v56, %v1171_v55  ;;  %v1258_v62 = vsub.f32 %v657_v53, %v1174_v56 }
  0x9a   :  { %15847 = vmatpush3.bf16.msra.mxu1 %v15846_v58  ;;  %14178 = vmatmul.mubr.f32.vlgmr.msra.gmra.mrb[0].mxu0 %v232_v32  ;;  %v1177_v58 = vand.u32 4294901760, %v658_v54 }
  0x9b   :  { %15866 = vmatprep.subr.bf16.mxu1 %v17124_v3  ;;  %14254 = vmatprep.mubr.msk.f32.mxu0 %vm17125_vm0, %v17126_v9  ;;  %v1259_v4 = vand.u32 4294901760, %v1258_v62 }
  0x9c   :  { %v1265_v0 = vsub.f32 %v658_v54, %v1177_v58  ;;  %15904 = vmatpush3.bf16.msra.mxu0 %v17440_v60  ;;  %v17443_v6 = vpack.c.bf16 %v1180_v59, %v1177_v58 }
  0x9d   :  { %14145 = vmatmul.mubr.f32.vlgmr.msra.gmra.mrb[0].mxu1 %v233_v33  ;;  %15905 = vmatprep.subr.bf16.mxu0 %v17124_v3  ;;  %v1260_v12 = vsub.f32 %v1258_v62, %v1259_v4 }
  0x9e   :  { %15868 = vmatpush3.bf16.msra.mxu1 %v17365_v63  ;;  %14188 = vmatprep.mubr.msk.f32.mxu1 %vm17125_vm0, %v17126_v9  ;;  %v1266_v7 = vand.u32 4294901760, %v1265_v0 }
  0x9f   :  { %15869 = vmatprep.subr.bf16.mxu1 %v17124_v3 }
  0xa0   :  { %v1267_v13 = vsub.f32 %v1265_v0, %v1266_v7  ;;  %15907 = vmatpush3.bf16.msra.mxu0 %v17443_v6 }
  0xa1   :  { %15914 = vmatprep.subr.bf16.mxu0 %v17124_v3 }
  0xa2   :  { %15871 = vmatpush3.bf16.msra.mxu1 %v17370_v5 }
  0xa3   :  { %15872 = vmatprep.subr.bf16.mxu1 %v17124_v3  ;;  %14255 = vmatmul.mubr.f32.vlgmr.msra.gmra.mrb[2].mxu0 %v17126_v9 }
  0xa4   :  { %14276 = vmatprep.mubr.msk.f32.mxu0 %vm17125_vm0, %v17126_v9 }
  0xa5   :  { %14189 = vmatmul.mubr.f32.vlgmr.msra.gmra.mrb[2].mxu1 %v17126_v9 }
  0xa6   :  { %15874 = vmatpush3.bf16.msra.mxu1 %v17377_v11  ;;  %14199 = vmatprep.mubr.msk.f32.mxu1 %vm17125_vm0, %v17126_v9 }
  0xa7   :  { %15875 = vmatprep.subr.bf16.mxu1 %v17124_v3 }
  0xaa   :  { %15877 = vmatpush3.bf16.msra.mxu1 %v17382_v14 }
  0xab   :  { %15878 = vmatprep.subr.bf16.mxu1 %v17124_v3 }
  0xad   :  { %14200 = vmatmul.mubr.f32.vlgmr.msra.gmra.mrb[4].mxu1 %v17126_v9 }
  0xae   :  { %15880 = vmatpush3.bf16.msra.mxu1 %v17388_v15  ;;  %14210 = vmatprep.mubr.msk.f32.mxu1 %vm17125_vm0, %v17126_v9 }
  0xaf   :  { %15881 = vmatprep.subr.bf16.mxu1 %v17124_v3 }
  0xb2   :  { %15883 = vmatpush3.bf16.msra.mxu1 %v17393_v16 }
  0xb3   :  { %15884 = vmatprep.subr.bf16.mxu1 %v17124_v3 }
  0xb5   :  { %14211 = vmatmul.mubr.f32.vlgmr.msra.gmra.mrb[6].mxu1 %v17126_v9 }
  0xb6   :  { %15886 = vmatpush3.bf16.msra.mxu1 %v17365_v63  ;;  %14221 = vmatprep.mubr.msk.f32.mxu1 %vm17125_vm0, %v17126_v9 }
  0xb7   :  { %15887 = vmatprep.subr.bf16.mxu1 %v17124_v3 }
  0xba   :  { %15889 = vmatpush3.bf16.msra.mxu1 %v17370_v5 }
  0xbb   :  { %15890 = vmatprep.subr.bf16.mxu1 %v17124_v3 }
  0xbd   :  { %14222 = vmatmul.mubr.f32.vlgmr.msra.gmra.mrb[8].mxu1 %v17126_v9 }
  0xbe   :  { %15892 = vmatpush3.bf16.msra.mxu1 %v17406_v17  ;;  %14232 = vmatprep.mubr.msk.f32.mxu1 %vm17125_vm0, %v17126_v9 }
  0xbf   :  { %15893 = vmatprep.subr.bf16.mxu1 %v17124_v3 }
  0xc2   :  { %15895 = vmatpush3.bf16.msra.mxu1 %v17411_v18 }
  0xc3   :  { %15896 = vmatprep.subr.bf16.mxu1 %v17124_v3 }
  0xc5   :  { %14233 = vmatmul.mubr.f32.vlgmr.msra.gmra.mrb[10].mxu1 %v17126_v9 }
  0xc6   :  { %15898 = vmatpush3.bf16.msra.mxu1 %v17365_v63  ;;  %14243 = vmatprep.mubr.msk.f32.mxu1 %vm17125_vm0, %v17126_v9 }
  0xc7   :  { %15899 = vmatprep.subr.bf16.mxu1 %v17124_v3 }
  0xca   :  { %15901 = vmatpush3.bf16.msra.mxu1 %v17370_v5 }
  0xcb   :  { %15908 = vmatprep.subr.bf16.mxu1 %v17124_v3 }
  0xcd   :  { %14244 = vmatmul.mubr.f32.vlgmr.msra.gmra.mrb[12].mxu1 %v17126_v9 }
  0xce   :  { %14265 = vmatprep.mubr.msk.f32.mxu1 %vm17125_vm0, %v17126_v9 }
 0x16d   :  { %v644_v19 = vpop.f32.mrb[0].mxu0 }
 0x16e   :  { %v14179_v21 = vpop.f32.mrb[1].mxu0 }
 0x16f   :  { %v1261_v21 = vand.u32 4294901760, %v1260_v12 }
 0x170   :  { %v409_v22 = vpop.f32.mrb[0].mxu1 }
 0x171   :  { %v16766_v23 = vadd.f32 %v13332_v20, %v409_v22  ;;  %v14146_v24 = vpop.f32.mrb[1].mxu1  ;;  %v1254_v20 = vand.u32 4294901760, %v1253_v10  ;;  %v1268_v22 = vand.u32 4294901760, %v1267_v13 }
 0x173   :  { %v17428_v25 = vadd.f32 %v16766_v23, %v644_v19  ;;  %v1274_v19 = vsub.f32 %v1272_v1, %v1273_v8  ;;  %v17447_v23 = vpack.c.bf16 %v1258_v62, %v1251_v61 }
 0x175   :  { %15916 = vmatpush3.bf16.msra.mxu0 %v17447_v23 }
 0x176   :  { %15917 = vmatprep.subr.bf16.mxu0 %v17124_v3 }
 0x178   :  { %v739_v26 = vpop.f32.mrb[2].mxu1 }
 0x179   :  { %v14190_v27 = vpop.f32.mrb[3].mxu1 }
 0x17a   :  { %v652_v27 = vld [vmem:[%s18633_s5] sm:$0xff] }
 0x180   :  { %v830_v28 = vpop.f32.mrb[4].mxu1 }
 0x181   :  { %v831_v29 = vadd.f32 %v830_v28, %v739_v26  ;;  %v14201_v30 = vpop.f32.mrb[5].mxu1  ;;  %v1275_v26 = vand.u32 4294901760, %v1274_v19  ;;  %v653_v28 = vld [vmem:[%s18633_s5 + $0x8] sm:$0xff] }
 0x183   :  { %v17461_v30 = vpack.c.bf16 %v1275_v26, %v1268_v22 }
 0x188   :  { %v910_v31 = vpop.f32.mrb[6].mxu1 }
 0x189   :  { %v911_v32 = vadd.f32 %v910_v31, %v831_v29  ;;  %v14212_v33 = vpop.f32.mrb[7].mxu1  ;;  %v17457_v29 = vpack.c.bf16 %v1261_v21, %v1254_v20  ;;  %v17464_v31 = vpack.c.bf16 %v1272_v1, %v1265_v0 }
 0x18a   :  { %v1664_v33 = vand.u32 4294901760, %v653_v28 }
 0x18b   :  { %15910 = vmatpush3.bf16.msra.mxu1 %v17457_v29  ;;  %15919 = vmatpush3.bf16.msra.mxu0 %v17464_v31 }
 0x18c   :  { %15911 = vmatprep.subr.bf16.mxu1 %v17124_v3  ;;  %15926 = vmatprep.subr.bf16.mxu0 %v17124_v3 }
 0x18e   :  { %14277 = vmatmul.mubr.f32.vlgmr.msra.gmra.mrb[4].mxu0 %v17126_v9 }
 0x18f   :  { %15913 = vmatpush3.bf16.msra.mxu1 %v17461_v30  ;;  %14298 = vmatprep.mubr.msk.f32.mxu0 %vm17125_vm0, %v17126_v9 }
 0x190   :  { %v987_v34 = vpop.f32.mrb[8].mxu1  ;;  %15920 = vmatprep.subr.bf16.mxu1 %v17124_v3 }
 0x191   :  { %v988_v35 = vadd.f32 %v987_v34, %v911_v32  ;;  %v14223_v36 = vpop.f32.mrb[9].mxu1  ;;  %v1661_v32 = vand.u32 4294901760, %v652_v27  ;;  %v654_v34 = vld [vmem:[%s18633_s5 + $0x10] sm:$0xff] }
 0x192   :  { %14266 = vmatmul.mubr.f32.vlgmr.msra.gmra.mrb[14].mxu1 %v17126_v9 }
 0x193   :  { %v17478_v36 = vsub.f32 %v652_v27, %v1661_v32  ;;  %15922 = vmatpush3.bf16.msra.mxu1 %v17440_v60  ;;  %14287 = vmatprep.mubr.msk.f32.mxu1 %vm17125_vm0, %v17126_v9  ;;  %v17515_v52 = vpack.c.bf16 %v1664_v33, %v1661_v32 }
 0x194   :  { %15923 = vmatprep.subr.bf16.mxu1 %v17124_v3 }
 0x197   :  { %15925 = vmatpush3.bf16.msra.mxu1 %v17443_v6 }
 0x198   :  { %v1070_v37 = vpop.f32.mrb[10].mxu1  ;;  %15932 = vmatprep.subr.bf16.mxu1 %v17124_v3 }
 0x199   :  { %v1071_v38 = vadd.f32 %v1070_v37, %v988_v35  ;;  %v14234_v39 = vpop.f32.mrb[11].mxu1  ;;  %v655_v35 = vld [vmem:[%s18633_s5 + $0x18] sm:$0xff]  ;;  %v17480_v37 = vsub.f32 %v653_v28, %v1664_v33  ;;  %s17129_s5 = smov [#allocation15]  }
 0x19a   :  { %v1670_v39 = vand.u32 4294901760, %v655_v35  ;;  %14288 = vmatmul.mubr.f32.vlgmr.msra.gmra.mrb[16].mxu1 %v17126_v9  ;;  %s13301_s18 = sshll.u32 %s17129_s5, 4  ;;  %s13302_s18 = int_to_ptr.vmem [resolvable:$true] %s13301_s18 }
 0x19b   :  { %15934 = vmatpush3.bf16.msra.mxu1 %v17440_v60  ;;  %14309 = vmatprep.mubr.msk.f32.mxu1 %vm17125_vm0, %v17126_v9  ;;  %s17060_s25 = scalar_lea.vmem %s13302_s18, 128  ;;  %p17065_p4 = scmp.lt.s32.totalorder %s13302_s18, %s13302_s18 }
 0x19c   :  { %15935 = vmatprep.subr.bf16.mxu1 %v17124_v3  ;;  %p17061_p3 = scmp.ne.s32.totalorder %s13302_s18, %s17060_s25  ;;  %p17066_p5 = scmp.lt.s32.totalorder %s17060_s25, %s17060_s25 }
 0x19e   :  { %p17067_p6 = por %p17066_p5, %p17065_p4 }
 0x19f   :  { %15937 = vmatpush3.bf16.msra.mxu1 %v17443_v6 }
 0x1a0   :  { %v1145_v40 = vpop.f32.mrb[12].mxu1  ;;  %15944 = vmatprep.subr.bf16.mxu1 %v17124_v3  ;;  %p17068_p7 = pnand %p17067_p6, %p17061_p3 }
 0x1a1   :  { %v1146_v41 = vadd.f32 %v1145_v40, %v1071_v38  ;;  %v14245_v42 = vpop.f32.mrb[13].mxu1  ;;  %v1667_v38 = vand.u32 4294901760, %v654_v34  ;;  %v17484_v40 = vpack.c.bf16 %v1259_v4, %v1252_v2  ;;  %v1245_v2 = vpop.f32.mrb[2].mxu0 }
 0x1a2   :  { %v1749_v42 = vand.u32 4294901760, %v17480_v37  ;;  %14310 = vmatmul.mubr.f32.vlgmr.msra.gmra.mrb[18].mxu1 %v17126_v9  ;;  %v14256_v4 = vpop.f32.mrb[3].mxu0 }
 0x1a3   :  { %v1149_v43 = vadd.f32 %v17428_v25, %v1146_v41  ;;  %v1742_v41 = vand.u32 4294901760, %v17478_v36  ;;  %15928 = vmatpush3.bf16.msra.mxu0 %v17484_v40  ;;  %v17530_v57 = vpack.c.bf16 %v1670_v39, %v1667_v38  ;;  %14331 = vmatprep.mubr.msk.f32.mxu1 %vm17125_vm0, %v17126_v9 }
 0x1a4   :  { %15929 = vmatprep.subr.bf16.mxu0 %v17124_v3 }
 0x1a5   :  { %16872 = vtanh.f32 %v1149_v43  ;;  %v17493_v43 = vsub.f32 %v654_v34, %v1667_v38 }
 0x1af   :  { %v16873_v44 = vpop.eup %16872 }
 0x1b0   :  { %1155 = vrot.lane.b32.xlu0 %v16873_v44, %s17127_s3  ;;  %v1151_v45 = vmul.f32 0.5, %v16873_v44  ;;  %v17495_v44 = vsub.f32 %v655_v35, %v1670_v39 }
 0x1b2   :  { %v17432_v46 = vadd.f32 0.5, %v1151_v45  ;;  %v17499_v45 = vpack.c.bf16 %v1273_v8, %v1266_v7 }
 0x1b4   :  { %v1153_v49 = vmul.f32 0.0, %v17432_v46  ;;  %15931 = vmatpush3.bf16.msra.mxu0 %v17499_v45 }
 0x1b5   :  { %15938 = vmatprep.subr.bf16.mxu0 %v17124_v3 }
 0x1b7   :  { %14299 = vmatmul.mubr.f32.vlgmr.msra.gmra.mrb[6].mxu0 %v17126_v9 }
 0x1b8   :  { %15940 = vmatpush3.bf16.msra.mxu0 %v17515_v52  ;;  %14320 = vmatprep.mubr.msk.f32.mxu0 %vm17125_vm0, %v17126_v9 }
 0x1b9   :  { %15941 = vmatprep.subr.bf16.mxu0 %v17124_v3 }
 0x1bc   :  { %15943 = vmatpush3.bf16.msra.mxu0 %v17530_v57 }
 0x1bd   :  { %15950 = vmatprep.subr.bf16.mxu0 %v17124_v3 }
 0x222   :  { %v1156_v47 = vpop.permute.xlu0 %1155 }
 0x223   :  { %v1158_v48 = vmul.f32 %v1156_v47, %v17432_v46  ;;  %v1743_v47 = vsub.f32 %v17478_v36, %v1742_v41 }
 0x225   :  { %1160 = vrot.lane.b32.xlu0 %v1158_v48, %s17128_s16  ;;  %v1750_v48 = vsub.f32 %v17480_v37, %v1749_v42  ;;  %v1744_v53 = vand.u32 4294901760, %v1743_v47 }
 0x227   :  { %v1751_v54 = vand.u32 4294901760, %v1750_v48  ;;  %v17567_v48 = vpack.c.bf16 %v17480_v37, %v17478_v36 }
 0x229   :  { %v17537_v58 = vpack.c.bf16 %v1751_v54, %v1744_v53  ;;  %v17574_v54 = vpack.c.bf16 %v17495_v44, %v17493_v43 }
 0x22b   :  { %15946 = vmatpush3.bf16.msra.mxu1 %v17537_v58 }
 0x22c   :  { %15947 = vmatprep.subr.bf16.mxu1 %v17124_v3 }
 0x261   :  { %v1416_v8 = vpop.f32.mrb[4].mxu0 }
 0x262   :  { %v14278_v13 = vpop.f32.mrb[5].mxu0 }
 0x265   :  { %v1336_v7 = vpop.f32.mrb[14].mxu1 }
 0x266   :  { %v1337_v10 = vadd.f32 %v1336_v7, %v1245_v2  ;;  %v14267_v12 = vpop.f32.mrb[15].mxu1 }
 0x267   :  { %v17658_v12 = vld [vmem:[#allocation10] sm:$0x1] }
 0x268   :  { %v1417_v19 = vadd.f32 %v1416_v8, %v1337_v10 }
 0x26d   :  { %v1493_v20 = vpop.f32.mrb[16].mxu1 }
 0x26e   :  { %v1494_v21 = vadd.f32 %v1493_v20, %v1417_v19 }
 0x28a   :  { %v1576_v22 = vpop.f32.mrb[6].mxu0 }
 0x28b   :  { %v14300_v26 = vpop.f32.mrb[7].mxu0  ;;  %v1577_v28 = vadd.f32 %v1576_v22, %v1494_v21 }
 0x297   :  { %v1161_v50 = vpop.permute.xlu0 %1160 }
 0x298   :  { %v17437_v51 = vadd.f32 %v1161_v50, %v1153_v49  ;;  %v1756_v49 = vand.u32 4294901760, %v17493_v43  ;;  %v1763_v50 = vand.u32 4294901760, %v17495_v44 }
 0x29a   :  { %16874 = vtanh.f32 %v17437_v51  ;;  %v1757_v55 = vsub.f32 %v17493_v43, %v1756_v49  ;;  %v1764_v56 = vsub.f32 %v17495_v44, %v1763_v50 }
 0x29c   :  { %v1758_v59 = vand.u32 4294901760, %v1757_v55  ;;  %v1765_v61 = vand.u32 4294901760, %v1764_v56  ;;  %v17588_v55 = vpack.c.bf16 %v1749_v42, %v1742_v41  ;;  %v17598_v56 = vpack.c.bf16 %v1763_v50, %v1756_v49 }
 0x29e   :  { %v17544_v62 = vpack.c.bf16 %v1765_v61, %v1758_v59 }
 0x2a0   :  { %15949 = vmatpush3.bf16.msra.mxu1 %v17544_v62 }
 0x2a1   :  { %15956 = vmatprep.subr.bf16.mxu1 %v17124_v3 }
 0x2a4   :  { %v16875_v24 = vpop.eup %16874 }
 0x2a5   :  { %1166 = vrot.lane.b32.xlu1 %v16875_v24, %s17127_s3  ;;  %v14289_v24 = vpop.f32.mrb[17].mxu1 }
 0x2a6   :  { %v1651_v34 = vpop.f32.mrb[18].mxu1 }
 0x2a7   :  { %v17562_v38 = vadd.f32 %v1651_v34, %v1577_v28  ;;  %v14311_v39 = vpop.f32.mrb[19].mxu1 }
 0x317   :  { %v1167_v0 = vpop.permute.xlu1 %1166 }
 0x318   :  { %v1169_v1 = vmul.f32 %v1167_v0, %v17432_v46 }
 0x31a   :  { %1656 = vrot.lane.b32.xlu1 %v1169_v1, %s17128_s16 }
 0x38c   :  { %v1657_v27 = vpop.permute.xlu1 %1656 }
 0x38d   :  { %v1658_v32 = vsel %vm159_vm2, %v1657_v27, 0 }
 0x38e   :  { %v17554_v46 = vand.u32 4294901760, %v1658_v32 }
 0x390   :  { %v1730_v33 = vsub.f32 %v1658_v32, %v17554_v46  ;;  %14332 = vmatmul.mubr.f32.vlgmr.msra.gmra.mrb[20].mxu1 %v17554_v46 }
 0x391   :  { %15958 = vmatpush3.bf16.msra.mxu1 %v17515_v52  ;;  %14353 = vmatprep.mubr.msk.f32.mxu1 %vm17125_vm0, %v17126_v9 }
 0x392   :  { %15959 = vmatprep.subr.bf16.mxu1 %v17124_v3  ;;  %v1731_v35 = vand.u32 4294901760, %v1730_v33 }
 0x394   :  { %v1732_v47 = vsub.f32 %v1730_v33, %v1731_v35 }
 0x395   :  { %15961 = vmatpush3.bf16.msra.mxu1 %v17530_v57 }
 0x396   :  { %15968 = vmatprep.subr.bf16.mxu1 %v17124_v3  ;;  %v1733_v53 = vand.u32 4294901760, %v1732_v47 }
 0x398   :  { %14354 = vmatmul.mubr.f32.vlgmr.msra.gmra.mrb[22].mxu1 %v1731_v35  ;;  %14321 = vmatmul.mubr.f32.vlgmr.msra.gmra.mrb[8].mxu0 %v1733_v53 }
 0x399   :  { %15952 = vmatpush3.bf16.msra.mxu0 %v17567_v48  ;;  %15970 = vmatpush3.bf16.msra.mxu1 %v17515_v52 }
 0x39a   :  { %15953 = vmatprep.subr.bf16.mxu0 %v17124_v3  ;;  %15971 = vmatprep.subr.bf16.mxu1 %v17124_v3 }
 0x39b   :  { %14342 = vmatprep.mubr.msk.f32.mxu0 %vm17125_vm0, %v17126_v9  ;;  %14375 = vmatprep.mubr.msk.f32.mxu1 %vm17125_vm0, %v17126_v9 }
 0x39d   :  { %15955 = vmatpush3.bf16.msra.mxu0 %v17574_v54  ;;  %15973 = vmatpush3.bf16.msra.mxu1 %v17530_v57 }
 0x39e   :  { %15962 = vmatprep.subr.bf16.mxu0 %v17124_v3  ;;  %16010 = vmatprep.subr.bf16.mxu1 %v17124_v3 }
 0x3a0   :  { %14343 = vmatmul.mubr.f32.vlgmr.msra.gmra.mrb[10].mxu0 %v1730_v33  ;;  %14376 = vmatmul.mubr.f32.vlgmr.msra.gmra.mrb[24].mxu1 %v17554_v46 }
 0x3a1   :  { %15964 = vmatpush3.bf16.msra.mxu0 %v17588_v55  ;;  %14364 = vmatprep.mubr.msk.f32.mxu0 %vm17125_vm0, %v17126_v9 }
 0x3a2   :  { %15965 = vmatprep.subr.bf16.mxu0 %v17124_v3  ;;  %16012 = vmatpush3.bf16.msra.mxu1 %v17440_v60 }
 0x3a3   :  { %16013 = vmatprep.subr.bf16.mxu1 %v17124_v3  ;;  %14452 = vmatprep.mubr.msk.f32.mxu1 %vm17125_vm0, %v17126_v9 }
 0x3a5   :  { %15967 = vmatpush3.bf16.msra.mxu0 %v17598_v56 }
 0x3a6   :  { %15974 = vmatprep.subr.bf16.mxu0 %v17124_v3  ;;  %16015 = vmatpush3.bf16.msra.mxu1 %v17443_v6 }
 0x3a7   :  { %16016 = vmatprep.subr.bf16.mxu1 %v17124_v3 }
 0x3a8   :  { %14365 = vmatmul.mubr.f32.vlgmr.msra.gmra.mrb[12].mxu0 %v17554_v46 }
 0x3a9   :  { %15976 = vmatpush3.bf16.msra.mxu0 %v17365_v63  ;;  %14386 = vmatprep.mubr.msk.f32.mxu0 %vm17125_vm0, %v17126_v9 }
 0x3aa   :  { %15977 = vmatprep.subr.bf16.mxu0 %v17124_v3 }
 0x3ad   :  { %15979 = vmatpush3.bf16.msra.mxu0 %v17370_v5 }
 0x3ae   :  { %15980 = vmatprep.subr.bf16.mxu0 %v17124_v3 }
 0x3b0   :  { %14387 = vmatmul.mubr.f32.vlgmr.msra.gmra.mrb[14].mxu0 %v1733_v53 }
 0x3b1   :  { %15982 = vmatpush3.bf16.msra.mxu0 %v17377_v11  ;;  %14397 = vmatprep.mubr.msk.f32.mxu0 %vm17125_vm0, %v17126_v9 }
 0x3b2   :  { %15983 = vmatprep.subr.bf16.mxu0 %v17124_v3 }
 0x3b5   :  { %15985 = vmatpush3.bf16.msra.mxu0 %v17382_v14 }
 0x3b6   :  { %15986 = vmatprep.subr.bf16.mxu0 %v17124_v3 }
 0x3b8   :  { %14398 = vmatmul.mubr.f32.vlgmr.msra.gmra.mrb[14].mxu0 %v17554_v46 }
 0x3b9   :  { %15988 = vmatpush3.bf16.msra.mxu0 %v17388_v15  ;;  %14408 = vmatprep.mubr.msk.f32.mxu0 %vm17125_vm0, %v17126_v9 }
 0x3ba   :  { %15989 = vmatprep.subr.bf16.mxu0 %v17124_v3 }
 0x3bd   :  { %15991 = vmatpush3.bf16.msra.mxu0 %v17393_v16 }
 0x3be   :  { %15992 = vmatprep.subr.bf16.mxu0 %v17124_v3 }
 0x3c0   :  { %14409 = vmatmul.mubr.f32.vlgmr.msra.gmra.mrb[14].mxu0 %v1730_v33 }
 0x3c1   :  { %15994 = vmatpush3.bf16.msra.mxu0 %v17365_v63  ;;  %14419 = vmatprep.mubr.msk.f32.mxu0 %vm17125_vm0, %v17126_v9 }
 0x3c2   :  { %15995 = vmatprep.subr.bf16.mxu0 %v17124_v3 }
 0x3c5   :  { %15997 = vmatpush3.bf16.msra.mxu0 %v17370_v5 }
 0x3c6   :  { %15998 = vmatprep.subr.bf16.mxu0 %v17124_v3 }
 0x3c8   :  { %14420 = vmatmul.mubr.f32.vlgmr.msra.gmra.mrb[14].mxu0 %v1731_v35 }
 0x3c9   :  { %16000 = vmatpush3.bf16.msra.mxu0 %v17406_v17  ;;  %14430 = vmatprep.mubr.msk.f32.mxu0 %vm17125_vm0, %v17126_v9 }
 0x3ca   :  { %16001 = vmatprep.subr.bf16.mxu0 %v17124_v3 }
 0x3cd   :  { %16003 = vmatpush3.bf16.msra.mxu0 %v17411_v18 }
 0x3ce   :  { %16004 = vmatprep.subr.bf16.mxu0 %v17124_v3 }
 0x3d0   :  { %14431 = vmatmul.mubr.f32.vlgmr.msra.gmra.mrb[14].mxu0 %v17554_v46 }
 0x3d1   :  { %16006 = vmatpush3.bf16.msra.mxu0 %v17365_v63  ;;  %14441 = vmatprep.mubr.msk.f32.mxu0 %vm17125_vm0, %v17126_v9 }
 0x3d2   :  { %16007 = vmatprep.subr.bf16.mxu0 %v17124_v3 }
 0x3d5   :  { %16009 = vmatpush3.bf16.msra.mxu0 %v17370_v5 }
 0x3d6   :  { %16046 = vmatprep.subr.bf16.mxu0 %v17124_v3 }
 0x3d8   :  { %14442 = vmatmul.mubr.f32.vlgmr.msra.gmra.mrb[14].mxu0 %v17554_v46 }
 0x3d9   :  { %16048 = vmatpush3.bf16.msra.mxu0 %v17515_v52  ;;  %14518 = vmatprep.mubr.msk.f32.mxu0 %vm17125_vm0, %v17126_v9 }
 0x3da   :  { %16049 = vmatprep.subr.bf16.mxu0 %v17124_v3 }
 0x3dd   :  { %16051 = vmatpush3.bf16.msra.mxu0 %v17530_v57 }
 0x3de   :  { %16058 = vmatprep.subr.bf16.mxu0 %v17124_v3 }
 0x463   :  { %v1826_v36 = vpop.f32.mrb[20].mxu1 }
 0x464   :  { %v14333_v37 = vpop.f32.mrb[21].mxu1 }
 0x46b   :  { %v1983_v41 = vpop.f32.mrb[22].mxu1  ;;  %v1735_v42 = vpop.f32.mrb[8].mxu0 }
 0x46c   :  { %v1736_v43 = vadd.f32 %v1735_v42, %v17562_v38  ;;  %v14355_v44 = vpop.f32.mrb[23].mxu1  ;;  %v14322_v49 = vpop.f32.mrb[9].mxu0 }
 0x46e   :  { %v1827_v50 = vadd.f32 %v1826_v36, %v1736_v43 }
 0x473   :  { %v1906_v59 = vpop.f32.mrb[10].mxu0  ;;  %v2141_v61 = vpop.f32.mrb[24].mxu1 }
 0x474   :  { %v1907_v0 = vadd.f32 %v1906_v59, %v1827_v50  ;;  %v14344_v1 = vpop.f32.mrb[11].mxu0  ;;  %v14377_v2 = vpop.f32.mrb[25].mxu1 }
 0x476   :  { %v1984_v4 = vadd.f32 %v1983_v41, %v1907_v0  ;;  %v2664_v41 = vrot.slane %v17437_v51, 7 }
 0x47b   :  { %v2066_v7 = vpop.f32.mrb[12].mxu0 }
 0x47c   :  { %v2067_v8 = vadd.f32 %v2066_v7, %v1984_v4  ;;  %v14366_v10 = vpop.f32.mrb[13].mxu0 }
 0x47e   :  { %v2142_v13 = vadd.f32 %v2141_v61, %v2067_v8 }
 0x480   :  { %v2145_v19 = vadd.f32 %v2142_v13, %v17658_v12 }
 0x482   :  { %16876 = vtanh.f32 %v2145_v19 }
 0x48c   :  { %v16877_v20 = vpop.eup %16876 }
 0x48d   :  { %2151 = vrot.lane.b32.xlu0 %v16877_v20, %s17127_s3  ;;  %v2147_v28 = vmul.f32 0.5, %v16877_v20 }
 0x48f   :  { %v2148_v32 = vadd.f32 0.5, %v2147_v28 }
 0x491   :  { %v2149_v47 = vmul.f32 0.0, %v2148_v32 }
 0x4ab   :  { %v2652_v21 = vpop.f32.mrb[14].mxu0 }
 0x4ac   :  { %v2657_v22 = vrot.slane %v2652_v21, 7  ;;  %v14443_v24 = vpop.f32.mrb[15].mxu0 }
 0x4ae   :  { %v2659_v26 = vadd.f32 %v17428_v25, %v2657_v22 }
 0x4b0   :  { %16878 = vtanh.f32 %v2659_v26 }
 0x4ba   :  { %v16879_v27 = vpop.eup %16878 }
 0x4bb   :  { %2668 = vrot.lane.b32.xlu1 %v16879_v27, %s17127_s3  ;;  %v2661_v34 = vmul.f32 0.5, %v16879_v27 }
 0x4bd   :  { %v2662_v35 = vadd.f32 0.5, %v2661_v34 }
 0x4bf   :  { %v2666_v42 = vmul.f32 %v2664_v41, %v2662_v35 }
 0x4ff   :  { %v2152_v46 = vpop.permute.xlu0 %2151 }
 0x500   :  { %v2154_v33 = vmul.f32 %v2152_v46, %v2148_v32 }
 0x502   :  { %2156 = vrot.lane.b32.xlu0 %v2154_v33, %s17128_s16 }
 0x52d   :  { %v2669_v38 = vpop.permute.xlu1 %2668 }
 0x52e   :  { %v2671_v39 = vmul.f32 %v2669_v38, %v2662_v35 }
 0x530   :  { %2673 = vrot.lane.b32.xlu1 %v2671_v39, %s17128_s16 }
 0x574   :  { %v2157_v53 = vpop.permute.xlu0 %2156 }
 0x575   :  { %v17666_v36 = vadd.f32 %v2157_v53, %v2149_v47 }
 0x577   :  { %16880 = vtanh.f32 %v17666_v36 }
 0x581   :  { %v16881_v37 = vpop.eup %16880 }
 0x582   :  { %2162 = vrot.lane.b32.xlu0 %v16881_v37, %s17127_s3 }
 0x5a2   :  { %v2674_v43 = vpop.permute.xlu1 %2673 }
 0x5a3   :  { %v17671_v44 = vadd.f32 %v2674_v43, %v2666_v42 }
 0x5a5   :  { %16882 = vtanh.f32 %v17671_v44 }
 0x5af   :  { %v16883_v49 = vpop.eup %16882 }
 0x5b0   :  { %2679 = vrot.lane.b32.xlu1 %v16883_v49, %s17127_s3 }
 0x5f4   :  { %v2163_v50 = vpop.permute.xlu0 %2162 }
 0x5f5   :  { %v2165_v59 = vmul.f32 %v2163_v50, %v2148_v32 }
 0x5f7   :  { %2167 = vrot.lane.b32.xlu0 %v2165_v59, %s17128_s16 }
 0x622   :  { %v2680_v61 = vpop.permute.xlu1 %2679 }
 0x623   :  { %v2682_v0 = vmul.f32 %v2680_v61, %v2662_v35 }
 0x625   :  { %v3171_v1 = vrot.slane %v2682_v0, 1 }
 0x627   :  { %3172 = vrot.lane.b32.xlu1 %v3171_v1, %s17128_s16 }
 0x669   :  { %v2168_v2 = vpop.permute.xlu0 %2167 }
 0x66a   :  { %2170 = vst.msk [vmem:[#allocation15] sm:$0x1] %vm117_vm1, %v2168_v2  ;;  %v2683_v51 = vsel %vm159_vm2, %v2168_v2, 0 }
 0x66b   :  { %v2754_v4 = vand.u32 4294901760, %v2683_v51 }
 0x66d   :  { %v2755_v7 = vsub.f32 %v2683_v51, %v2754_v4 }
 0x66f   :  { %v2756_v8 = vand.u32 4294901760, %v2755_v7 }
 0x671   :  { %v2757_v10 = vsub.f32 %v2755_v7, %v2756_v8 }
 0x673   :  { %v2758_v13 = vand.u32 4294901760, %v2757_v10 }
 0x675   :  { %14453 = vmatmul.mubr.f32.vlgmr.msra.gmra.mrb[26].mxu1 %v2758_v13 }
 0x676   :  { %16018 = vmatpush3.bf16.msra.mxu1 %v17457_v29  ;;  %14463 = vmatprep.mubr.msk.f32.mxu1 %vm17125_vm0, %v17126_v9 }
 0x677   :  { %16019 = vmatprep.subr.bf16.mxu1 %v17124_v3 }
 0x67a   :  { %16021 = vmatpush3.bf16.msra.mxu1 %v17461_v30 }
 0x67b   :  { %16022 = vmatprep.subr.bf16.mxu1 %v17124_v3 }
 0x67d   :  { %14464 = vmatmul.mubr.f32.vlgmr.msra.gmra.mrb[28].mxu1 %v2754_v4 }
 0x67e   :  { %16024 = vmatpush3.bf16.msra.mxu1 %v17447_v23  ;;  %14474 = vmatprep.mubr.msk.f32.mxu1 %vm17125_vm0, %v17126_v9 }
 0x67f   :  { %16025 = vmatprep.subr.bf16.mxu1 %v17124_v3 }
 0x682   :  { %16027 = vmatpush3.bf16.msra.mxu1 %v17464_v31 }
 0x683   :  { %16028 = vmatprep.subr.bf16.mxu1 %v17124_v3 }
 0x685   :  { %14475 = vmatmul.mubr.f32.vlgmr.msra.gmra.mrb[30].mxu1 %v2755_v7 }
 0x686   :  { %16030 = vmatpush3.bf16.msra.mxu1 %v17440_v60  ;;  %14485 = vmatprep.mubr.msk.f32.mxu1 %vm17125_vm0, %v17126_v9 }
 0x687   :  { %16031 = vmatprep.subr.bf16.mxu1 %v17124_v3 }
 0x68a   :  { %16033 = vmatpush3.bf16.msra.mxu1 %v17443_v6 }
 0x68b   :  { %16034 = vmatprep.subr.bf16.mxu1 %v17124_v3 }
 0x68d   :  { %14486 = vmatmul.mubr.f32.vlgmr.msra.gmra.mrb[32].mxu1 %v2756_v8 }
 0x68e   :  { %16036 = vmatpush3.bf16.msra.mxu1 %v17484_v40  ;;  %14496 = vmatprep.mubr.msk.f32.mxu1 %vm17125_vm0, %v17126_v9 }
 0x68f   :  { %16037 = vmatprep.subr.bf16.mxu1 %v17124_v3 }
 0x692   :  { %16039 = vmatpush3.bf16.msra.mxu1 %v17499_v45 }
 0x693   :  { %16040 = vmatprep.subr.bf16.mxu1 %v17124_v3 }
 0x695   :  { %14497 = vmatmul.mubr.f32.vlgmr.msra.gmra.mrb[34].mxu1 %v2754_v4 }
 0x696   :  { %16042 = vmatpush3.bf16.msra.mxu1 %v17440_v60  ;;  %14507 = vmatprep.mubr.msk.f32.mxu1 %vm17125_vm0, %v17126_v9 }
 0x697   :  { %16043 = vmatprep.subr.bf16.mxu1 %v17124_v3 }
 0x699   :  { %v3173_v19 = vpop.permute.xlu1 %3172 }
 0x69a   :  { %v3174_v20 = vsel %vm159_vm2, %v3173_v19, 0  ;;  %16045 = vmatpush3.bf16.msra.mxu1 %v17443_v6 }
 0x69b   :  { %v17709_v21 = vand.u32 4294901760, %v3174_v20  ;;  %16052 = vmatprep.subr.bf16.mxu1 %v17124_v3 }
 0x69d   :  { %v3246_v22 = vsub.f32 %v3174_v20, %v17709_v21  ;;  %14508 = vmatmul.mubr.f32.vlgmr.msra.gmra.mrb[36].mxu1 %v2754_v4 }
 0x69e   :  { %16054 = vmatpush3.bf16.msra.mxu1 %v17537_v58  ;;  %14529 = vmatprep.mubr.msk.f32.mxu1 %vm17125_vm0, %v17126_v9 }
 0x69f   :  { %v3247_v24 = vand.u32 4294901760, %v3246_v22  ;;  %16055 = vmatprep.subr.bf16.mxu1 %v17124_v3 }
 0x6a1   :  { %v3248_v26 = vsub.f32 %v3246_v22, %v3247_v24 }
 0x6a2   :  { %16057 = vmatpush3.bf16.msra.mxu1 %v17544_v62 }
 0x6a3   :  { %16064 = vmatprep.subr.bf16.mxu1 %v17124_v3  ;;  %v3249_v27 = vand.u32 4294901760, %v3248_v26 }
 0x6a5   :  { %14530 = vmatmul.mubr.f32.vlgmr.msra.gmra.mrb[38].mxu1 %v17709_v21  ;;  %14519 = vmatmul.mubr.f32.vlgmr.msra.gmra.mrb[16].mxu0 %v3249_v27 }
 0x6a6   :  { %16060 = vmatpush3.bf16.msra.mxu0 %v17567_v48  ;;  %16066 = vmatpush3.bf16.msra.mxu1 %v17515_v52 }
 0x6a7   :  { %16061 = vmatprep.subr.bf16.mxu0 %v17124_v3  ;;  %16067 = vmatprep.subr.bf16.mxu1 %v17124_v3 }
 0x6a8   :  { %14540 = vmatprep.mubr.msk.f32.mxu0 %vm17125_vm0, %v17126_v9  ;;  %14551 = vmatprep.mubr.msk.f32.mxu1 %vm17125_vm0, %v17126_v9 }
 0x6aa   :  { %16063 = vmatpush3.bf16.msra.mxu0 %v17574_v54  ;;  %16069 = vmatpush3.bf16.msra.mxu1 %v17530_v57 }
 0x6ab   :  { %16070 = vmatprep.subr.bf16.mxu0 %v17124_v3  ;;  %16076 = vmatprep.subr.bf16.mxu1 %v17124_v3 }
 0x6ad   :  { %14541 = vmatmul.mubr.f32.vlgmr.msra.gmra.mrb[18].mxu0 %v3246_v22  ;;  %14552 = vmatmul.mubr.f32.vlgmr.msra.gmra.mrb[40].mxu1 %v3247_v24 }
 0x6ae   :  { %16072 = vmatpush3.bf16.msra.mxu0 %v17588_v55  ;;  %16078 = vmatpush3.bf16.msra.mxu1 %v17515_v52 }
 0x6af   :  { %16073 = vmatprep.subr.bf16.mxu0 %v17124_v3  ;;  %16079 = vmatprep.subr.bf16.mxu1 %v17124_v3 }
 0x6b0   :  { %14562 = vmatprep.mubr.msk.f32.mxu0 %vm17125_vm0, %v17126_v9  ;;  %14573 = vmatprep.mubr.msk.f32.mxu1 %vm17125_vm0, %v17126_v9 }
 0x6b2   :  { %16075 = vmatpush3.bf16.msra.mxu0 %v17598_v56  ;;  %16081 = vmatpush3.bf16.msra.mxu1 %v17530_v57 }
 0x6b3   :  { %16082 = vmatprep.subr.bf16.mxu0 %v17124_v3  ;;  %16118 = vmatprep.subr.bf16.mxu1 %v17124_v3 }
 0x6b5   :  { %14563 = vmatmul.mubr.f32.vlgmr.msra.gmra.mrb[20].mxu0 %v17709_v21  ;;  %14574 = vmatmul.mubr.f32.vlgmr.msra.gmra.mrb[42].mxu1 %v17709_v21 }
 0x6b6   :  { %16084 = vmatpush3.bf16.msra.mxu0 %v17365_v63  ;;  %14584 = vmatprep.mubr.msk.f32.mxu0 %vm17125_vm0, %v17126_v9 }
 0x6b7   :  { %16085 = vmatprep.subr.bf16.mxu0 %v17124_v3  ;;  %16120 = vmatpush3.bf16.msra.mxu1 %v17440_v60 }
 0x6b8   :  { %16121 = vmatprep.subr.bf16.mxu1 %v17124_v3  ;;  %14650 = vmatprep.mubr.msk.f32.mxu1 %vm17125_vm0, %v17126_v9 }
 0x6ba   :  { %16087 = vmatpush3.bf16.msra.mxu0 %v17370_v5 }
 0x6bb   :  { %16088 = vmatprep.subr.bf16.mxu0 %v17124_v3  ;;  %16123 = vmatpush3.bf16.msra.mxu1 %v17443_v6 }
 0x6bc   :  { %16124 = vmatprep.subr.bf16.mxu1 %v17124_v3 }
 0x6bd   :  { %14585 = vmatmul.mubr.f32.vlgmr.msra.gmra.mrb[22].mxu0 %v3249_v27 }
 0x6be   :  { %16090 = vmatpush3.bf16.msra.mxu0 %v17377_v11  ;;  %14595 = vmatprep.mubr.msk.f32.mxu0 %vm17125_vm0, %v17126_v9 }
 0x6bf   :  { %16091 = vmatprep.subr.bf16.mxu0 %v17124_v3 }
 0x6c2   :  { %16093 = vmatpush3.bf16.msra.mxu0 %v17382_v14 }
 0x6c3   :  { %16094 = vmatprep.subr.bf16.mxu0 %v17124_v3 }
 0x6c5   :  { %14596 = vmatmul.mubr.f32.vlgmr.msra.gmra.mrb[22].mxu0 %v17709_v21 }
 0x6c6   :  { %16096 = vmatpush3.bf16.msra.mxu0 %v17388_v15  ;;  %14606 = vmatprep.mubr.msk.f32.mxu0 %vm17125_vm0, %v17126_v9 }
 0x6c7   :  { %16097 = vmatprep.subr.bf16.mxu0 %v17124_v3 }
 0x6ca   :  { %16099 = vmatpush3.bf16.msra.mxu0 %v17393_v16 }
 0x6cb   :  { %16100 = vmatprep.subr.bf16.mxu0 %v17124_v3 }
 0x6cd   :  { %14607 = vmatmul.mubr.f32.vlgmr.msra.gmra.mrb[22].mxu0 %v3246_v22 }
 0x6ce   :  { %16102 = vmatpush3.bf16.msra.mxu0 %v17365_v63  ;;  %14617 = vmatprep.mubr.msk.f32.mxu0 %vm17125_vm0, %v17126_v9 }
 0x6cf   :  { %16103 = vmatprep.subr.bf16.mxu0 %v17124_v3 }
 0x6d2   :  { %16105 = vmatpush3.bf16.msra.mxu0 %v17370_v5 }
 0x6d3   :  { %16106 = vmatprep.subr.bf16.mxu0 %v17124_v3 }
 0x6d5   :  { %14618 = vmatmul.mubr.f32.vlgmr.msra.gmra.mrb[22].mxu0 %v3247_v24 }
 0x6d6   :  { %16108 = vmatpush3.bf16.msra.mxu0 %v17406_v17  ;;  %14628 = vmatprep.mubr.msk.f32.mxu0 %vm17125_vm0, %v17126_v9 }
 0x6d7   :  { %16109 = vmatprep.subr.bf16.mxu0 %v17124_v3 }
 0x6da   :  { %16111 = vmatpush3.bf16.msra.mxu0 %v17411_v18 }
 0x6db   :  { %16112 = vmatprep.subr.bf16.mxu0 %v17124_v3 }
 0x6dd   :  { %14629 = vmatmul.mubr.f32.vlgmr.msra.gmra.mrb[22].mxu0 %v17709_v21 }
 0x6de   :  { %16114 = vmatpush3.bf16.msra.mxu0 %v17365_v63  ;;  %14639 = vmatprep.mubr.msk.f32.mxu0 %vm17125_vm0, %v17126_v9 }
 0x6df   :  { %16115 = vmatprep.subr.bf16.mxu0 %v17124_v3 }
 0x6e2   :  { %16117 = vmatpush3.bf16.msra.mxu0 %v17370_v5 }
 0x6e3   :  { %16154 = vmatprep.subr.bf16.mxu0 %v17124_v3 }
 0x6e5   :  { %14640 = vmatmul.mubr.f32.vlgmr.msra.gmra.mrb[22].mxu0 %v17709_v21 }
 0x6e6   :  { %16156 = vmatpush3.bf16.msra.mxu0 %v17515_v52  ;;  %14716 = vmatprep.mubr.msk.f32.mxu0 %vm17125_vm0, %v17126_v9 }
 0x6e7   :  { %16157 = vmatprep.subr.bf16.mxu0 %v17124_v3 }
 0x6ea   :  { %16159 = vmatpush3.bf16.msra.mxu0 %v17530_v57 }
 0x6eb   :  { %16166 = vmatprep.subr.bf16.mxu0 %v17124_v3 }
 0x748   :  { %v2760_v28 = vpop.f32.mrb[26].mxu1 }
 0x749   :  { %v14454_v32 = vpop.f32.mrb[27].mxu1 }
 0x750   :  { %v2851_v46 = vpop.f32.mrb[28].mxu1 }
 0x751   :  { %v2852_v33 = vadd.f32 %v2851_v46, %v2760_v28  ;;  %v14465_v34 = vpop.f32.mrb[29].mxu1 }
 0x758   :  { %v2931_v35 = vpop.f32.mrb[30].mxu1 }
 0x759   :  { %v2932_v38 = vadd.f32 %v2931_v35, %v2852_v33  ;;  %v14476_v39 = vpop.f32.mrb[31].mxu1 }
 0x760   :  { %v3008_v47 = vpop.f32.mrb[32].mxu1 }
 0x761   :  { %v3009_v53 = vadd.f32 %v3008_v47, %v2932_v38  ;;  %v14487_v37 = vpop.f32.mrb[33].mxu1 }
 0x768   :  { %v3091_v41 = vpop.f32.mrb[34].mxu1 }
 0x769   :  { %v3092_v42 = vadd.f32 %v3091_v41, %v3009_v53  ;;  %v14498_v43 = vpop.f32.mrb[35].mxu1 }
 0x770   :  { %v3166_v49 = vpop.f32.mrb[36].mxu1 }
 0x771   :  { %v3167_v50 = vadd.f32 %v3166_v49, %v3092_v42  ;;  %v14509_v59 = vpop.f32.mrb[37].mxu1 }
 0x778   :  { %v3342_v61 = vpop.f32.mrb[38].mxu1  ;;  %v3251_v0 = vpop.f32.mrb[16].mxu0 }
 0x779   :  { %v3252_v1 = vadd.f32 %v3251_v0, %v3167_v50  ;;  %v14531_v2 = vpop.f32.mrb[39].mxu1  ;;  %v14520_v51 = vpop.f32.mrb[17].mxu0 }
 0x77a   :  { %v4180_v2 = vrot.slane %v17671_v44, 7 }
 0x77b   :  { %v3343_v4 = vadd.f32 %v3342_v61, %v3252_v1 }
 0x780   :  { %v3422_v7 = vpop.f32.mrb[18].mxu0  ;;  %v3499_v8 = vpop.f32.mrb[40].mxu1 }
 0x781   :  { %v3423_v10 = vadd.f32 %v3422_v7, %v3343_v4  ;;  %v14542_v13 = vpop.f32.mrb[19].mxu0  ;;  %v14553_v19 = vpop.f32.mrb[41].mxu1 }
 0x783   :  { %v3500_v20 = vadd.f32 %v3499_v8, %v3423_v10 }
 0x788   :  { %v3582_v21 = vpop.f32.mrb[20].mxu0  ;;  %v3657_v22 = vpop.f32.mrb[42].mxu1 }
 0x789   :  { %v3583_v24 = vadd.f32 %v3582_v21, %v3500_v20  ;;  %v14564_v26 = vpop.f32.mrb[21].mxu0  ;;  %v14575_v27 = vpop.f32.mrb[43].mxu1 }
 0x78b   :  { %v3658_v28 = vadd.f32 %v3657_v22, %v3583_v24 }
 0x78d   :  { %v3661_v32 = vadd.f32 %v3658_v28, %v17658_v12 }
 0x78f   :  { %16884 = vtanh.f32 %v3661_v32 }
 0x799   :  { %v16885_v46 = vpop.eup %16884 }
 0x79a   :  { %3667 = vrot.lane.b32.xlu0 %v16885_v46, %s17127_s3  ;;  %v3663_v47 = vmul.f32 0.5, %v16885_v46 }
 0x79c   :  { %v3664_v53 = vadd.f32 0.5, %v3663_v47 }
 0x79e   :  { %v3665_v59 = vmul.f32 %v3664_v53, %v17666_v36 }
 0x7b8   :  { %v4168_v33 = vpop.f32.mrb[22].mxu0 }
 0x7b9   :  { %v4173_v34 = vrot.slane %v4168_v33, 6  ;;  %v14641_v35 = vpop.f32.mrb[23].mxu0 }
 0x7bb   :  { %v4175_v38 = vadd.f32 %v17428_v25, %v4173_v34 }
 0x7bd   :  { %16886 = vtanh.f32 %v4175_v38 }
 0x7c7   :  { %v16887_v39 = vpop.eup %16886 }
 0x7c8   :  { %4184 = vrot.lane.b32.xlu1 %v16887_v39, %s17127_s3  ;;  %v4177_v42 = vmul.f32 0.5, %v16887_v39 }
 0x7ca   :  { %v4178_v43 = vadd.f32 0.5, %v4177_v42 }
 0x7cc   :  { %v4182_v51 = vmul.f32 %v4180_v2, %v4178_v43 }
 0x80c   :  { %v3668_v37 = vpop.permute.xlu0 %3667 }
 0x80d   :  { %v3670_v41 = vmul.f32 %v3668_v37, %v3664_v53 }
 0x80f   :  { %3672 = vrot.lane.b32.xlu0 %v3670_v41, %s17128_s16 }
 0x83a   :  { %v4185_v49 = vpop.permute.xlu1 %4184 }
 0x83b   :  { %v4187_v50 = vmul.f32 %v4185_v49, %v4178_v43 }
 0x83d   :  { %4189 = vrot.lane.b32.xlu1 %v4187_v50, %s17128_s16 }
 0x881   :  { %v3673_v61 = vpop.permute.xlu0 %3672 }
 0x882   :  { %v17804_v0 = vadd.f32 %v3673_v61, %v3665_v59 }
 0x884   :  { %16888 = vtanh.f32 %v17804_v0 }
 0x88e   :  { %v16889_v1 = vpop.eup %16888 }
 0x88f   :  { %3678 = vrot.lane.b32.xlu0 %v16889_v1, %s17127_s3 }
 0x8af   :  { %v4190_v4 = vpop.permute.xlu1 %4189 }
 0x8b0   :  { %v17809_v7 = vadd.f32 %v4190_v4, %v4182_v51 }
 0x8b2   :  { %16890 = vtanh.f32 %v17809_v7 }
 0x8bc   :  { %v16891_v8 = vpop.eup %16890 }
 0x8bd   :  { %4195 = vrot.lane.b32.xlu1 %v16891_v8, %s17127_s3 }
 0x901   :  { %v3679_v36 = vpop.permute.xlu0 %3678 }
 0x902   :  { %v3681_v10 = vmul.f32 %v3679_v36, %v3664_v53 }
 0x904   :  { %3683 = vrot.lane.b32.xlu0 %v3681_v10, %s17128_s16 }
 0x92f   :  { %v4196_v13 = vpop.permute.xlu1 %4195 }
 0x930   :  { %v4198_v19 = vmul.f32 %v4196_v13, %v4178_v43 }
 0x932   :  { %v4687_v20 = vrot.slane %v4198_v19, 2 }
 0x934   :  { %4688 = vrot.lane.b32.xlu1 %v4687_v20, %s17128_s16 }
 0x976   :  { %v3684_v21 = vpop.permute.xlu0 %3683 }
 0x977   :  { %3686 = vst.msk [vmem:[#allocation15 + $0x1] sm:$0x1] %vm117_vm1, %v3684_v21  ;;  %v4199_v44 = vsel %vm159_vm2, %v3684_v21, 0 }
 0x978   :  { %v4270_v22 = vand.u32 4294901760, %v4199_v44 }
 0x97a   :  { %v4271_v24 = vsub.f32 %v4199_v44, %v4270_v22 }
 0x97c   :  { %v4272_v26 = vand.u32 4294901760, %v4271_v24 }
 0x97e   :  { %v4273_v27 = vsub.f32 %v4271_v24, %v4272_v26 }
 0x980   :  { %v4274_v28 = vand.u32 4294901760, %v4273_v27 }
 0x982   :  { %14651 = vmatmul.mubr.f32.vlgmr.msra.gmra.mrb[44].mxu1 %v4274_v28 }
 0x983   :  { %16126 = vmatpush3.bf16.msra.mxu1 %v17457_v29  ;;  %14661 = vmatprep.mubr.msk.f32.mxu1 %vm17125_vm0, %v17126_v9 }
 0x984   :  { %16127 = vmatprep.subr.bf16.mxu1 %v17124_v3 }
 0x987   :  { %16129 = vmatpush3.bf16.msra.mxu1 %v17461_v30 }
 0x988   :  { %16130 = vmatprep.subr.bf16.mxu1 %v17124_v3 }
 0x98a   :  { %14662 = vmatmul.mubr.f32.vlgmr.msra.gmra.mrb[46].mxu1 %v4270_v22 }
 0x98b   :  { %16132 = vmatpush3.bf16.msra.mxu1 %v17447_v23  ;;  %14672 = vmatprep.mubr.msk.f32.mxu1 %vm17125_vm0, %v17126_v9 }
 0x98c   :  { %16133 = vmatprep.subr.bf16.mxu1 %v17124_v3 }
 0x98f   :  { %16135 = vmatpush3.bf16.msra.mxu1 %v17464_v31 }
 0x990   :  { %16136 = vmatprep.subr.bf16.mxu1 %v17124_v3 }
 0x992   :  { %14673 = vmatmul.mubr.f32.vlgmr.msra.gmra.mrb[48].mxu1 %v4271_v24 }
 0x993   :  { %16138 = vmatpush3.bf16.msra.mxu1 %v17440_v60  ;;  %14683 = vmatprep.mubr.msk.f32.mxu1 %vm17125_vm0, %v17126_v9 }
 0x994   :  { %16139 = vmatprep.subr.bf16.mxu1 %v17124_v3 }
 0x997   :  { %16141 = vmatpush3.bf16.msra.mxu1 %v17443_v6 }
 0x998   :  { %16142 = vmatprep.subr.bf16.mxu1 %v17124_v3 }
 0x99a   :  { %14684 = vmatmul.mubr.f32.vlgmr.msra.gmra.mrb[50].mxu1 %v4272_v26 }
 0x99b   :  { %16144 = vmatpush3.bf16.msra.mxu1 %v17484_v40  ;;  %14694 = vmatprep.mubr.msk.f32.mxu1 %vm17125_vm0, %v17126_v9 }
 0x99c   :  { %16145 = vmatprep.subr.bf16.mxu1 %v17124_v3 }
 0x99f   :  { %16147 = vmatpush3.bf16.msra.mxu1 %v17499_v45 }
 0x9a0   :  { %16148 = vmatprep.subr.bf16.mxu1 %v17124_v3 }
 0x9a2   :  { %14695 = vmatmul.mubr.f32.vlgmr.msra.gmra.mrb[52].mxu1 %v4270_v22 }
 0x9a3   :  { %16150 = vmatpush3.bf16.msra.mxu1 %v17440_v60  ;;  %14705 = vmatprep.mubr.msk.f32.mxu1 %vm17125_vm0, %v17126_v9 }
 0x9a4   :  { %16151 = vmatprep.subr.bf16.mxu1 %v17124_v3 }
 0x9a6   :  { %v4689_v32 = vpop.permute.xlu1 %4688 }
 0x9a7   :  { %v4690_v46 = vsel %vm159_vm2, %v4689_v32, 0  ;;  %16153 = vmatpush3.bf16.msra.mxu1 %v17443_v6 }
 0x9a8   :  { %v17847_v33 = vand.u32 4294901760, %v4690_v46  ;;  %16160 = vmatprep.subr.bf16.mxu1 %v17124_v3 }
 0x9aa   :  { %v4762_v34 = vsub.f32 %v4690_v46, %v17847_v33  ;;  %14706 = vmatmul.mubr.f32.vlgmr.msra.gmra.mrb[54].mxu1 %v4270_v22 }
 0x9ab   :  { %16162 = vmatpush3.bf16.msra.mxu1 %v17537_v58  ;;  %14727 = vmatprep.mubr.msk.f32.mxu1 %vm17125_vm0, %v17126_v9 }
 0x9ac   :  { %v4763_v35 = vand.u32 4294901760, %v4762_v34  ;;  %16163 = vmatprep.subr.bf16.mxu1 %v17124_v3 }
 0x9ae   :  { %v4764_v38 = vsub.f32 %v4762_v34, %v4763_v35 }
 0x9af   :  { %16165 = vmatpush3.bf16.msra.mxu1 %v17544_v62 }
 0x9b0   :  { %16172 = vmatprep.subr.bf16.mxu1 %v17124_v3  ;;  %v4765_v39 = vand.u32 4294901760, %v4764_v38 }
 0x9b2   :  { %14728 = vmatmul.mubr.f32.vlgmr.msra.gmra.mrb[56].mxu1 %v17847_v33  ;;  %14717 = vmatmul.mubr.f32.vlgmr.msra.gmra.mrb[24].mxu0 %v4765_v39 }
 0x9b3   :  { %16168 = vmatpush3.bf16.msra.mxu0 %v17567_v48  ;;  %16174 = vmatpush3.bf16.msra.mxu1 %v17515_v52 }
 0x9b4   :  { %16169 = vmatprep.subr.bf16.mxu0 %v17124_v3  ;;  %16175 = vmatprep.subr.bf16.mxu1 %v17124_v3 }
 0x9b5   :  { %14738 = vmatprep.mubr.msk.f32.mxu0 %vm17125_vm0, %v17126_v9  ;;  %14749 = vmatprep.mubr.msk.f32.mxu1 %vm17125_vm0, %v17126_v9 }
 0x9b7   :  { %16171 = vmatpush3.bf16.msra.mxu0 %v17574_v54  ;;  %16177 = vmatpush3.bf16.msra.mxu1 %v17530_v57 }
 0x9b8   :  { %16178 = vmatprep.subr.bf16.mxu0 %v17124_v3  ;;  %16184 = vmatprep.subr.bf16.mxu1 %v17124_v3 }
 0x9ba   :  { %14739 = vmatmul.mubr.f32.vlgmr.msra.gmra.mrb[26].mxu0 %v4762_v34  ;;  %14750 = vmatmul.mubr.f32.vlgmr.msra.gmra.mrb[58].mxu1 %v4763_v35 }
 0x9bb   :  { %16180 = vmatpush3.bf16.msra.mxu0 %v17588_v55  ;;  %16186 = vmatpush3.bf16.msra.mxu1 %v17515_v52 }
 0x9bc   :  { %16181 = vmatprep.subr.bf16.mxu0 %v17124_v3  ;;  %16187 = vmatprep.subr.bf16.mxu1 %v17124_v3 }
 0x9bd   :  { %14760 = vmatprep.mubr.msk.f32.mxu0 %vm17125_vm0, %v17126_v9  ;;  %14771 = vmatprep.mubr.msk.f32.mxu1 %vm17125_vm0, %v17126_v9 }
 0x9bf   :  { %16183 = vmatpush3.bf16.msra.mxu0 %v17598_v56  ;;  %16189 = vmatpush3.bf16.msra.mxu1 %v17530_v57 }
 0x9c0   :  { %16190 = vmatprep.subr.bf16.mxu0 %v17124_v3  ;;  %16226 = vmatprep.subr.bf16.mxu1 %v17124_v3 }
 0x9c2   :  { %14761 = vmatmul.mubr.f32.vlgmr.msra.gmra.mrb[28].mxu0 %v17847_v33  ;;  %14772 = vmatmul.mubr.f32.vlgmr.msra.gmra.mrb[60].mxu1 %v17847_v33 }
 0x9c3   :  { %16192 = vmatpush3.bf16.msra.mxu0 %v17365_v63  ;;  %14782 = vmatprep.mubr.msk.f32.mxu0 %vm17125_vm0, %v17126_v9 }
 0x9c4   :  { %16193 = vmatprep.subr.bf16.mxu0 %v17124_v3  ;;  %16228 = vmatpush3.bf16.msra.mxu1 %v17440_v60 }
 0x9c5   :  { %16229 = vmatprep.subr.bf16.mxu1 %v17124_v3  ;;  %14848 = vmatprep.mubr.msk.f32.mxu1 %vm17125_vm0, %v17126_v9 }
 0x9c7   :  { %16195 = vmatpush3.bf16.msra.mxu0 %v17370_v5 }
 0x9c8   :  { %16196 = vmatprep.subr.bf16.mxu0 %v17124_v3  ;;  %16231 = vmatpush3.bf16.msra.mxu1 %v17443_v6 }
 0x9c9   :  { %16232 = vmatprep.subr.bf16.mxu1 %v17124_v3 }
 0x9ca   :  { %14783 = vmatmul.mubr.f32.vlgmr.msra.gmra.mrb[30].mxu0 %v4765_v39 }
 0x9cb   :  { %16198 = vmatpush3.bf16.msra.mxu0 %v17377_v11  ;;  %14793 = vmatprep.mubr.msk.f32.mxu0 %vm17125_vm0, %v17126_v9 }
 0x9cc   :  { %16199 = vmatprep.subr.bf16.mxu0 %v17124_v3 }
 0x9cf   :  { %16201 = vmatpush3.bf16.msra.mxu0 %v17382_v14 }
 0x9d0   :  { %16202 = vmatprep.subr.bf16.mxu0 %v17124_v3 }
 0x9d2   :  { %14794 = vmatmul.mubr.f32.vlgmr.msra.gmra.mrb[30].mxu0 %v17847_v33 }
 0x9d3   :  { %16204 = vmatpush3.bf16.msra.mxu0 %v17388_v15  ;;  %14804 = vmatprep.mubr.msk.f32.mxu0 %vm17125_vm0, %v17126_v9 }
 0x9d4   :  { %16205 = vmatprep.subr.bf16.mxu0 %v17124_v3 }
 0x9d7   :  { %16207 = vmatpush3.bf16.msra.mxu0 %v17393_v16 }
 0x9d8   :  { %16208 = vmatprep.subr.bf16.mxu0 %v17124_v3 }
 0x9da   :  { %14805 = vmatmul.mubr.f32.vlgmr.msra.gmra.mrb[30].mxu0 %v4762_v34 }
 0x9db   :  { %16210 = vmatpush3.bf16.msra.mxu0 %v17365_v63  ;;  %14815 = vmatprep.mubr.msk.f32.mxu0 %vm17125_vm0, %v17126_v9 }
 0x9dc   :  { %16211 = vmatprep.subr.bf16.mxu0 %v17124_v3 }
 0x9df   :  { %16213 = vmatpush3.bf16.msra.mxu0 %v17370_v5 }
 0x9e0   :  { %16214 = vmatprep.subr.bf16.mxu0 %v17124_v3 }
 0x9e2   :  { %14816 = vmatmul.mubr.f32.vlgmr.msra.gmra.mrb[30].mxu0 %v4763_v35 }
 0x9e3   :  { %16216 = vmatpush3.bf16.msra.mxu0 %v17406_v17  ;;  %14826 = vmatprep.mubr.msk.f32.mxu0 %vm17125_vm0, %v17126_v9 }
 0x9e4   :  { %16217 = vmatprep.subr.bf16.mxu0 %v17124_v3 }
 0x9e7   :  { %16219 = vmatpush3.bf16.msra.mxu0 %v17411_v18 }
 0x9e8   :  { %16220 = vmatprep.subr.bf16.mxu0 %v17124_v3 }
 0x9ea   :  { %14827 = vmatmul.mubr.f32.vlgmr.msra.gmra.mrb[30].mxu0 %v17847_v33 }
 0x9eb   :  { %16222 = vmatpush3.bf16.msra.mxu0 %v17365_v63  ;;  %14837 = vmatprep.mubr.msk.f32.mxu0 %vm17125_vm0, %v17126_v9 }
 0x9ec   :  { %16223 = vmatprep.subr.bf16.mxu0 %v17124_v3 }
 0x9ef   :  { %16225 = vmatpush3.bf16.msra.mxu0 %v17370_v5 }
 0x9f0   :  { %16262 = vmatprep.subr.bf16.mxu0 %v17124_v3 }
 0x9f2   :  { %14838 = vmatmul.mubr.f32.vlgmr.msra.gmra.mrb[30].mxu0 %v17847_v33 }
 0x9f3   :  { %16264 = vmatpush3.bf16.msra.mxu0 %v17515_v52  ;;  %14914 = vmatprep.mubr.msk.f32.mxu0 %vm17125_vm0, %v17126_v9 }
 0x9f4   :  { %16265 = vmatprep.subr.bf16.mxu0 %v17124_v3 }
 0x9f7   :  { %16267 = vmatpush3.bf16.msra.mxu0 %v17530_v57 }
 0x9f8   :  { %16274 = vmatprep.subr.bf16.mxu0 %v17124_v3 }
 0xa55   :  { %v4276_v47 = vpop.f32.mrb[44].mxu1 }
 0xa56   :  { %v14652_v53 = vpop.f32.mrb[45].mxu1 }
 0xa5d   :  { %v4367_v37 = vpop.f32.mrb[46].mxu1 }
 0xa5e   :  { %v4368_v41 = vadd.f32 %v4367_v37, %v4276_v47  ;;  %v14663_v42 = vpop.f32.mrb[47].mxu1 }
 0xa65   :  { %v4447_v43 = vpop.f32.mrb[48].mxu1 }
 0xa66   :  { %v4448_v49 = vadd.f32 %v4447_v43, %v4368_v41  ;;  %v14674_v50 = vpop.f32.mrb[49].mxu1 }
 0xa6d   :  { %v4524_v59 = vpop.f32.mrb[50].mxu1 }
 0xa6e   :  { %v4525_v61 = vadd.f32 %v4524_v59, %v4448_v49  ;;  %v14685_v1 = vpop.f32.mrb[51].mxu1 }
 0xa75   :  { %v4607_v2 = vpop.f32.mrb[52].mxu1 }
 0xa76   :  { %v4608_v51 = vadd.f32 %v4607_v2, %v4525_v61  ;;  %v14696_v4 = vpop.f32.mrb[53].mxu1 }
 0xa7d   :  { %v4682_v8 = vpop.f32.mrb[54].mxu1 }
 0xa7e   :  { %v4683_v36 = vadd.f32 %v4682_v8, %v4608_v51  ;;  %v14707_v10 = vpop.f32.mrb[55].mxu1 }
 0xa85   :  { %v4858_v13 = vpop.f32.mrb[56].mxu1  ;;  %v4767_v19 = vpop.f32.mrb[24].mxu0 }
 0xa86   :  { %v4768_v20 = vadd.f32 %v4767_v19, %v4683_v36  ;;  %v14729_v21 = vpop.f32.mrb[57].mxu1  ;;  %v14718_v44 = vpop.f32.mrb[25].mxu0 }
 0xa88   :  { %v4859_v22 = vadd.f32 %v4858_v13, %v4768_v20  ;;  %v5696_v20 = vrot.slane %v17809_v7, 7 }
 0xa8d   :  { %v4938_v24 = vpop.f32.mrb[26].mxu0  ;;  %v5015_v26 = vpop.f32.mrb[58].mxu1 }
 0xa8e   :  { %v4939_v27 = vadd.f32 %v4938_v24, %v4859_v22  ;;  %v14740_v28 = vpop.f32.mrb[27].mxu0  ;;  %v14751_v32 = vpop.f32.mrb[59].mxu1 }
 0xa90   :  { %v5016_v46 = vadd.f32 %v5015_v26, %v4939_v27 }
 0xa95   :  { %v5098_v33 = vpop.f32.mrb[28].mxu0  ;;  %v5173_v34 = vpop.f32.mrb[60].mxu1 }
 0xa96   :  { %v5099_v35 = vadd.f32 %v5098_v33, %v5016_v46  ;;  %v14762_v38 = vpop.f32.mrb[29].mxu0  ;;  %v14773_v39 = vpop.f32.mrb[61].mxu1 }
 0xa98   :  { %v5174_v47 = vadd.f32 %v5173_v34, %v5099_v35 }
 0xa9a   :  { %v5177_v53 = vadd.f32 %v5174_v47, %v17658_v12 }
 0xa9c   :  { %16892 = vtanh.f32 %v5177_v53 }
 0xaa6   :  { %v16893_v37 = vpop.eup %16892 }
 0xaa7   :  { %5183 = vrot.lane.b32.xlu0 %v16893_v37, %s17127_s3  ;;  %v5179_v59 = vmul.f32 0.5, %v16893_v37 }
 0xaa9   :  { %v5180_v61 = vadd.f32 0.5, %v5179_v59 }
 0xaab   :  { %v5181_v36 = vmul.f32 %v5180_v61, %v17804_v0 }
 0xac5   :  { %v5684_v41 = vpop.f32.mrb[30].mxu0 }
 0xac6   :  { %v5689_v42 = vrot.slane %v5684_v41, 5  ;;  %v14839_v43 = vpop.f32.mrb[31].mxu0 }
 0xac8   :  { %v5691_v49 = vadd.f32 %v17428_v25, %v5689_v42 }
 0xaca   :  { %16894 = vtanh.f32 %v5691_v49 }
 0xad4   :  { %v16895_v50 = vpop.eup %16894 }
 0xad5   :  { %5700 = vrot.lane.b32.xlu1 %v16895_v50, %s17127_s3  ;;  %v5693_v12 = vmul.f32 0.5, %v16895_v50 }
 0xad7   :  { %v5694_v51 = vadd.f32 0.5, %v5693_v12 }
 0xad9   :  { %v5698_v21 = vmul.f32 %v5696_v20, %v5694_v51 }
 0xb19   :  { %v5184_v1 = vpop.permute.xlu0 %5183 }
 0xb1a   :  { %v5186_v2 = vmul.f32 %v5184_v1, %v5180_v61 }
 0xb1c   :  { %5188 = vrot.lane.b32.xlu0 %v5186_v2, %s17128_s16 }
 0xb47   :  { %v5701_v4 = vpop.permute.xlu1 %5700 }
 0xb48   :  { %v5703_v8 = vmul.f32 %v5701_v4, %v5694_v51 }
 0xb4a   :  { %5705 = vrot.lane.b32.xlu1 %v5703_v8, %s17128_s16 }
 0xb8e   :  { %v5189_v10 = vpop.permute.xlu0 %5188 }
 0xb8f   :  { %v17942_v13 = vadd.f32 %v5189_v10, %v5181_v36 }
 0xb91   :  { %16896 = vtanh.f32 %v17942_v13 }
 0xb9b   :  { %v16897_v19 = vpop.eup %16896 }
 0xb9c   :  { %5194 = vrot.lane.b32.xlu0 %v16897_v19, %s17127_s3 }
 0xbbc   :  { %v5706_v44 = vpop.permute.xlu1 %5705 }
 0xbbd   :  { %v17947_v22 = vadd.f32 %v5706_v44, %v5698_v21 }
 0xbbf   :  { %16898 = vtanh.f32 %v17947_v22 }
 0xbc9   :  { %v16899_v24 = vpop.eup %16898 }
 0xbca   :  { %5711 = vrot.lane.b32.xlu1 %v16899_v24, %s17127_s3 }
 0xc0e   :  { %v5195_v0 = vpop.permute.xlu0 %5194 }
 0xc0f   :  { %v5197_v26 = vmul.f32 %v5195_v0, %v5180_v61 }
 0xc11   :  { %5199 = vrot.lane.b32.xlu0 %v5197_v26, %s17128_s16 }
 0xc3c   :  { %v5712_v27 = vpop.permute.xlu1 %5711 }
 0xc3d   :  { %v5714_v28 = vmul.f32 %v5712_v27, %v5694_v51 }
 0xc3f   :  { %v6203_v32 = vrot.slane %v5714_v28, 3 }
 0xc41   :  { %6204 = vrot.lane.b32.xlu1 %v6203_v32, %s17128_s16 }
 0xc83   :  { %v5200_v46 = vpop.permute.xlu0 %5199 }
 0xc84   :  { %5202 = vst.msk [vmem:[#allocation15 + $0x2] sm:$0x1] %vm117_vm1, %v5200_v46  ;;  %v5715_v7 = vsel %vm159_vm2, %v5200_v46, 0 }
 0xc85   :  { %v5786_v33 = vand.u32 4294901760, %v5715_v7 }
 0xc87   :  { %v5787_v34 = vsub.f32 %v5715_v7, %v5786_v33 }
 0xc89   :  { %v5788_v35 = vand.u32 4294901760, %v5787_v34 }
 0xc8b   :  { %v5789_v38 = vsub.f32 %v5787_v34, %v5788_v35 }
 0xc8d   :  { %v5790_v39 = vand.u32 4294901760, %v5789_v38 }
 0xc8f   :  { %14849 = vmatmul.mubr.f32.vlgmr.msra.gmra.mrb[62].mxu1 %v5790_v39 }
 0xc90   :  { %16234 = vmatpush3.bf16.msra.mxu1 %v17457_v29  ;;  %14859 = vmatprep.mubr.msk.f32.mxu1 %vm17125_vm0, %v17126_v9 }
 0xc91   :  { %16235 = vmatprep.subr.bf16.mxu1 %v17124_v3 }
 0xc94   :  { %16237 = vmatpush3.bf16.msra.mxu1 %v17461_v30 }
 0xc95   :  { %16238 = vmatprep.subr.bf16.mxu1 %v17124_v3 }
 0xc97   :  { %14860 = vmatmul.mubr.f32.vlgmr.msra.gmra.mrb[64].mxu1 %v5786_v33 }
 0xc98   :  { %16240 = vmatpush3.bf16.msra.mxu1 %v17447_v23  ;;  %14870 = vmatprep.mubr.msk.f32.mxu1 %vm17125_vm0, %v17126_v9 }
 0xc99   :  { %16241 = vmatprep.subr.bf16.mxu1 %v17124_v3 }
 0xc9c   :  { %16243 = vmatpush3.bf16.msra.mxu1 %v17464_v31 }
 0xc9d   :  { %16244 = vmatprep.subr.bf16.mxu1 %v17124_v3 }
 0xc9f   :  { %14871 = vmatmul.mubr.f32.vlgmr.msra.gmra.mrb[66].mxu1 %v5787_v34 }
 0xca0   :  { %16246 = vmatpush3.bf16.msra.mxu1 %v17440_v60  ;;  %14881 = vmatprep.mubr.msk.f32.mxu1 %vm17125_vm0, %v17126_v9 }
 0xca1   :  { %16247 = vmatprep.subr.bf16.mxu1 %v17124_v3 }
 0xca4   :  { %16249 = vmatpush3.bf16.msra.mxu1 %v17443_v6 }
 0xca5   :  { %16250 = vmatprep.subr.bf16.mxu1 %v17124_v3 }
 0xca7   :  { %14882 = vmatmul.mubr.f32.vlgmr.msra.gmra.mrb[68].mxu1 %v5788_v35 }
 0xca8   :  { %16252 = vmatpush3.bf16.msra.mxu1 %v17484_v40  ;;  %14892 = vmatprep.mubr.msk.f32.mxu1 %vm17125_vm0, %v17126_v9 }
 0xca9   :  { %16253 = vmatprep.subr.bf16.mxu1 %v17124_v3 }
 0xcac   :  { %16255 = vmatpush3.bf16.msra.mxu1 %v17499_v45 }
 0xcad   :  { %16256 = vmatprep.subr.bf16.mxu1 %v17124_v3 }
 0xcaf   :  { %14893 = vmatmul.mubr.f32.vlgmr.msra.gmra.mrb[70].mxu1 %v5786_v33 }
 0xcb0   :  { %16258 = vmatpush3.bf16.msra.mxu1 %v17440_v60  ;;  %14903 = vmatprep.mubr.msk.f32.mxu1 %vm17125_vm0, %v17126_v9 }
 0xcb1   :  { %16259 = vmatprep.subr.bf16.mxu1 %v17124_v3 }
 0xcb3   :  { %v6205_v47 = vpop.permute.xlu1 %6204 }
 0xcb4   :  { %v6206_v53 = vsel %vm159_vm2, %v6205_v47, 0  ;;  %16261 = vmatpush3.bf16.msra.mxu1 %v17443_v6 }
 0xcb5   :  { %v17985_v37 = vand.u32 4294901760, %v6206_v53  ;;  %16268 = vmatprep.subr.bf16.mxu1 %v17124_v3 }
 0xcb7   :  { %v6278_v41 = vsub.f32 %v6206_v53, %v17985_v37  ;;  %14904 = vmatmul.mubr.f32.vlgmr.msra.gmra.mrb[72].mxu1 %v5786_v33 }
 0xcb8   :  { %16270 = vmatpush3.bf16.msra.mxu1 %v17537_v58  ;;  %14925 = vmatprep.mubr.msk.f32.mxu1 %vm17125_vm0, %v17126_v9 }
 0xcb9   :  { %v6279_v42 = vand.u32 4294901760, %v6278_v41  ;;  %16271 = vmatprep.subr.bf16.mxu1 %v17124_v3 }
 0xcbb   :  { %v6280_v43 = vsub.f32 %v6278_v41, %v6279_v42 }
 0xcbc   :  { %16273 = vmatpush3.bf16.msra.mxu1 %v17544_v62 }
 0xcbd   :  { %16280 = vmatprep.subr.bf16.mxu1 %v17124_v3  ;;  %v6281_v49 = vand.u32 4294901760, %v6280_v43 }
 0xcbf   :  { %14926 = vmatmul.mubr.f32.vlgmr.msra.gmra.mrb[74].mxu1 %v17985_v37  ;;  %14915 = vmatmul.mubr.f32.vlgmr.msra.gmra.mrb[32].mxu0 %v6281_v49 }
 0xcc0   :  { %16276 = vmatpush3.bf16.msra.mxu0 %v17567_v48  ;;  %16282 = vmatpush3.bf16.msra.mxu1 %v17515_v52 }
 0xcc1   :  { %16277 = vmatprep.subr.bf16.mxu0 %v17124_v3  ;;  %16283 = vmatprep.subr.bf16.mxu1 %v17124_v3 }
 0xcc2   :  { %14936 = vmatprep.mubr.msk.f32.mxu0 %vm17125_vm0, %v17126_v9  ;;  %14947 = vmatprep.mubr.msk.f32.mxu1 %vm17125_vm0, %v17126_v9 }
 0xcc4   :  { %16279 = vmatpush3.bf16.msra.mxu0 %v17574_v54  ;;  %16285 = vmatpush3.bf16.msra.mxu1 %v17530_v57 }
 0xcc5   :  { %16286 = vmatprep.subr.bf16.mxu0 %v17124_v3  ;;  %16292 = vmatprep.subr.bf16.mxu1 %v17124_v3 }
 0xcc7   :  { %14937 = vmatmul.mubr.f32.vlgmr.msra.gmra.mrb[34].mxu0 %v6278_v41  ;;  %14948 = vmatmul.mubr.f32.vlgmr.msra.gmra.mrb[76].mxu1 %v6279_v42 }
 0xcc8   :  { %16288 = vmatpush3.bf16.msra.mxu0 %v17588_v55  ;;  %16294 = vmatpush3.bf16.msra.mxu1 %v17515_v52 }
 0xcc9   :  { %16289 = vmatprep.subr.bf16.mxu0 %v17124_v3  ;;  %16295 = vmatprep.subr.bf16.mxu1 %v17124_v3 }
 0xcca   :  { %14958 = vmatprep.mubr.msk.f32.mxu0 %vm17125_vm0, %v17126_v9  ;;  %14969 = vmatprep.mubr.msk.f32.mxu1 %vm17125_vm0, %v17126_v9 }
 0xccc   :  { %16291 = vmatpush3.bf16.msra.mxu0 %v17598_v56  ;;  %16297 = vmatpush3.bf16.msra.mxu1 %v17530_v57 }
 0xccd   :  { %16298 = vmatprep.subr.bf16.mxu0 %v17124_v3  ;;  %16334 = vmatprep.subr.bf16.mxu1 %v17124_v3 }
 0xccf   :  { %14959 = vmatmul.mubr.f32.vlgmr.msra.gmra.mrb[36].mxu0 %v17985_v37  ;;  %14970 = vmatmul.mubr.f32.vlgmr.msra.gmra.mrb[78].mxu1 %v17985_v37 }
 0xcd0   :  { %16300 = vmatpush3.bf16.msra.mxu0 %v17365_v63  ;;  %14980 = vmatprep.mubr.msk.f32.mxu0 %vm17125_vm0, %v17126_v9 }
 0xcd1   :  { %16301 = vmatprep.subr.bf16.mxu0 %v17124_v3  ;;  %16336 = vmatpush3.bf16.msra.mxu1 %v17440_v60 }
 0xcd2   :  { %16337 = vmatprep.subr.bf16.mxu1 %v17124_v3  ;;  %15046 = vmatprep.mubr.msk.f32.mxu1 %vm17125_vm0, %v17126_v9 }
 0xcd4   :  { %16303 = vmatpush3.bf16.msra.mxu0 %v17370_v5 }
 0xcd5   :  { %16304 = vmatprep.subr.bf16.mxu0 %v17124_v3  ;;  %16339 = vmatpush3.bf16.msra.mxu1 %v17443_v6 }
 0xcd6   :  { %16340 = vmatprep.subr.bf16.mxu1 %v17124_v3 }
 0xcd7   :  { %14981 = vmatmul.mubr.f32.vlgmr.msra.gmra.mrb[38].mxu0 %v6281_v49 }
 0xcd8   :  { %16306 = vmatpush3.bf16.msra.mxu0 %v17377_v11  ;;  %14991 = vmatprep.mubr.msk.f32.mxu0 %vm17125_vm0, %v17126_v9 }
 0xcd9   :  { %16307 = vmatprep.subr.bf16.mxu0 %v17124_v3 }
 0xcdc   :  { %16309 = vmatpush3.bf16.msra.mxu0 %v17382_v14 }
 0xcdd   :  { %16310 = vmatprep.subr.bf16.mxu0 %v17124_v3 }
 0xcdf   :  { %14992 = vmatmul.mubr.f32.vlgmr.msra.gmra.mrb[38].mxu0 %v17985_v37 }
 0xce0   :  { %16312 = vmatpush3.bf16.msra.mxu0 %v17388_v15  ;;  %15002 = vmatprep.mubr.msk.f32.mxu0 %vm17125_vm0, %v17126_v9 }
 0xce1   :  { %16313 = vmatprep.subr.bf16.mxu0 %v17124_v3 }
 0xce4   :  { %16315 = vmatpush3.bf16.msra.mxu0 %v17393_v16 }
 0xce5   :  { %16316 = vmatprep.subr.bf16.mxu0 %v17124_v3 }
 0xce7   :  { %15003 = vmatmul.mubr.f32.vlgmr.msra.gmra.mrb[38].mxu0 %v6278_v41 }
 0xce8   :  { %16318 = vmatpush3.bf16.msra.mxu0 %v17365_v63  ;;  %15013 = vmatprep.mubr.msk.f32.mxu0 %vm17125_vm0, %v17126_v9 }
 0xce9   :  { %16319 = vmatprep.subr.bf16.mxu0 %v17124_v3 }
 0xcec   :  { %16321 = vmatpush3.bf16.msra.mxu0 %v17370_v5 }
 0xced   :  { %16322 = vmatprep.subr.bf16.mxu0 %v17124_v3 }
 0xcef   :  { %15014 = vmatmul.mubr.f32.vlgmr.msra.gmra.mrb[38].mxu0 %v6279_v42 }
 0xcf0   :  { %16324 = vmatpush3.bf16.msra.mxu0 %v17406_v17  ;;  %15024 = vmatprep.mubr.msk.f32.mxu0 %vm17125_vm0, %v17126_v9 }
 0xcf1   :  { %16325 = vmatprep.subr.bf16.mxu0 %v17124_v3 }
 0xcf4   :  { %16327 = vmatpush3.bf16.msra.mxu0 %v17411_v18 }
 0xcf5   :  { %16328 = vmatprep.subr.bf16.mxu0 %v17124_v3 }
 0xcf7   :  { %15025 = vmatmul.mubr.f32.vlgmr.msra.gmra.mrb[38].mxu0 %v17985_v37 }
 0xcf8   :  { %16330 = vmatpush3.bf16.msra.mxu0 %v17365_v63  ;;  %15035 = vmatprep.mubr.msk.f32.mxu0 %vm17125_vm0, %v17126_v9 }
 0xcf9   :  { %16331 = vmatprep.subr.bf16.mxu0 %v17124_v3 }
 0xcfc   :  { %16333 = vmatpush3.bf16.msra.mxu0 %v17370_v5 }
 0xcfd   :  { %16370 = vmatprep.subr.bf16.mxu0 %v17124_v3 }
 0xcff   :  { %15036 = vmatmul.mubr.f32.vlgmr.msra.gmra.mrb[38].mxu0 %v17985_v37 }
 0xd00   :  { %16372 = vmatpush3.bf16.msra.mxu0 %v17515_v52  ;;  %15112 = vmatprep.mubr.msk.f32.mxu0 %vm17125_vm0, %v17126_v9 }
 0xd01   :  { %16373 = vmatprep.subr.bf16.mxu0 %v17124_v3 }
 0xd04   :  { %16375 = vmatpush3.bf16.msra.mxu0 %v17530_v57 }
 0xd05   :  { %16382 = vmatprep.subr.bf16.mxu0 %v17124_v3 }
 0xd62   :  { %v5792_v50 = vpop.f32.mrb[62].mxu1 }
 0xd63   :  { %v14850_v59 = vpop.f32.mrb[63].mxu1 }
 0xd6a   :  { %v5883_v61 = vpop.f32.mrb[64].mxu1 }
 0xd6b   :  { %v5884_v1 = vadd.f32 %v5883_v61, %v5792_v50  ;;  %v14861_v2 = vpop.f32.mrb[65].mxu1  ;;  %v18073_v50 = vld [vmem:[#allocation10] sm:$0x1] }
 0xd72   :  { %v5963_v12 = vpop.f32.mrb[66].mxu1 }
 0xd73   :  { %v5964_v51 = vadd.f32 %v5963_v12, %v5884_v1  ;;  %v14872_v4 = vpop.f32.mrb[67].mxu1 }
 0xd7a   :  { %v6040_v8 = vpop.f32.mrb[68].mxu1 }
 0xd7b   :  { %v6041_v36 = vadd.f32 %v6040_v8, %v5964_v51  ;;  %v14883_v10 = vpop.f32.mrb[69].mxu1 }
 0xd82   :  { %v6123_v19 = vpop.f32.mrb[70].mxu1 }
 0xd83   :  { %v6124_v20 = vadd.f32 %v6123_v19, %v6041_v36  ;;  %v14894_v21 = vpop.f32.mrb[71].mxu1 }
 0xd8a   :  { %v6198_v44 = vpop.f32.mrb[72].mxu1 }
 0xd8b   :  { %v6199_v24 = vadd.f32 %v6198_v44, %v6124_v20  ;;  %v14905_v0 = vpop.f32.mrb[73].mxu1 }
 0xd92   :  { %v6374_v26 = vpop.f32.mrb[74].mxu1  ;;  %v6283_v27 = vpop.f32.mrb[32].mxu0 }
 0xd93   :  { %v6284_v28 = vadd.f32 %v6283_v27, %v6199_v24  ;;  %v14927_v32 = vpop.f32.mrb[75].mxu1  ;;  %v14916_v46 = vpop.f32.mrb[33].mxu0 }
 0xd94   :  { %v7212_v32 = vrot.slane %v17947_v22, 7 }
 0xd95   :  { %v6375_v7 = vadd.f32 %v6374_v26, %v6284_v28 }
 0xd9a   :  { %v6454_v33 = vpop.f32.mrb[34].mxu0  ;;  %v6531_v34 = vpop.f32.mrb[76].mxu1 }
 0xd9b   :  { %v6455_v35 = vadd.f32 %v6454_v33, %v6375_v7  ;;  %v14938_v38 = vpop.f32.mrb[35].mxu0  ;;  %v14949_v39 = vpop.f32.mrb[77].mxu1 }
 0xd9d   :  { %v6532_v47 = vadd.f32 %v6531_v34, %v6455_v35 }
 0xda2   :  { %v6614_v53 = vpop.f32.mrb[36].mxu0  ;;  %v6689_v37 = vpop.f32.mrb[78].mxu1 }
 0xda3   :  { %v6615_v41 = vadd.f32 %v6614_v53, %v6532_v47  ;;  %v14960_v42 = vpop.f32.mrb[37].mxu0  ;;  %v14971_v43 = vpop.f32.mrb[79].mxu1 }
 0xda5   :  { %v6690_v49 = vadd.f32 %v6689_v37, %v6615_v41 }
 0xda7   :  { %v6693_v59 = vadd.f32 %v18073_v50, %v6690_v49 }
 0xda9   :  { %16900 = vtanh.f32 %v6693_v59 }
 0xdb3   :  { %v16901_v61 = vpop.eup %16900 }
 0xdb4   :  { %6699 = vrot.lane.b32.xlu0 %v16901_v61, %s17127_s3  ;;  %v6695_v8 = vmul.f32 0.5, %v16901_v61 }
 0xdb6   :  { %v6696_v36 = vadd.f32 0.5, %v6695_v8 }
 0xdb8   :  { %v6697_v0 = vmul.f32 %v6696_v36, %v17942_v13 }
 0xdd2   :  { %v7200_v1 = vpop.f32.mrb[38].mxu0 }
 0xdd3   :  { %v7205_v2 = vrot.slane %v7200_v1, 4  ;;  %v15037_v12 = vpop.f32.mrb[39].mxu0 }
 0xdd5   :  { %v7207_v51 = vadd.f32 %v17428_v25, %v7205_v2 }
 0xdd7   :  { %16902 = vtanh.f32 %v7207_v51 }
 0xde1   :  { %v16903_v4 = vpop.eup %16902 }
 0xde2   :  { %7216 = vrot.lane.b32.xlu1 %v16903_v4, %s17127_s3  ;;  %v7209_v20 = vmul.f32 0.5, %v16903_v4 }
 0xde4   :  { %v7210_v21 = vadd.f32 0.5, %v7209_v20 }
 0xde6   :  { %v7214_v46 = vmul.f32 %v7212_v32, %v7210_v21 }
 0xe26   :  { %v6700_v10 = vpop.permute.xlu0 %6699 }
 0xe27   :  { %v6702_v19 = vmul.f32 %v6700_v10, %v6696_v36 }
 0xe29   :  { %6704 = vrot.lane.b32.xlu0 %v6702_v19, %s17128_s16 }
 0xe54   :  { %v7217_v44 = vpop.permute.xlu1 %7216 }
 0xe55   :  { %v7219_v24 = vmul.f32 %v7217_v44, %v7210_v21 }
 0xe57   :  { %7221 = vrot.lane.b32.xlu1 %v7219_v24, %s17128_s16 }
 0xe9b   :  { %v6705_v26 = vpop.permute.xlu0 %6704 }
 0xe9c   :  { %v18082_v27 = vadd.f32 %v6705_v26, %v6697_v0 }
 0xe9e   :  { %16904 = vtanh.f32 %v18082_v27 }
 0xea8   :  { %v16905_v28 = vpop.eup %16904 }
 0xea9   :  { %6710 = vrot.lane.b32.xlu0 %v16905_v28, %s17127_s3 }
 0xec9   :  { %v7222_v7 = vpop.permute.xlu1 %7221 }
 0xeca   :  { %v18087_v33 = vadd.f32 %v7222_v7, %v7214_v46 }
 0xecc   :  { %16906 = vtanh.f32 %v18087_v33 }
 0xed6   :  { %v16907_v34 = vpop.eup %16906 }
 0xed7   :  { %7227 = vrot.lane.b32.xlu1 %v16907_v34, %s17127_s3 }
 0xf1b   :  { %v6711_v13 = vpop.permute.xlu0 %6710 }
 0xf1c   :  { %v6713_v35 = vmul.f32 %v6711_v13, %v6696_v36 }
 0xf1e   :  { %6715 = vrot.lane.b32.xlu0 %v6713_v35, %s17128_s16 }
 0xf49   :  { %v7228_v38 = vpop.permute.xlu1 %7227 }
 0xf4a   :  { %v7230_v39 = vmul.f32 %v7228_v38, %v7210_v21 }
 0xf4c   :  { %v7719_v47 = vrot.slane %v7230_v39, 4 }
 0xf4e   :  { %7720 = vrot.lane.b32.xlu1 %v7719_v47, %s17128_s16 }
 0xf90   :  { %v6716_v53 = vpop.permute.xlu0 %6715 }
 0xf91   :  { %6718 = vst.msk [vmem:[#allocation15 + $0x3] sm:$0x1] %vm117_vm1, %v6716_v53  ;;  %v7231_v22 = vsel %vm159_vm2, %v6716_v53, 0 }
 0xf92   :  { %v7302_v37 = vand.u32 4294901760, %v7231_v22 }
 0xf94   :  { %v7303_v41 = vsub.f32 %v7231_v22, %v7302_v37 }
 0xf96   :  { %v7304_v42 = vand.u32 4294901760, %v7303_v41 }
 0xf98   :  { %v7305_v43 = vsub.f32 %v7303_v41, %v7304_v42 }
 0xf9a   :  { %v7306_v49 = vand.u32 4294901760, %v7305_v43 }
 0xf9c   :  { %15047 = vmatmul.mubr.f32.vlgmr.msra.gmra.mrb[80].mxu1 %v7306_v49 }
 0xf9d   :  { %16342 = vmatpush3.bf16.msra.mxu1 %v17457_v29  ;;  %15057 = vmatprep.mubr.msk.f32.mxu1 %vm17125_vm0, %v17126_v9 }
 0xf9e   :  { %16343 = vmatprep.subr.bf16.mxu1 %v17124_v3 }
 0xfa1   :  { %16345 = vmatpush3.bf16.msra.mxu1 %v17461_v30 }
 0xfa2   :  { %16346 = vmatprep.subr.bf16.mxu1 %v17124_v3 }
 0xfa4   :  { %15058 = vmatmul.mubr.f32.vlgmr.msra.gmra.mrb[82].mxu1 %v7302_v37 }
 0xfa5   :  { %16348 = vmatpush3.bf16.msra.mxu1 %v17447_v23  ;;  %15068 = vmatprep.mubr.msk.f32.mxu1 %vm17125_vm0, %v17126_v9 }
 0xfa6   :  { %16349 = vmatprep.subr.bf16.mxu1 %v17124_v3 }
 0xfa9   :  { %16351 = vmatpush3.bf16.msra.mxu1 %v17464_v31 }
 0xfaa   :  { %16352 = vmatprep.subr.bf16.mxu1 %v17124_v3 }
 0xfac   :  { %15069 = vmatmul.mubr.f32.vlgmr.msra.gmra.mrb[84].mxu1 %v7303_v41 }
 0xfad   :  { %16354 = vmatpush3.bf16.msra.mxu1 %v17440_v60  ;;  %15079 = vmatprep.mubr.msk.f32.mxu1 %vm17125_vm0, %v17126_v9 }
 0xfae   :  { %16355 = vmatprep.subr.bf16.mxu1 %v17124_v3 }
 0xfb1   :  { %16357 = vmatpush3.bf16.msra.mxu1 %v17443_v6 }
 0xfb2   :  { %16358 = vmatprep.subr.bf16.mxu1 %v17124_v3 }
 0xfb4   :  { %15080 = vmatmul.mubr.f32.vlgmr.msra.gmra.mrb[86].mxu1 %v7304_v42 }
 0xfb5   :  { %16360 = vmatpush3.bf16.msra.mxu1 %v17484_v40  ;;  %15090 = vmatprep.mubr.msk.f32.mxu1 %vm17125_vm0, %v17126_v9 }
 0xfb6   :  { %16361 = vmatprep.subr.bf16.mxu1 %v17124_v3 }
 0xfb9   :  { %16363 = vmatpush3.bf16.msra.mxu1 %v17499_v45 }
 0xfba   :  { %16364 = vmatprep.subr.bf16.mxu1 %v17124_v3 }
 0xfbc   :  { %15091 = vmatmul.mubr.f32.vlgmr.msra.gmra.mrb[88].mxu1 %v7302_v37 }
 0xfbd   :  { %16366 = vmatpush3.bf16.msra.mxu1 %v17440_v60  ;;  %15101 = vmatprep.mubr.msk.f32.mxu1 %vm17125_vm0, %v17126_v9 }
 0xfbe   :  { %16367 = vmatprep.subr.bf16.mxu1 %v17124_v3 }
 0xfc0   :  { %v7721_v59 = vpop.permute.xlu1 %7720 }
 0xfc1   :  { %v7722_v61 = vsel %vm159_vm2, %v7721_v59, 0  ;;  %16369 = vmatpush3.bf16.msra.mxu1 %v17443_v6 }
 0xfc2   :  { %v18125_v1 = vand.u32 4294901760, %v7722_v61  ;;  %16376 = vmatprep.subr.bf16.mxu1 %v17124_v3 }
 0xfc4   :  { %v7794_v2 = vsub.f32 %v7722_v61, %v18125_v1  ;;  %15102 = vmatmul.mubr.f32.vlgmr.msra.gmra.mrb[90].mxu1 %v7302_v37 }
 0xfc5   :  { %16378 = vmatpush3.bf16.msra.mxu1 %v17537_v58  ;;  %15123 = vmatprep.mubr.msk.f32.mxu1 %vm17125_vm0, %v17126_v9 }
 0xfc6   :  { %v7795_v12 = vand.u32 4294901760, %v7794_v2  ;;  %16379 = vmatprep.subr.bf16.mxu1 %v17124_v3 }
 0xfc8   :  { %v7796_v51 = vsub.f32 %v7794_v2, %v7795_v12 }
 0xfc9   :  { %16381 = vmatpush3.bf16.msra.mxu1 %v17544_v62 }
 0xfca   :  { %16388 = vmatprep.subr.bf16.mxu1 %v17124_v3  ;;  %v7797_v4 = vand.u32 4294901760, %v7796_v51 }
 0xfcc   :  { %15124 = vmatmul.mubr.f32.vlgmr.msra.gmra.mrb[92].mxu1 %v18125_v1  ;;  %15113 = vmatmul.mubr.f32.vlgmr.msra.gmra.mrb[40].mxu0 %v7797_v4 }
 0xfcd   :  { %16384 = vmatpush3.bf16.msra.mxu0 %v17567_v48  ;;  %16390 = vmatpush3.bf16.msra.mxu1 %v17515_v52 }
 0xfce   :  { %16385 = vmatprep.subr.bf16.mxu0 %v17124_v3  ;;  %16391 = vmatprep.subr.bf16.mxu1 %v17124_v3 }
 0xfcf   :  { %15134 = vmatprep.mubr.msk.f32.mxu0 %vm17125_vm0, %v17126_v9  ;;  %15145 = vmatprep.mubr.msk.f32.mxu1 %vm17125_vm0, %v17126_v9 }
 0xfd1   :  { %16387 = vmatpush3.bf16.msra.mxu0 %v17574_v54  ;;  %16393 = vmatpush3.bf16.msra.mxu1 %v17530_v57 }
 0xfd2   :  { %16394 = vmatprep.subr.bf16.mxu0 %v17124_v3  ;;  %16400 = vmatprep.subr.bf16.mxu1 %v17124_v3 }
 0xfd4   :  { %15135 = vmatmul.mubr.f32.vlgmr.msra.gmra.mrb[42].mxu0 %v7794_v2  ;;  %15146 = vmatmul.mubr.f32.vlgmr.msra.gmra.mrb[94].mxu1 %v7795_v12 }
 0xfd5   :  { %16396 = vmatpush3.bf16.msra.mxu0 %v17588_v55  ;;  %16402 = vmatpush3.bf16.msra.mxu1 %v17515_v52 }
 0xfd6   :  { %16397 = vmatprep.subr.bf16.mxu0 %v17124_v3  ;;  %16403 = vmatprep.subr.bf16.mxu1 %v17124_v3 }
 0xfd7   :  { %15156 = vmatprep.mubr.msk.f32.mxu0 %vm17125_vm0, %v17126_v9  ;;  %15167 = vmatprep.mubr.msk.f32.mxu1 %vm17125_vm0, %v17126_v9 }
 0xfd9   :  { %16399 = vmatpush3.bf16.msra.mxu0 %v17598_v56  ;;  %16405 = vmatpush3.bf16.msra.mxu1 %v17530_v57 }
 0xfda   :  { %16406 = vmatprep.subr.bf16.mxu0 %v17124_v3  ;;  %16442 = vmatprep.subr.bf16.mxu1 %v17124_v3 }
 0xfdc   :  { %15157 = vmatmul.mubr.f32.vlgmr.msra.gmra.mrb[44].mxu0 %v18125_v1  ;;  %15168 = vmatmul.mubr.f32.vlgmr.msra.gmra.mrb[96].mxu1 %v18125_v1 }
 0xfdd   :  { %16408 = vmatpush3.bf16.msra.mxu0 %v17365_v63  ;;  %15178 = vmatprep.mubr.msk.f32.mxu0 %vm17125_vm0, %v17126_v9 }
 0xfde   :  { %16409 = vmatprep.subr.bf16.mxu0 %v17124_v3  ;;  %16444 = vmatpush3.bf16.msra.mxu1 %v17440_v60 }
 0xfdf   :  { %16445 = vmatprep.subr.bf16.mxu1 %v17124_v3  ;;  %15244 = vmatprep.mubr.msk.f32.mxu1 %vm17125_vm0, %v17126_v9 }
 0xfe1   :  { %16411 = vmatpush3.bf16.msra.mxu0 %v17370_v5 }
 0xfe2   :  { %16412 = vmatprep.subr.bf16.mxu0 %v17124_v3  ;;  %16447 = vmatpush3.bf16.msra.mxu1 %v17443_v6 }
 0xfe3   :  { %16448 = vmatprep.subr.bf16.mxu1 %v17124_v3 }
 0xfe4   :  { %15179 = vmatmul.mubr.f32.vlgmr.msra.gmra.mrb[46].mxu0 %v7797_v4 }
 0xfe5   :  { %16414 = vmatpush3.bf16.msra.mxu0 %v17377_v11  ;;  %15189 = vmatprep.mubr.msk.f32.mxu0 %vm17125_vm0, %v17126_v9 }
 0xfe6   :  { %16415 = vmatprep.subr.bf16.mxu0 %v17124_v3 }
 0xfe9   :  { %16417 = vmatpush3.bf16.msra.mxu0 %v17382_v14 }
 0xfea   :  { %16418 = vmatprep.subr.bf16.mxu0 %v17124_v3 }
 0xfec   :  { %15190 = vmatmul.mubr.f32.vlgmr.msra.gmra.mrb[46].mxu0 %v18125_v1 }
 0xfed   :  { %16420 = vmatpush3.bf16.msra.mxu0 %v17388_v15  ;;  %15200 = vmatprep.mubr.msk.f32.mxu0 %vm17125_vm0, %v17126_v9 }
 0xfee   :  { %16421 = vmatprep.subr.bf16.mxu0 %v17124_v3 }
 0xff1   :  { %16423 = vmatpush3.bf16.msra.mxu0 %v17393_v16 }
 0xff2   :  { %16424 = vmatprep.subr.bf16.mxu0 %v17124_v3 }
 0xff4   :  { %15201 = vmatmul.mubr.f32.vlgmr.msra.gmra.mrb[46].mxu0 %v7794_v2 }
 0xff5   :  { %16426 = vmatpush3.bf16.msra.mxu0 %v17365_v63  ;;  %15211 = vmatprep.mubr.msk.f32.mxu0 %vm17125_vm0, %v17126_v9 }
 0xff6   :  { %16427 = vmatprep.subr.bf16.mxu0 %v17124_v3 }
 0xff9   :  { %16429 = vmatpush3.bf16.msra.mxu0 %v17370_v5 }
 0xffa   :  { %16430 = vmatprep.subr.bf16.mxu0 %v17124_v3 }
 0xffc   :  { %15212 = vmatmul.mubr.f32.vlgmr.msra.gmra.mrb[46].mxu0 %v7795_v12 }
 0xffd   :  { %16432 = vmatpush3.bf16.msra.mxu0 %v17406_v17  ;;  %15222 = vmatprep.mubr.msk.f32.mxu0 %vm17125_vm0, %v17126_v9 }
 0xffe   :  { %16433 = vmatprep.subr.bf16.mxu0 %v17124_v3 }
0x1001   :  { %16435 = vmatpush3.bf16.msra.mxu0 %v17411_v18 }
0x1002   :  { %16436 = vmatprep.subr.bf16.mxu0 %v17124_v3 }
0x1004   :  { %15223 = vmatmul.mubr.f32.vlgmr.msra.gmra.mrb[46].mxu0 %v18125_v1 }
0x1005   :  { %16438 = vmatpush3.bf16.msra.mxu0 %v17365_v63  ;;  %15233 = vmatprep.mubr.msk.f32.mxu0 %vm17125_vm0, %v17126_v9 }
0x1006   :  { %16439 = vmatprep.subr.bf16.mxu0 %v17124_v3 }
0x1009   :  { %16441 = vmatpush3.bf16.msra.mxu0 %v17370_v5 }
0x100a   :  { %16478 = vmatprep.subr.bf16.mxu0 %v17124_v3 }
0x100c   :  { %15234 = vmatmul.mubr.f32.vlgmr.msra.gmra.mrb[46].mxu0 %v18125_v1 }
0x100d   :  { %16480 = vmatpush3.bf16.msra.mxu0 %v17515_v52  ;;  %15310 = vmatprep.mubr.msk.f32.mxu0 %vm17125_vm0, %v17126_v9 }
0x100e   :  { %16481 = vmatprep.subr.bf16.mxu0 %v17124_v3 }
0x1011   :  { %16483 = vmatpush3.bf16.msra.mxu0 %v17530_v57 }
0x1012   :  { %16490 = vmatprep.subr.bf16.mxu0 %v17124_v3 }
0x106f   :  { %v7308_v8 = vpop.f32.mrb[80].mxu1 }
0x1070   :  { %v15048_v36 = vpop.f32.mrb[81].mxu1 }
0x1077   :  { %v7399_v10 = vpop.f32.mrb[82].mxu1 }
0x1078   :  { %v7400_v19 = vadd.f32 %v7399_v10, %v7308_v8  ;;  %v15059_v20 = vpop.f32.mrb[83].mxu1 }
0x107f   :  { %v7479_v21 = vpop.f32.mrb[84].mxu1 }
0x1080   :  { %v7480_v44 = vadd.f32 %v7479_v21, %v7400_v19  ;;  %v15070_v24 = vpop.f32.mrb[85].mxu1 }
0x1087   :  { %v7556_v0 = vpop.f32.mrb[86].mxu1 }
0x1088   :  { %v7557_v26 = vadd.f32 %v7556_v0, %v7480_v44  ;;  %v15081_v28 = vpop.f32.mrb[87].mxu1 }
0x108f   :  { %v7639_v32 = vpop.f32.mrb[88].mxu1 }
0x1090   :  { %v7640_v46 = vadd.f32 %v7639_v32, %v7557_v26  ;;  %v15092_v7 = vpop.f32.mrb[89].mxu1 }
0x1097   :  { %v7714_v34 = vpop.f32.mrb[90].mxu1 }
0x1098   :  { %v7715_v13 = vadd.f32 %v7714_v34, %v7640_v46  ;;  %v15103_v35 = vpop.f32.mrb[91].mxu1 }
0x109f   :  { %v7890_v38 = vpop.f32.mrb[92].mxu1  ;;  %v7799_v39 = vpop.f32.mrb[40].mxu0 }
0x10a0   :  { %v7800_v47 = vadd.f32 %v7799_v39, %v7715_v13  ;;  %v15125_v53 = vpop.f32.mrb[93].mxu1  ;;  %v15114_v22 = vpop.f32.mrb[41].mxu0 }
0x10a1   :  { %v8728_v53 = vrot.slane %v18087_v33, 7 }
0x10a2   :  { %v7891_v37 = vadd.f32 %v7890_v38, %v7800_v47 }
0x10a7   :  { %v7970_v41 = vpop.f32.mrb[42].mxu0  ;;  %v8047_v42 = vpop.f32.mrb[94].mxu1 }
0x10a8   :  { %v7971_v43 = vadd.f32 %v7970_v41, %v7891_v37  ;;  %v15136_v49 = vpop.f32.mrb[43].mxu0  ;;  %v15147_v59 = vpop.f32.mrb[95].mxu1 }
0x10aa   :  { %v8048_v61 = vadd.f32 %v8047_v42, %v7971_v43 }
0x10af   :  { %v8130_v1 = vpop.f32.mrb[44].mxu0  ;;  %v8205_v2 = vpop.f32.mrb[96].mxu1 }
0x10b0   :  { %v8131_v12 = vadd.f32 %v8130_v1, %v8048_v61  ;;  %v15158_v51 = vpop.f32.mrb[45].mxu0  ;;  %v15169_v4 = vpop.f32.mrb[97].mxu1 }
0x10b2   :  { %v8206_v8 = vadd.f32 %v8205_v2, %v8131_v12 }
0x10b4   :  { %v8209_v36 = vadd.f32 %v18073_v50, %v8206_v8 }
0x10b6   :  { %16908 = vtanh.f32 %v8209_v36 }
0x10c0   :  { %v16909_v10 = vpop.eup %16908 }
0x10c1   :  { %8215 = vrot.lane.b32.xlu0 %v16909_v10, %s17127_s3  ;;  %v8211_v0 = vmul.f32 0.5, %v16909_v10 }
0x10c3   :  { %v8212_v26 = vadd.f32 0.5, %v8211_v0 }
0x10c5   :  { %v8213_v35 = vmul.f32 %v8212_v26, %v18082_v27 }
0x10df   :  { %v8716_v19 = vpop.f32.mrb[46].mxu0 }
0x10e0   :  { %v8721_v20 = vrot.slane %v8716_v19, 3  ;;  %v15235_v21 = vpop.f32.mrb[47].mxu0 }
0x10e2   :  { %v8723_v44 = vadd.f32 %v17428_v25, %v8721_v20 }
0x10e4   :  { %16910 = vtanh.f32 %v8723_v44 }
0x10ee   :  { %v16911_v24 = vpop.eup %16910 }
0x10ef   :  { %8732 = vrot.lane.b32.xlu1 %v16911_v24, %s17127_s3  ;;  %v8725_v46 = vmul.f32 0.5, %v16911_v24 }
0x10f1   :  { %v8726_v7 = vadd.f32 0.5, %v8725_v46 }
0x10f3   :  { %v8730_v22 = vmul.f32 %v8728_v53, %v8726_v7 }
0x1133   :  { %v8216_v28 = vpop.permute.xlu0 %8215 }
0x1134   :  { %v8218_v32 = vmul.f32 %v8216_v28, %v8212_v26 }
0x1136   :  { %8220 = vrot.lane.b32.xlu0 %v8218_v32, %s17128_s16 }
0x1161   :  { %v8733_v34 = vpop.permute.xlu1 %8732 }
0x1162   :  { %v8735_v13 = vmul.f32 %v8733_v34, %v8726_v7 }
0x1164   :  { %8737 = vrot.lane.b32.xlu1 %v8735_v13, %s17128_s16 }
0x11a8   :  { %v8221_v38 = vpop.permute.xlu0 %8220 }
0x11a9   :  { %v18220_v39 = vadd.f32 %v8221_v38, %v8213_v35 }
0x11ab   :  { %16912 = vtanh.f32 %v18220_v39 }
0x11b5   :  { %v16913_v47 = vpop.eup %16912 }
0x11b6   :  { %8226 = vrot.lane.b32.xlu0 %v16913_v47, %s17127_s3 }
0x11d6   :  { %v8738_v37 = vpop.permute.xlu1 %8737 }
0x11d7   :  { %v18225_v41 = vadd.f32 %v8738_v37, %v8730_v22 }
0x11d9   :  { %16914 = vtanh.f32 %v18225_v41 }
0x11e3   :  { %v16915_v42 = vpop.eup %16914 }
0x11e4   :  { %8743 = vrot.lane.b32.xlu1 %v16915_v42, %s17127_s3 }
0x1228   :  { %v8227_v27 = vpop.permute.xlu0 %8226 }
0x1229   :  { %v8229_v43 = vmul.f32 %v8227_v27, %v8212_v26 }
0x122b   :  { %8231 = vrot.lane.b32.xlu0 %v8229_v43, %s17128_s16 }
0x1256   :  { %v8744_v49 = vpop.permute.xlu1 %8743 }
0x1257   :  { %v8746_v59 = vmul.f32 %v8744_v49, %v8726_v7 }
0x1259   :  { %v9235_v61 = vrot.slane %v8746_v59, 5 }
0x125b   :  { %9236 = vrot.lane.b32.xlu1 %v9235_v61, %s17128_s16 }
0x129d   :  { %v8232_v1 = vpop.permute.xlu0 %8231 }
0x129e   :  { %8234 = vst.msk [vmem:[#allocation15 + $0x4] sm:$0x1] %vm117_vm1, %v8232_v1  ;;  %v8747_v33 = vsel %vm159_vm2, %v8232_v1, 0 }
0x129f   :  { %v8818_v2 = vand.u32 4294901760, %v8747_v33 }
0x12a1   :  { %v8819_v12 = vsub.f32 %v8747_v33, %v8818_v2 }
0x12a3   :  { %v8820_v51 = vand.u32 4294901760, %v8819_v12 }
0x12a5   :  { %v8821_v4 = vsub.f32 %v8819_v12, %v8820_v51 }
0x12a7   :  { %v8822_v8 = vand.u32 4294901760, %v8821_v4 }
0x12a9   :  { %15245 = vmatmul.mubr.f32.vlgmr.msra.gmra.mrb[98].mxu1 %v8822_v8 }
0x12aa   :  { %16450 = vmatpush3.bf16.msra.mxu1 %v17457_v29  ;;  %15255 = vmatprep.mubr.msk.f32.mxu1 %vm17125_vm0, %v17126_v9 }
0x12ab   :  { %16451 = vmatprep.subr.bf16.mxu1 %v17124_v3 }
0x12ae   :  { %16453 = vmatpush3.bf16.msra.mxu1 %v17461_v30 }
0x12af   :  { %16454 = vmatprep.subr.bf16.mxu1 %v17124_v3 }
0x12b1   :  { %15256 = vmatmul.mubr.f32.vlgmr.msra.gmra.mrb[100].mxu1 %v8818_v2 }
0x12b2   :  { %16456 = vmatpush3.bf16.msra.mxu1 %v17447_v23  ;;  %15266 = vmatprep.mubr.msk.f32.mxu1 %vm17125_vm0, %v17126_v9 }
0x12b3   :  { %16457 = vmatprep.subr.bf16.mxu1 %v17124_v3 }
0x12b6   :  { %16459 = vmatpush3.bf16.msra.mxu1 %v17464_v31 }
0x12b7   :  { %16460 = vmatprep.subr.bf16.mxu1 %v17124_v3 }
0x12b9   :  { %15267 = vmatmul.mubr.f32.vlgmr.msra.gmra.mrb[102].mxu1 %v8819_v12 }
0x12ba   :  { %16462 = vmatpush3.bf16.msra.mxu1 %v17440_v60  ;;  %15277 = vmatprep.mubr.msk.f32.mxu1 %vm17125_vm0, %v17126_v9 }
0x12bb   :  { %16463 = vmatprep.subr.bf16.mxu1 %v17124_v3 }
0x12be   :  { %16465 = vmatpush3.bf16.msra.mxu1 %v17443_v6 }
0x12bf   :  { %16466 = vmatprep.subr.bf16.mxu1 %v17124_v3 }
0x12c1   :  { %15278 = vmatmul.mubr.f32.vlgmr.msra.gmra.mrb[104].mxu1 %v8820_v51 }
0x12c2   :  { %16468 = vmatpush3.bf16.msra.mxu1 %v17484_v40  ;;  %15288 = vmatprep.mubr.msk.f32.mxu1 %vm17125_vm0, %v17126_v9 }
0x12c3   :  { %16469 = vmatprep.subr.bf16.mxu1 %v17124_v3 }
0x12c6   :  { %16471 = vmatpush3.bf16.msra.mxu1 %v17499_v45 }
0x12c7   :  { %16472 = vmatprep.subr.bf16.mxu1 %v17124_v3 }
0x12c9   :  { %15289 = vmatmul.mubr.f32.vlgmr.msra.gmra.mrb[106].mxu1 %v8818_v2 }
0x12ca   :  { %16474 = vmatpush3.bf16.msra.mxu1 %v17440_v60  ;;  %15299 = vmatprep.mubr.msk.f32.mxu1 %vm17125_vm0, %v17126_v9 }
0x12cb   :  { %16475 = vmatprep.subr.bf16.mxu1 %v17124_v3 }
0x12cd   :  { %v9237_v36 = vpop.permute.xlu1 %9236 }
0x12ce   :  { %v9238_v10 = vsel %vm159_vm2, %v9237_v36, 0  ;;  %16477 = vmatpush3.bf16.msra.mxu1 %v17443_v6 }
0x12cf   :  { %v18263_v19 = vand.u32 4294901760, %v9238_v10  ;;  %16484 = vmatprep.subr.bf16.mxu1 %v17124_v3 }
0x12d1   :  { %v9310_v20 = vsub.f32 %v9238_v10, %v18263_v19  ;;  %15300 = vmatmul.mubr.f32.vlgmr.msra.gmra.mrb[108].mxu1 %v8818_v2 }
0x12d2   :  { %16486 = vmatpush3.bf16.msra.mxu1 %v17537_v58  ;;  %15321 = vmatprep.mubr.msk.f32.mxu1 %vm17125_vm0, %v17126_v9 }
0x12d3   :  { %v9311_v21 = vand.u32 4294901760, %v9310_v20  ;;  %16487 = vmatprep.subr.bf16.mxu1 %v17124_v3 }
0x12d5   :  { %v9312_v44 = vsub.f32 %v9310_v20, %v9311_v21 }
0x12d6   :  { %16489 = vmatpush3.bf16.msra.mxu1 %v17544_v62 }
0x12d7   :  { %16496 = vmatprep.subr.bf16.mxu1 %v17124_v3  ;;  %v9313_v24 = vand.u32 4294901760, %v9312_v44 }
0x12d9   :  { %15322 = vmatmul.mubr.f32.vlgmr.msra.gmra.mrb[110].mxu1 %v18263_v19  ;;  %15311 = vmatmul.mubr.f32.vlgmr.msra.gmra.mrb[48].mxu0 %v9313_v24 }
0x12da   :  { %16492 = vmatpush3.bf16.msra.mxu0 %v17567_v48  ;;  %16498 = vmatpush3.bf16.msra.mxu1 %v17515_v52 }
0x12db   :  { %16493 = vmatprep.subr.bf16.mxu0 %v17124_v3  ;;  %16499 = vmatprep.subr.bf16.mxu1 %v17124_v3 }
0x12dc   :  { %15332 = vmatprep.mubr.msk.f32.mxu0 %vm17125_vm0, %v17126_v9  ;;  %15343 = vmatprep.mubr.msk.f32.mxu1 %vm17125_vm0, %v17126_v9 }
0x12de   :  { %16495 = vmatpush3.bf16.msra.mxu0 %v17574_v54  ;;  %16501 = vmatpush3.bf16.msra.mxu1 %v17530_v57 }
0x12df   :  { %16502 = vmatprep.subr.bf16.mxu0 %v17124_v3  ;;  %16508 = vmatprep.subr.bf16.mxu1 %v17124_v3 }
0x12e1   :  { %15333 = vmatmul.mubr.f32.vlgmr.msra.gmra.mrb[50].mxu0 %v9310_v20  ;;  %15344 = vmatmul.mubr.f32.vlgmr.msra.gmra.mrb[112].mxu1 %v9311_v21 }
0x12e2   :  { %16504 = vmatpush3.bf16.msra.mxu0 %v17588_v55  ;;  %16510 = vmatpush3.bf16.msra.mxu1 %v17515_v52 }
0x12e3   :  { %16505 = vmatprep.subr.bf16.mxu0 %v17124_v3  ;;  %16511 = vmatprep.subr.bf16.mxu1 %v17124_v3 }
0x12e4   :  { %15354 = vmatprep.mubr.msk.f32.mxu0 %vm17125_vm0, %v17126_v9  ;;  %15365 = vmatprep.mubr.msk.f32.mxu1 %vm17125_vm0, %v17126_v9 }
0x12e6   :  { %16507 = vmatpush3.bf16.msra.mxu0 %v17598_v56  ;;  %16513 = vmatpush3.bf16.msra.mxu1 %v17530_v57 }
0x12e7   :  { %16514 = vmatprep.subr.bf16.mxu0 %v17124_v3  ;;  %16550 = vmatprep.subr.bf16.mxu1 %v17124_v3 }
0x12e9   :  { %15355 = vmatmul.mubr.f32.vlgmr.msra.gmra.mrb[52].mxu0 %v18263_v19  ;;  %15366 = vmatmul.mubr.f32.vlgmr.msra.gmra.mrb[114].mxu1 %v18263_v19 }
0x12ea   :  { %16516 = vmatpush3.bf16.msra.mxu0 %v17365_v63  ;;  %15376 = vmatprep.mubr.msk.f32.mxu0 %vm17125_vm0, %v17126_v9 }
0x12eb   :  { %16517 = vmatprep.subr.bf16.mxu0 %v17124_v3  ;;  %16552 = vmatpush3.bf16.msra.mxu1 %v17440_v60 }
0x12ec   :  { %16553 = vmatprep.subr.bf16.mxu1 %v17124_v3  ;;  %15442 = vmatprep.mubr.msk.f32.mxu1 %vm17125_vm0, %v17126_v9 }
0x12ee   :  { %16519 = vmatpush3.bf16.msra.mxu0 %v17370_v5 }
0x12ef   :  { %16520 = vmatprep.subr.bf16.mxu0 %v17124_v3  ;;  %16555 = vmatpush3.bf16.msra.mxu1 %v17443_v6 }
0x12f0   :  { %16556 = vmatprep.subr.bf16.mxu1 %v17124_v3 }
0x12f1   :  { %15377 = vmatmul.mubr.f32.vlgmr.msra.gmra.mrb[54].mxu0 %v9313_v24 }
0x12f2   :  { %16522 = vmatpush3.bf16.msra.mxu0 %v17377_v11  ;;  %15387 = vmatprep.mubr.msk.f32.mxu0 %vm17125_vm0, %v17126_v9 }
0x12f3   :  { %16523 = vmatprep.subr.bf16.mxu0 %v17124_v3 }
0x12f6   :  { %16525 = vmatpush3.bf16.msra.mxu0 %v17382_v14 }
0x12f7   :  { %16526 = vmatprep.subr.bf16.mxu0 %v17124_v3 }
0x12f9   :  { %15388 = vmatmul.mubr.f32.vlgmr.msra.gmra.mrb[54].mxu0 %v18263_v19 }
0x12fa   :  { %16528 = vmatpush3.bf16.msra.mxu0 %v17388_v15  ;;  %15398 = vmatprep.mubr.msk.f32.mxu0 %vm17125_vm0, %v17126_v9 }
0x12fb   :  { %16529 = vmatprep.subr.bf16.mxu0 %v17124_v3 }
0x12fe   :  { %16531 = vmatpush3.bf16.msra.mxu0 %v17393_v16 }
0x12ff   :  { %16532 = vmatprep.subr.bf16.mxu0 %v17124_v3 }
0x1301   :  { %15399 = vmatmul.mubr.f32.vlgmr.msra.gmra.mrb[54].mxu0 %v9310_v20 }
0x1302   :  { %16534 = vmatpush3.bf16.msra.mxu0 %v17365_v63  ;;  %15409 = vmatprep.mubr.msk.f32.mxu0 %vm17125_vm0, %v17126_v9 }
0x1303   :  { %16535 = vmatprep.subr.bf16.mxu0 %v17124_v3 }
0x1306   :  { %16537 = vmatpush3.bf16.msra.mxu0 %v17370_v5 }
0x1307   :  { %16538 = vmatprep.subr.bf16.mxu0 %v17124_v3 }
0x1309   :  { %15410 = vmatmul.mubr.f32.vlgmr.msra.gmra.mrb[54].mxu0 %v9311_v21 }
0x130a   :  { %16540 = vmatpush3.bf16.msra.mxu0 %v17406_v17  ;;  %15420 = vmatprep.mubr.msk.f32.mxu0 %vm17125_vm0, %v17126_v9 }
0x130b   :  { %16541 = vmatprep.subr.bf16.mxu0 %v17124_v3 }
0x130e   :  { %16543 = vmatpush3.bf16.msra.mxu0 %v17411_v18 }
0x130f   :  { %16544 = vmatprep.subr.bf16.mxu0 %v17124_v3 }
0x1311   :  { %15421 = vmatmul.mubr.f32.vlgmr.msra.gmra.mrb[54].mxu0 %v18263_v19 }
0x1312   :  { %16546 = vmatpush3.bf16.msra.mxu0 %v17365_v63  ;;  %15431 = vmatprep.mubr.msk.f32.mxu0 %vm17125_vm0, %v17126_v9 }
0x1313   :  { %16547 = vmatprep.subr.bf16.mxu0 %v17124_v3 }
0x1316   :  { %16549 = vmatpush3.bf16.msra.mxu0 %v17370_v5 }
0x1317   :  { %16586 = vmatprep.subr.bf16.mxu0 %v17124_v3 }
0x1319   :  { %15432 = vmatmul.mubr.f32.vlgmr.msra.gmra.mrb[54].mxu0 %v18263_v19 }
0x131a   :  { %16588 = vmatpush3.bf16.msra.mxu0 %v17515_v52  ;;  %15508 = vmatprep.mubr.msk.f32.mxu0 %vm17125_vm0, %v17126_v9 }
0x131b   :  { %16589 = vmatprep.subr.bf16.mxu0 %v17124_v3 }
0x131e   :  { %16591 = vmatpush3.bf16.msra.mxu0 %v17530_v57 }
0x131f   :  { %16598 = vmatprep.subr.bf16.mxu0 %v17124_v3 }
0x137c   :  { %v8824_v0 = vpop.f32.mrb[98].mxu1 }
0x137d   :  { %v15246_v26 = vpop.f32.mrb[99].mxu1 }
0x1384   :  { %v8915_v28 = vpop.f32.mrb[100].mxu1 }
0x1385   :  { %v8916_v32 = vadd.f32 %v8915_v28, %v8824_v0  ;;  %v15257_v46 = vpop.f32.mrb[101].mxu1 }
0x138c   :  { %v8995_v7 = vpop.f32.mrb[102].mxu1 }
0x138d   :  { %v8996_v34 = vadd.f32 %v8995_v7, %v8916_v32  ;;  %v15268_v13 = vpop.f32.mrb[103].mxu1 }
0x1394   :  { %v9072_v35 = vpop.f32.mrb[104].mxu1 }
0x1395   :  { %v9073_v38 = vadd.f32 %v9072_v35, %v8996_v34  ;;  %v15279_v47 = vpop.f32.mrb[105].mxu1 }
0x139c   :  { %v9155_v53 = vpop.f32.mrb[106].mxu1 }
0x139d   :  { %v9156_v22 = vadd.f32 %v9155_v53, %v9073_v38  ;;  %v15290_v37 = vpop.f32.mrb[107].mxu1 }
0x13a4   :  { %v9230_v42 = vpop.f32.mrb[108].mxu1 }
0x13a5   :  { %v9231_v27 = vadd.f32 %v9230_v42, %v9156_v22  ;;  %v15301_v43 = vpop.f32.mrb[109].mxu1 }
0x13ac   :  { %v9406_v49 = vpop.f32.mrb[110].mxu1  ;;  %v9315_v59 = vpop.f32.mrb[48].mxu0 }
0x13ad   :  { %v9316_v61 = vadd.f32 %v9315_v59, %v9231_v27  ;;  %v15323_v1 = vpop.f32.mrb[111].mxu1  ;;  %v15312_v33 = vpop.f32.mrb[49].mxu0 }
0x13af   :  { %v9407_v2 = vadd.f32 %v9406_v49, %v9316_v61  ;;  %v10244_v61 = vrot.slane %v18225_v41, 7 }
0x13b4   :  { %v9486_v12 = vpop.f32.mrb[50].mxu0  ;;  %v9563_v51 = vpop.f32.mrb[112].mxu1 }
0x13b5   :  { %v9487_v4 = vadd.f32 %v9486_v12, %v9407_v2  ;;  %v15334_v8 = vpop.f32.mrb[51].mxu0  ;;  %v15345_v36 = vpop.f32.mrb[113].mxu1 }
0x13b7   :  { %v9564_v10 = vadd.f32 %v9563_v51, %v9487_v4 }
0x13bc   :  { %v9646_v19 = vpop.f32.mrb[52].mxu0  ;;  %v9721_v20 = vpop.f32.mrb[114].mxu1 }
0x13bd   :  { %v9647_v21 = vadd.f32 %v9646_v19, %v9564_v10  ;;  %v15356_v44 = vpop.f32.mrb[53].mxu0  ;;  %v15367_v24 = vpop.f32.mrb[115].mxu1 }
0x13bf   :  { %v9722_v0 = vadd.f32 %v9721_v20, %v9647_v21 }
0x13c1   :  { %v9725_v26 = vadd.f32 %v18073_v50, %v9722_v0 }
0x13c3   :  { %16916 = vtanh.f32 %v9725_v26 }
0x13cd   :  { %v16917_v28 = vpop.eup %16916 }
0x13ce   :  { %9731 = vrot.lane.b32.xlu0 %v16917_v28, %s17127_s3  ;;  %v9727_v35 = vmul.f32 0.5, %v16917_v28 }
0x13d0   :  { %v9728_v38 = vadd.f32 0.5, %v9727_v35 }
0x13d2   :  { %v9729_v27 = vmul.f32 %v9728_v38, %v18220_v39 }
0x13ec   :  { %v10232_v32 = vpop.f32.mrb[54].mxu0 }
0x13ed   :  { %v10237_v46 = vrot.slane %v10232_v32, 2  ;;  %v15433_v7 = vpop.f32.mrb[55].mxu0 }
0x13ef   :  { %v10239_v34 = vadd.f32 %v17428_v25, %v10237_v46 }
0x13f1   :  { %16918 = vtanh.f32 %v10239_v34 }
0x13fb   :  { %v16919_v13 = vpop.eup %16918 }
0x13fc   :  { %10248 = vrot.lane.b32.xlu1 %v16919_v13, %s17127_s3  ;;  %v10241_v50 = vmul.f32 0.5, %v16919_v13 }
0x13fe   :  { %v10242_v22 = vadd.f32 0.5, %v10241_v50 }
0x1400   :  { %v10246_v1 = vmul.f32 %v10244_v61, %v10242_v22 }
0x1440   :  { %v9732_v47 = vpop.permute.xlu0 %9731 }
0x1441   :  { %v9734_v53 = vmul.f32 %v9732_v47, %v9728_v38 }
0x1443   :  { %9736 = vrot.lane.b32.xlu0 %v9734_v53, %s17128_s16 }
0x146e   :  { %v10249_v37 = vpop.permute.xlu1 %10248 }
0x146f   :  { %v10251_v42 = vmul.f32 %v10249_v37, %v10242_v22 }
0x1471   :  { %10253 = vrot.lane.b32.xlu1 %v10251_v42, %s17128_s16 }
0x14b5   :  { %v9737_v43 = vpop.permute.xlu0 %9736 }
0x14b6   :  { %v18358_v49 = vadd.f32 %v9737_v43, %v9729_v27 }
0x14b8   :  { %16920 = vtanh.f32 %v18358_v49 }
0x14c2   :  { %v16921_v59 = vpop.eup %16920 }
0x14c3   :  { %9742 = vrot.lane.b32.xlu0 %v16921_v59, %s17127_s3 }
0x14e3   :  { %v10254_v33 = vpop.permute.xlu1 %10253 }
0x14e4   :  { %v18363_v2 = vadd.f32 %v10254_v33, %v10246_v1 }
0x14e6   :  { %16922 = vtanh.f32 %v18363_v2 }
0x14f0   :  { %v16923_v12 = vpop.eup %16922 }
0x14f1   :  { %10259 = vrot.lane.b32.xlu1 %v16923_v12, %s17127_s3 }
0x1535   :  { %v9743_v39 = vpop.permute.xlu0 %9742 }
0x1536   :  { %v9745_v51 = vmul.f32 %v9743_v39, %v9728_v38 }
0x1538   :  { %9747 = vrot.lane.b32.xlu0 %v9745_v51, %s17128_s16 }
0x1563   :  { %v10260_v4 = vpop.permute.xlu1 %10259 }
0x1564   :  { %v10262_v8 = vmul.f32 %v10260_v4, %v10242_v22 }
0x1566   :  { %v10751_v36 = vrot.slane %v10262_v8, 6 }
0x1568   :  { %10752 = vrot.lane.b32.xlu1 %v10751_v36, %s17128_s16 }
0x15aa   :  { %v9748_v10 = vpop.permute.xlu0 %9747 }
0x15ab   :  { %9750 = vst.msk [vmem:[#allocation15 + $0x5] sm:$0x1] %vm117_vm1, %v9748_v10  ;;  %v10263_v41 = vsel %vm159_vm2, %v9748_v10, 0 }
0x15ac   :  { %v10334_v19 = vand.u32 4294901760, %v10263_v41 }
0x15ae   :  { %v10335_v20 = vsub.f32 %v10263_v41, %v10334_v19 }
0x15b0   :  { %v10336_v21 = vand.u32 4294901760, %v10335_v20 }
0x15b2   :  { %v10337_v44 = vsub.f32 %v10335_v20, %v10336_v21 }
0x15b4   :  { %v10338_v24 = vand.u32 4294901760, %v10337_v44 }
0x15b6   :  { %15443 = vmatmul.mubr.f32.vlgmr.msra.gmra.mrb[116].mxu1 %v10338_v24  ;;  %v18489_v24 = vld [vmem:[#allocation10] sm:$0x1] }
0x15b7   :  { %16558 = vmatpush3.bf16.msra.mxu1 %v17457_v29  ;;  %15453 = vmatprep.mubr.msk.f32.mxu1 %vm17125_vm0, %v17126_v9 }
0x15b8   :  { %16559 = vmatprep.subr.bf16.mxu1 %v17124_v3 }
0x15bb   :  { %16561 = vmatpush3.bf16.msra.mxu1 %v17461_v30 }
0x15bc   :  { %16562 = vmatprep.subr.bf16.mxu1 %v17124_v3 }
0x15be   :  { %15454 = vmatmul.mubr.f32.vlgmr.msra.gmra.mrb[118].mxu1 %v10334_v19 }
0x15bf   :  { %16564 = vmatpush3.bf16.msra.mxu1 %v17447_v23  ;;  %15464 = vmatprep.mubr.msk.f32.mxu1 %vm17125_vm0, %v17126_v9 }
0x15c0   :  { %16565 = vmatprep.subr.bf16.mxu1 %v17124_v3 }
0x15c3   :  { %16567 = vmatpush3.bf16.msra.mxu1 %v17464_v31 }
0x15c4   :  { %16568 = vmatprep.subr.bf16.mxu1 %v17124_v3 }
0x15c6   :  { %15465 = vmatmul.mubr.f32.vlgmr.msra.gmra.mrb[120].mxu1 %v10335_v20 }
0x15c7   :  { %16570 = vmatpush3.bf16.msra.mxu1 %v17440_v60  ;;  %15475 = vmatprep.mubr.msk.f32.mxu1 %vm17125_vm0, %v17126_v9 }
0x15c8   :  { %16571 = vmatprep.subr.bf16.mxu1 %v17124_v3 }
0x15cb   :  { %16573 = vmatpush3.bf16.msra.mxu1 %v17443_v6 }
0x15cc   :  { %16574 = vmatprep.subr.bf16.mxu1 %v17124_v3 }
0x15ce   :  { %15476 = vmatmul.mubr.f32.vlgmr.msra.gmra.mrb[122].mxu1 %v10336_v21 }
0x15cf   :  { %16576 = vmatpush3.bf16.msra.mxu1 %v17484_v40  ;;  %15486 = vmatprep.mubr.msk.f32.mxu1 %vm17125_vm0, %v17126_v9 }
0x15d0   :  { %16577 = vmatprep.subr.bf16.mxu1 %v17124_v3 }
0x15d3   :  { %16579 = vmatpush3.bf16.msra.mxu1 %v17499_v45 }
0x15d4   :  { %16580 = vmatprep.subr.bf16.mxu1 %v17124_v3 }
0x15d6   :  { %15487 = vmatmul.mubr.f32.vlgmr.msra.gmra.mrb[124].mxu1 %v10334_v19 }
0x15d7   :  { %16582 = vmatpush3.bf16.msra.mxu1 %v17440_v60  ;;  %15497 = vmatprep.mubr.msk.f32.mxu1 %vm17125_vm0, %v17126_v9 }
0x15d8   :  { %16583 = vmatprep.subr.bf16.mxu1 %v17124_v3 }
0x15da   :  { %v10753_v0 = vpop.permute.xlu1 %10752 }
0x15db   :  { %v10754_v26 = vsel %vm159_vm2, %v10753_v0, 0  ;;  %16585 = vmatpush3.bf16.msra.mxu1 %v17443_v6 }
0x15dc   :  { %v18401_v28 = vand.u32 4294901760, %v10754_v26  ;;  %16592 = vmatprep.subr.bf16.mxu1 %v17124_v3 }
0x15de   :  { %v10826_v32 = vsub.f32 %v10754_v26, %v18401_v28  ;;  %15498 = vmatmul.mubr.f32.vlgmr.msra.gmra.mrb[126].mxu1 %v10334_v19 }
0x15df   :  { %16594 = vmatpush3.bf16.msra.mxu1 %v17537_v58  ;;  %15519 = vmatprep.mubr.msk.f32.mxu1 %vm17125_vm0, %v17126_v9 }
0x15e0   :  { %v10827_v46 = vand.u32 4294901760, %v10826_v32  ;;  %16595 = vmatprep.subr.bf16.mxu1 %v17124_v3 }
0x15e2   :  { %v10828_v7 = vsub.f32 %v10826_v32, %v10827_v46 }
0x15e3   :  { %16597 = vmatpush3.bf16.msra.mxu1 %v17544_v62 }
0x15e4   :  { %16604 = vmatprep.subr.bf16.mxu1 %v17124_v3  ;;  %v10829_v34 = vand.u32 4294901760, %v10828_v7 }
0x15e6   :  { %15520 = vmatmul.mubr.f32.vlgmr.msra.gmra.mrb[128].mxu1 %v18401_v28  ;;  %15509 = vmatmul.mubr.f32.vlgmr.msra.gmra.mrb[56].mxu0 %v10829_v34 }
0x15e7   :  { %16600 = vmatpush3.bf16.msra.mxu0 %v17567_v48  ;;  %16606 = vmatpush3.bf16.msra.mxu1 %v17515_v52 }
0x15e8   :  { %16601 = vmatprep.subr.bf16.mxu0 %v17124_v3  ;;  %16607 = vmatprep.subr.bf16.mxu1 %v17124_v3 }
0x15e9   :  { %15530 = vmatprep.mubr.msk.f32.mxu0 %vm17125_vm0, %v17126_v9  ;;  %15541 = vmatprep.mubr.msk.f32.mxu1 %vm17125_vm0, %v17126_v9 }
0x15eb   :  { %16603 = vmatpush3.bf16.msra.mxu0 %v17574_v54  ;;  %16609 = vmatpush3.bf16.msra.mxu1 %v17530_v57 }
0x15ec   :  { %16610 = vmatprep.subr.bf16.mxu0 %v17124_v3  ;;  %16616 = vmatprep.subr.bf16.mxu1 %v17124_v3 }
0x15ee   :  { %15531 = vmatmul.mubr.f32.vlgmr.msra.gmra.mrb[58].mxu0 %v10826_v32  ;;  %15542 = vmatmul.mubr.f32.vlgmr.msra.gmra.mrb[130].mxu1 %v10827_v46 }
0x15ef   :  { %16612 = vmatpush3.bf16.msra.mxu0 %v17588_v55  ;;  %16618 = vmatpush3.bf16.msra.mxu1 %v17515_v52 }
0x15f0   :  { %16613 = vmatprep.subr.bf16.mxu0 %v17124_v3  ;;  %16619 = vmatprep.subr.bf16.mxu1 %v17124_v3 }
0x15f1   :  { %15552 = vmatprep.mubr.msk.f32.mxu0 %vm17125_vm0, %v17126_v9  ;;  %15563 = vmatprep.mubr.msk.f32.mxu1 %vm17125_vm0, %v17126_v9 }
0x15f3   :  { %16615 = vmatpush3.bf16.msra.mxu0 %v17598_v56  ;;  %16621 = vmatpush3.bf16.msra.mxu1 %v17530_v57 }
0x15f4   :  { %16622 = vmatprep.subr.bf16.mxu0 %v17124_v3  ;;  %16658 = vmatprep.subr.bf16.mxu1 %v17124_v3 }
0x15f6   :  { %15553 = vmatmul.mubr.f32.vlgmr.msra.gmra.mrb[60].mxu0 %v18401_v28  ;;  %15564 = vmatmul.mubr.f32.vlgmr.msra.gmra.mrb[132].mxu1 %v18401_v28 }
0x15f7   :  { %16624 = vmatpush3.bf16.msra.mxu0 %v17365_v63  ;;  %15574 = vmatprep.mubr.msk.f32.mxu0 %vm17125_vm0, %v17126_v9 }
0x15f8   :  { %16625 = vmatprep.subr.bf16.mxu0 %v17124_v3  ;;  %16660 = vmatpush3.bf16.msra.mxu1 %v17440_v60 }
0x15f9   :  { %16661 = vmatprep.subr.bf16.mxu1 %v17124_v3  ;;  %15640 = vmatprep.mubr.msk.f32.mxu1 %vm17125_vm0, %v17126_v9 }
0x15fb   :  { %16627 = vmatpush3.bf16.msra.mxu0 %v17370_v5 }
0x15fc   :  { %16628 = vmatprep.subr.bf16.mxu0 %v17124_v3  ;;  %16663 = vmatpush3.bf16.msra.mxu1 %v17443_v6 }
0x15fd   :  { %16664 = vmatprep.subr.bf16.mxu1 %v17124_v3 }
0x15fe   :  { %15575 = vmatmul.mubr.f32.vlgmr.msra.gmra.mrb[62].mxu0 %v10829_v34 }
0x15ff   :  { %16630 = vmatpush3.bf16.msra.mxu0 %v17377_v11  ;;  %15585 = vmatprep.mubr.msk.f32.mxu0 %vm17125_vm0, %v17126_v9 }
0x1600   :  { %16631 = vmatprep.subr.bf16.mxu0 %v17124_v3 }
0x1603   :  { %16633 = vmatpush3.bf16.msra.mxu0 %v17382_v14 }
0x1604   :  { %16634 = vmatprep.subr.bf16.mxu0 %v17124_v3 }
0x1606   :  { %15586 = vmatmul.mubr.f32.vlgmr.msra.gmra.mrb[62].mxu0 %v18401_v28 }
0x1607   :  { %16636 = vmatpush3.bf16.msra.mxu0 %v17388_v15  ;;  %15596 = vmatprep.mubr.msk.f32.mxu0 %vm17125_vm0, %v17126_v9 }
0x1608   :  { %16637 = vmatprep.subr.bf16.mxu0 %v17124_v3 }
0x160b   :  { %16639 = vmatpush3.bf16.msra.mxu0 %v17393_v16 }
0x160c   :  { %16640 = vmatprep.subr.bf16.mxu0 %v17124_v3 }
0x160e   :  { %15597 = vmatmul.mubr.f32.vlgmr.msra.gmra.mrb[62].mxu0 %v10826_v32 }
0x160f   :  { %16642 = vmatpush3.bf16.msra.mxu0 %v17365_v63  ;;  %15607 = vmatprep.mubr.msk.f32.mxu0 %vm17125_vm0, %v17126_v9 }
0x1610   :  { %16643 = vmatprep.subr.bf16.mxu0 %v17124_v3 }
0x1613   :  { %16645 = vmatpush3.bf16.msra.mxu0 %v17370_v5 }
0x1614   :  { %16646 = vmatprep.subr.bf16.mxu0 %v17124_v3 }
0x1616   :  { %15608 = vmatmul.mubr.f32.vlgmr.msra.gmra.mrb[62].mxu0 %v10827_v46 }
0x1617   :  { %16648 = vmatpush3.bf16.msra.mxu0 %v17406_v17  ;;  %15618 = vmatprep.mubr.msk.f32.mxu0 %vm17125_vm0, %v17126_v9 }
0x1618   :  { %16649 = vmatprep.subr.bf16.mxu0 %v17124_v3 }
0x161b   :  { %16651 = vmatpush3.bf16.msra.mxu0 %v17411_v18 }
0x161c   :  { %16652 = vmatprep.subr.bf16.mxu0 %v17124_v3 }
0x161e   :  { %15619 = vmatmul.mubr.f32.vlgmr.msra.gmra.mrb[62].mxu0 %v18401_v28 }
0x161f   :  { %16654 = vmatpush3.bf16.msra.mxu0 %v17365_v63  ;;  %15629 = vmatprep.mubr.msk.f32.mxu0 %vm17125_vm0, %v17126_v9 }
0x1620   :  { %16655 = vmatprep.subr.bf16.mxu0 %v17124_v3 }
0x1623   :  { %16657 = vmatpush3.bf16.msra.mxu0 %v17370_v5 }
0x1624   :  { %16694 = vmatprep.subr.bf16.mxu0 %v17124_v3 }
0x1626   :  { %15630 = vmatmul.mubr.f32.vlgmr.msra.gmra.mrb[62].mxu0 %v18401_v28 }
0x1627   :  { %16696 = vmatpush3.bf16.msra.mxu0 %v17515_v52  ;;  %15706 = vmatprep.mubr.msk.f32.mxu0 %vm17125_vm0, %v17126_v9 }
0x1628   :  { %16697 = vmatprep.subr.bf16.mxu0 %v17124_v3 }
0x162b   :  { %16699 = vmatpush3.bf16.msra.mxu0 %v17530_v57 }
0x162c   :  { %16706 = vmatprep.subr.bf16.mxu0 %v17124_v3 }
0x1689   :  { %v10340_v63 = vpop.f32.mrb[116].mxu1 }
0x168a   :  { %v15444_v11 = vpop.f32.mrb[117].mxu1 }
0x1691   :  { %v10431_v14 = vpop.f32.mrb[118].mxu1 }
0x1692   :  { %v10432_v15 = vadd.f32 %v10431_v14, %v10340_v63  ;;  %v15455_v5 = vpop.f32.mrb[119].mxu1 }
0x1699   :  { %v10511_v16 = vpop.f32.mrb[120].mxu1 }
0x169a   :  { %v10512_v17 = vadd.f32 %v10511_v16, %v10432_v15  ;;  %v15466_v18 = vpop.f32.mrb[121].mxu1 }
0x16a1   :  { %v10588_v13 = vpop.f32.mrb[122].mxu1 }
0x16a2   :  { %v10589_v35 = vadd.f32 %v10588_v13, %v10512_v17  ;;  %v15477_v38 = vpop.f32.mrb[123].mxu1 }
0x16a9   :  { %v10671_v47 = vpop.f32.mrb[124].mxu1 }
0x16aa   :  { %v10672_v53 = vadd.f32 %v10671_v47, %v10589_v35  ;;  %v15488_v50 = vpop.f32.mrb[125].mxu1  ;;  %v11760_v47 = vrot.slane %v18363_v2, 7 }
0x16b1   :  { %v10746_v22 = vpop.f32.mrb[126].mxu1 }
0x16b2   :  { %v10747_v37 = vadd.f32 %v10746_v22, %v10672_v53  ;;  %v15499_v42 = vpop.f32.mrb[127].mxu1 }
0x16b9   :  { %v10922_v27 = vpop.f32.mrb[128].mxu1  ;;  %v10831_v43 = vpop.f32.mrb[56].mxu0 }
0x16ba   :  { %v10832_v59 = vadd.f32 %v10831_v43, %v10747_v37  ;;  %v15521_v61 = vpop.f32.mrb[129].mxu1  ;;  %v15510_v1 = vpop.f32.mrb[57].mxu0 }
0x16bc   :  { %v10923_v33 = vadd.f32 %v10922_v27, %v10832_v59 }
0x16c1   :  { %v11002_v12 = vpop.f32.mrb[58].mxu0  ;;  %v11079_v39 = vpop.f32.mrb[130].mxu1 }
0x16c2   :  { %v11003_v51 = vadd.f32 %v11002_v12, %v10923_v33  ;;  %v15532_v4 = vpop.f32.mrb[59].mxu0  ;;  %v15543_v8 = vpop.f32.mrb[131].mxu1 }
0x16c4   :  { %v11080_v36 = vadd.f32 %v11079_v39, %v11003_v51 }
0x16c9   :  { %v11162_v10 = vpop.f32.mrb[60].mxu0  ;;  %v11237_v41 = vpop.f32.mrb[132].mxu1 }
0x16ca   :  { %v11163_v19 = vadd.f32 %v11162_v10, %v11080_v36  ;;  %v15554_v20 = vpop.f32.mrb[61].mxu0  ;;  %v15565_v21 = vpop.f32.mrb[133].mxu1 }
0x16cc   :  { %v11238_v44 = vadd.f32 %v11237_v41, %v11163_v19 }
0x16ce   :  { %v11241_v0 = vadd.f32 %v18489_v24, %v11238_v44 }
0x16d0   :  { %16924 = vtanh.f32 %v11241_v0 }
0x16da   :  { %v16925_v26 = vpop.eup %16924 }
0x16db   :  { %11247 = vrot.lane.b32.xlu0 %v16925_v26, %s17127_s3  ;;  %v11243_v63 = vmul.f32 0.5, %v16925_v26 }
0x16dd   :  { %v11244_v11 = vadd.f32 0.5, %v11243_v63 }
0x16df   :  { %v11245_v13 = vmul.f32 %v11244_v11, %v18358_v49 }
0x16f9   :  { %v11748_v28 = vpop.f32.mrb[62].mxu0 }
0x16fa   :  { %v11753_v32 = vrot.slane %v11748_v28, 1  ;;  %v15631_v46 = vpop.f32.mrb[63].mxu0 }
0x16fc   :  { %v11755_v7 = vadd.f32 %v17428_v25, %v11753_v32 }
0x16fe   :  { %16926 = vtanh.f32 %v11755_v7 }
0x1708   :  { %v16927_v34 = vpop.eup %16926 }
0x1709   :  { %11764 = vrot.lane.b32.xlu1 %v16927_v34, %s17127_s3  ;;  %v11757_v5 = vmul.f32 0.5, %v16927_v34 }
0x170b   :  { %v11758_v16 = vadd.f32 0.5, %v11757_v5 }
0x170d   :  { %v11762_v53 = vmul.f32 %v11760_v47, %v11758_v16 }
0x174d   :  { %v11248_v14 = vpop.permute.xlu0 %11247 }
0x174e   :  { %v11250_v15 = vmul.f32 %v11248_v14, %v11244_v11 }
0x1750   :  { %11252 = vrot.lane.b32.xlu0 %v11250_v15, %s17128_s16 }
0x177b   :  { %v11765_v17 = vpop.permute.xlu1 %11764 }
0x177c   :  { %v11767_v18 = vmul.f32 %v11765_v17, %v11758_v16 }
0x177e   :  { %11769 = vrot.lane.b32.xlu1 %v11767_v18, %s17128_s16 }
0x17c2   :  { %v11253_v35 = vpop.permute.xlu0 %11252 }
0x17c3   :  { %v18498_v25 = vadd.f32 %v11253_v35, %v11245_v13 }
0x17c5   :  { %16928 = vtanh.f32 %v18498_v25 }
0x17cf   :  { %v16929_v38 = vpop.eup %16928 }
0x17d0   :  { %11258 = vrot.lane.b32.xlu0 %v16929_v38, %s17127_s3 }
0x17f0   :  { %v11770_v50 = vpop.permute.xlu1 %11769 }
0x17f1   :  { %v11772_v22 = vadd.f32 %v11770_v50, %v11762_v53 }
0x17f3   :  { %16930 = vtanh.f32 %v11772_v22 }
0x17fd   :  { %v16931_v37 = vpop.eup %16930 }
0x17fe   :  { %11775 = vrot.lane.b32.xlu1 %v16931_v37, %s17127_s3 }
0x1842   :  { %v11259_v42 = vpop.permute.xlu0 %11258 }
0x1843   :  { %v11261_v27 = vmul.f32 %v11259_v42, %v11244_v11 }
0x1845   :  { %11263 = vrot.lane.b32.xlu0 %v11261_v27, %s17128_s16 }
0x1870   :  { %v11776_v49 = vpop.permute.xlu1 %11775 }
0x1871   :  { %v11778_v43 = vmul.f32 %v11776_v49, %v11758_v16 }
0x1873   :  { %v12267_v59 = vrot.slane %v11778_v43, 7 }
0x1875   :  { %12268 = vrot.lane.b32.xlu1 %v12267_v59, %s17128_s16  ;;  %v12784_v59 = vld [vmem:[#allocation11] sm:$0xff] }
0x18b7   :  { %v11264_v61 = vpop.permute.xlu0 %11263 }
0x18b8   :  { %11266 = vst.msk [vmem:[#allocation15 + $0x6] sm:$0x1] %vm117_vm1, %v11264_v61  ;;  %v11779_v2 = vsel %vm159_vm2, %v11264_v61, 0  ;;  %v12786_v61 = vld [vmem:[#allocation11 + $0x10] sm:$0xff] }
0x18b9   :  { %v11850_v1 = vand.u32 4294901760, %v11779_v2 }
0x18bb   :  { %v11851_v33 = vsub.f32 %v11779_v2, %v11850_v1  ;;  %v12799_v2 = vand.u32 4294901760, %v12784_v59 }
0x18bd   :  { %v11852_v12 = vand.u32 4294901760, %v11851_v33 }
0x18bf   :  { %v11853_v39 = vsub.f32 %v11851_v33, %v11852_v12 }
0x18c1   :  { %v11854_v51 = vand.u32 4294901760, %v11853_v39 }
0x18c3   :  { %15641 = vmatmul.mubr.f32.vlgmr.msra.gmra.mrb[134].mxu1 %v11854_v51 }
0x18c4   :  { %16666 = vmatpush3.bf16.msra.mxu1 %v17457_v29  ;;  %15651 = vmatprep.mubr.msk.f32.mxu1 %vm17125_vm0, %v17126_v9 }
0x18c5   :  { %16667 = vmatprep.subr.bf16.mxu1 %v17124_v3 }
0x18c8   :  { %16669 = vmatpush3.bf16.msra.mxu1 %v17461_v30 }
0x18c9   :  { %16670 = vmatprep.subr.bf16.mxu1 %v17124_v3 }
0x18cb   :  { %15652 = vmatmul.mubr.f32.vlgmr.msra.gmra.mrb[136].mxu1 %v11850_v1 }
0x18cc   :  { %16672 = vmatpush3.bf16.msra.mxu1 %v17447_v23  ;;  %15662 = vmatprep.mubr.msk.f32.mxu1 %vm17125_vm0, %v17126_v9 }
0x18cd   :  { %16673 = vmatprep.subr.bf16.mxu1 %v17124_v3 }
0x18d0   :  { %16675 = vmatpush3.bf16.msra.mxu1 %v17464_v31 }
0x18d1   :  { %16676 = vmatprep.subr.bf16.mxu1 %v17124_v3 }
0x18d3   :  { %15663 = vmatmul.mubr.f32.vlgmr.msra.gmra.mrb[138].mxu1 %v11851_v33  ;;  %v12787_v33 = vld [vmem:[#allocation11 + $0x18] sm:$0xff] }
0x18d4   :  { %16678 = vmatpush3.bf16.msra.mxu1 %v17440_v60  ;;  %15673 = vmatprep.mubr.msk.f32.mxu1 %vm17125_vm0, %v17126_v9  ;;  %v12808_v39 = vand.u32 4294901760, %v12787_v33 }
0x18d5   :  { %16679 = vmatprep.subr.bf16.mxu1 %v17124_v3 }
0x18d8   :  { %16681 = vmatpush3.bf16.msra.mxu1 %v17443_v6 }
0x18d9   :  { %16682 = vmatprep.subr.bf16.mxu1 %v17124_v3 }
0x18db   :  { %15674 = vmatmul.mubr.f32.vlgmr.msra.gmra.mrb[140].mxu1 %v11852_v12  ;;  %v12805_v12 = vand.u32 4294901760, %v12786_v61 }
0x18dc   :  { %16684 = vmatpush3.bf16.msra.mxu1 %v17484_v40  ;;  %15684 = vmatprep.mubr.msk.f32.mxu1 %vm17125_vm0, %v17126_v9 }
0x18dd   :  { %16685 = vmatprep.subr.bf16.mxu1 %v17124_v3 }
0x18e0   :  { %16687 = vmatpush3.bf16.msra.mxu1 %v17499_v45 }
0x18e1   :  { %16688 = vmatprep.subr.bf16.mxu1 %v17124_v3 }
0x18e3   :  { %15685 = vmatmul.mubr.f32.vlgmr.msra.gmra.mrb[142].mxu1 %v11850_v1 }
0x18e4   :  { %16690 = vmatpush3.bf16.msra.mxu1 %v17440_v60  ;;  %15695 = vmatprep.mubr.msk.f32.mxu1 %vm17125_vm0, %v17126_v9 }
0x18e5   :  { %16691 = vmatprep.subr.bf16.mxu1 %v17124_v3 }
0x18e7   :  { %v12269_v23 = vpop.permute.xlu1 %12268 }
0x18e8   :  { %v12270_v29 = vsel %vm159_vm2, %v12269_v23, 0  ;;  %16693 = vmatpush3.bf16.msra.mxu1 %v17443_v6  ;;  %v12879_v23 = vsub.f32 %v12784_v59, %v12799_v2 }
0x18e9   :  { %v12341_v30 = vand.u32 4294901760, %v12270_v29  ;;  %16700 = vmatprep.subr.bf16.mxu1 %v17124_v3 }
0x18eb   :  { %v12342_v31 = vsub.f32 %v12270_v29, %v12341_v30  ;;  %15696 = vmatmul.mubr.f32.vlgmr.msra.gmra.mrb[144].mxu1 %v11850_v1 }
0x18ec   :  { %16702 = vmatpush3.bf16.msra.mxu1 %v17537_v58  ;;  %15717 = vmatprep.mubr.msk.f32.mxu1 %vm17125_vm0, %v17126_v9 }
0x18ed   :  { %v12343_v60 = vand.u32 4294901760, %v12342_v31  ;;  %16703 = vmatprep.subr.bf16.mxu1 %v17124_v3 }
0x18ef   :  { %v12344_v40 = vsub.f32 %v12342_v31, %v12343_v60 }
0x18f0   :  { %16705 = vmatpush3.bf16.msra.mxu1 %v17544_v62 }
0x18f1   :  { %v12345_v45 = vand.u32 4294901760, %v12344_v40  ;;  %16712 = vmatprep.subr.bf16.mxu1 %v17124_v3 }
0x18f3   :  { %15718 = vmatmul.mubr.f32.vlgmr.msra.gmra.mrb[146].mxu1 %v12341_v30  ;;  %15707 = vmatmul.mubr.f32.vlgmr.msra.gmra.mrb[64].mxu0 %v12345_v45  ;;  %v12880_v45 = vand.u32 4294901760, %v12879_v23 }
0x18f4   :  { %16708 = vmatpush3.bf16.msra.mxu0 %v17567_v48  ;;  %16714 = vmatpush3.bf16.msra.mxu1 %v17515_v52 }
0x18f5   :  { %16709 = vmatprep.subr.bf16.mxu0 %v17124_v3  ;;  %16715 = vmatprep.subr.bf16.mxu1 %v17124_v3 }
0x18f6   :  { %15728 = vmatprep.mubr.msk.f32.mxu0 %vm17125_vm0, %v17126_v9  ;;  %15739 = vmatprep.mubr.msk.f32.mxu1 %vm17125_vm0, %v17126_v9 }
0x18f8   :  { %16711 = vmatpush3.bf16.msra.mxu0 %v17574_v54  ;;  %16717 = vmatpush3.bf16.msra.mxu1 %v17530_v57 }
0x18f9   :  { %16718 = vmatprep.subr.bf16.mxu0 %v17124_v3  ;;  %16724 = vmatprep.subr.bf16.mxu1 %v17124_v3 }
0x18fb   :  { %15729 = vmatmul.mubr.f32.vlgmr.msra.gmra.mrb[66].mxu0 %v12342_v31  ;;  %15740 = vmatmul.mubr.f32.vlgmr.msra.gmra.mrb[148].mxu1 %v12343_v60  ;;  %v16734_v31 = vpack.c.bf16 %v12808_v39, %v12805_v12 }
0x18fc   :  { %16720 = vmatpush3.bf16.msra.mxu0 %v17588_v55  ;;  %16726 = vmatpush3.bf16.msra.mxu1 %v17515_v52 }
0x18fd   :  { %16721 = vmatprep.subr.bf16.mxu0 %v17124_v3  ;;  %16727 = vmatprep.subr.bf16.mxu1 %v17124_v3 }
0x18fe   :  { %15750 = vmatprep.mubr.msk.f32.mxu0 %vm17125_vm0, %v17126_v9  ;;  %15761 = vmatprep.mubr.msk.f32.mxu1 %vm17125_vm0, %v17126_v9 }
0x1900   :  { %16723 = vmatpush3.bf16.msra.mxu0 %v17598_v56  ;;  %16729 = vmatpush3.bf16.msra.mxu1 %v17530_v57 }
0x1901   :  { %16730 = vmatprep.subr.bf16.mxu0 %v17124_v3 }
0x1903   :  { %15751 = vmatmul.mubr.f32.vlgmr.msra.gmra.mrb[68].mxu0 %v12341_v30  ;;  %15762 = vmatmul.mubr.f32.vlgmr.msra.gmra.mrb[150].mxu1 %v12341_v30  ;;  %v12893_v30 = vsub.f32 %v12786_v61, %v12805_v12 }
0x1904   :  { %15772 = vmatprep.mubr.msk.f32.mxu0 %vm17125_vm0, %v17126_v9 }
0x1996   :  { %v11856_v6 = vpop.f32.mrb[134].mxu1 }
0x1997   :  { %v15642_v52 = vpop.f32.mrb[135].mxu1 }
0x1998   :  { %v12881_v52 = vsub.f32 %v12879_v23, %v12880_v45 }
0x199e   :  { %v11947_v58 = vpop.f32.mrb[136].mxu1 }
0x199f   :  { %v11948_v62 = vadd.f32 %v11947_v58, %v11856_v6  ;;  %v15653_v48 = vpop.f32.mrb[137].mxu1 }
0x19a6   :  { %v12027_v54 = vpop.f32.mrb[138].mxu1 }
0x19a7   :  { %v12028_v55 = vadd.f32 %v12027_v54, %v11948_v62  ;;  %v15664_v4 = vpop.f32.mrb[139].mxu1  ;;  %v12882_v62 = vand.u32 4294901760, %v12881_v52  ;;  %v12894_v54 = vand.u32 4294901760, %v12893_v30 }
0x19ae   :  { %v12104_v8 = vpop.f32.mrb[140].mxu1 }
0x19af   :  { %v12105_v36 = vadd.f32 %v12104_v8, %v12028_v55  ;;  %v15675_v56 = vpop.f32.mrb[141].mxu1  ;;  %v12895_v8 = vsub.f32 %v12893_v30, %v12894_v54 }
0x19b1   :  { %v12896_v56 = vand.u32 4294901760, %v12895_v8 }
0x19b6   :  { %v12187_v10 = vpop.f32.mrb[142].mxu1 }
0x19b7   :  { %v12188_v57 = vadd.f32 %v12187_v10, %v12105_v36  ;;  %v15686_v41 = vpop.f32.mrb[143].mxu1 }
0x19be   :  { %v12262_v19 = vpop.f32.mrb[144].mxu1 }
0x19bf   :  { %v12263_v20 = vadd.f32 %v12262_v19, %v12188_v57  ;;  %v15697_v21 = vpop.f32.mrb[145].mxu1 }
0x19c6   :  { %v12438_v44 = vpop.f32.mrb[146].mxu1  ;;  %v12347_v0 = vpop.f32.mrb[64].mxu0 }
0x19c7   :  { %v12348_v26 = vadd.f32 %v12347_v0, %v12263_v20  ;;  %v15719_v28 = vpop.f32.mrb[147].mxu1  ;;  %v15708_v32 = vpop.f32.mrb[65].mxu0 }
0x19c9   :  { %v12439_v46 = vadd.f32 %v12438_v44, %v12348_v26 }
0x19ce   :  { %v12518_v7 = vpop.f32.mrb[66].mxu0  ;;  %v12595_v34 = vpop.f32.mrb[148].mxu1 }
0x19cf   :  { %v12519_v63 = vadd.f32 %v12518_v7, %v12439_v46  ;;  %v15730_v11 = vpop.f32.mrb[67].mxu0  ;;  %v15741_v14 = vpop.f32.mrb[149].mxu1 }
0x19d1   :  { %v12596_v15 = vadd.f32 %v12595_v34, %v12519_v63 }
0x19d6   :  { %v12678_v5 = vpop.f32.mrb[68].mxu0  ;;  %v12753_v16 = vpop.f32.mrb[150].mxu1 }
0x19d7   :  { %v12679_v17 = vadd.f32 %v12678_v5, %v12596_v15  ;;  %v15752_v18 = vpop.f32.mrb[69].mxu0  ;;  %v15763_v13 = vpop.f32.mrb[151].mxu1 }
0x19d9   :  { %v12754_v35 = vadd.f32 %v12753_v16, %v12679_v17 }
0x19db   :  { %v12757_v38 = vadd.f32 %v18489_v24, %v12754_v35  ;;  %v12785_v24 = vld [vmem:[#allocation11 + $0x8] sm:$0xff] }
0x19dc   :  { %v12802_v1 = vand.u32 4294901760, %v12785_v24 }
0x19dd   :  { %16932 = vtanh.f32 %v12757_v38 }
0x19de   :  { %v18575_v51 = vpack.c.bf16 %v12802_v1, %v12799_v2  ;;  %v12886_v29 = vsub.f32 %v12785_v24, %v12802_v1 }
0x19e0   :  { %16732 = vmatpush3.bf16.msra.mxu0 %v18575_v51  ;;  %v12887_v6 = vand.u32 4294901760, %v12886_v29  ;;  %v16743_v41 = vpack.c.bf16 %v12886_v29, %v12879_v23 }
0x19e1   :  { %16733 = vmatprep.subr.bf16.mxu0 %v17124_v3 }
0x19e2   :  { %v12888_v58 = vsub.f32 %v12886_v29, %v12887_v6  ;;  %v16755_v20 = vpack.c.bf16 %v12887_v6, %v12880_v45 }
0x19e4   :  { %16735 = vmatpush3.bf16.msra.mxu0 %v16734_v31  ;;  %v12889_v48 = vand.u32 4294901760, %v12888_v58 }
0x19e5   :  { %16736 = vmatprep.subr.bf16.mxu0 %v17124_v3 }
0x19e6   :  { %v16737_v4 = vpack.c.bf16 %v12889_v48, %v12882_v62 }
0x19e7   :  { %v16933_v47 = vpop.eup %16932 }
0x19e8   :  { %12763 = vrot.lane.b32.xlu0 %v16933_v47, %s17127_s3  ;;  %v12759_v53 = vmul.f32 0.5, %v16933_v47 }
0x19ea   :  { %v12760_v50 = vadd.f32 0.5, %v12759_v53 }
0x19ec   :  { %v12761_v42 = vmul.f32 %v12760_v50, %v18498_v25  ;;  %v12900_v25 = vsub.f32 %v12787_v33, %v12808_v39 }
0x19ee   :  { %v12901_v55 = vand.u32 4294901760, %v12900_v25  ;;  %v16746_v19 = vpack.c.bf16 %v12900_v25, %v12893_v30 }
0x19f0   :  { %v12902_v36 = vsub.f32 %v12900_v25, %v12901_v55  ;;  %v16758_v21 = vpack.c.bf16 %v12901_v55, %v12894_v54 }
0x19f2   :  { %v12903_v10 = vand.u32 4294901760, %v12902_v36 }
0x19f4   :  { %v16740_v57 = vpack.c.bf16 %v12903_v10, %v12896_v56 }
0x1a5a   :  { %v12764_v22 = vpop.permute.xlu0 %12763 }
0x1a5b   :  { %v12766_v37 = vmul.f32 %v12764_v22, %v12760_v50 }
0x1a5d   :  { %12768 = vrot.lane.b32.xlu1 %v12766_v37, %s17128_s16 }
0x1acf   :  { %v12769_v27 = vpop.permute.xlu1 %12768 }
0x1ad0   :  { %v12771_v49 = vadd.f32 %v12769_v27, %v12761_v42 }
0x1ad2   :  { %16934 = vtanh.f32 %v12771_v49 }
0x1adc   :  { %v16935_v43 = vpop.eup %16934 }
0x1add   :  { %12774 = vrot.lane.b32.xlu0 %v16935_v43, %s17127_s3 }
0x1b4f   :  { %v12775_v60 = vpop.permute.xlu0 %12774 }
0x1b50   :  { %v12777_v40 = vmul.f32 %v12775_v60, %v12760_v50 }
0x1b52   :  { %12779 = vrot.lane.b32.xlu1 %v12777_v40, %s17128_s16 }
0x1bc4   :  { %v12780_v44 = vpop.permute.xlu1 %12779 }
0x1bc5   :  { %12782 = vst.msk [vmem:[#allocation15 + $0x7] sm:$0x1] %vm117_vm1, %v12780_v44 }
0x1bcc   :  { %v12783_v0 = vld [vmem:[#allocation15] sm:$0xff] }
0x1bcd   :  { %v12796_v26 = vsel %vm159_vm2, %v12783_v0, 0 }
0x1bce   :  { %v12867_v28 = vand.u32 4294901760, %v12796_v26 }
0x1bd0   :  { %v12868_v32 = vsub.f32 %v12796_v26, %v12867_v28 }
0x1bd2   :  { %v12869_v46 = vand.u32 4294901760, %v12868_v32 }
0x1bd4   :  { %v12870_v7 = vsub.f32 %v12868_v32, %v12869_v46 }
0x1bd6   :  { %v12871_v34 = vand.u32 4294901760, %v12870_v7 }
0x1bd8   :  { %15773 = vmatmul.mubr.f32.vlgmr.msra.gmra.mrb[70].mxu0 %v12871_v34 }
0x1bd9   :  { %16738 = vmatpush3.bf16.msra.mxu0 %v16737_v4  ;;  %15783 = vmatprep.mubr.msk.f32.mxu0 %vm17125_vm0, %v17126_v9 }
0x1bda   :  { %16739 = vmatprep.subr.bf16.mxu0 %v17124_v3 }
0x1bdd   :  { %16741 = vmatpush3.bf16.msra.mxu0 %v16740_v57 }
0x1bde   :  { %16742 = vmatprep.subr.bf16.mxu0 %v17124_v3 }
0x1be0   :  { %15784 = vmatmul.mubr.f32.vlgmr.msra.gmra.mrb[70].mxu0 %v12867_v28 }
0x1be1   :  { %16744 = vmatpush3.bf16.msra.mxu0 %v16743_v41  ;;  %15794 = vmatprep.mubr.msk.f32.mxu0 %vm17125_vm0, %v17126_v9 }
0x1be2   :  { %16745 = vmatprep.subr.bf16.mxu0 %v17124_v3 }
0x1be5   :  { %16747 = vmatpush3.bf16.msra.mxu0 %v16746_v19 }
0x1be6   :  { %16748 = vmatprep.subr.bf16.mxu0 %v17124_v3 }
0x1be8   :  { %15795 = vmatmul.mubr.f32.vlgmr.msra.gmra.mrb[70].mxu0 %v12868_v32 }
0x1be9   :  { %16750 = vmatpush3.bf16.msra.mxu0 %v18575_v51  ;;  %15805 = vmatprep.mubr.msk.f32.mxu0 %vm17125_vm0, %v17126_v9 }
0x1bea   :  { %16751 = vmatprep.subr.bf16.mxu0 %v17124_v3 }
0x1bed   :  { %16753 = vmatpush3.bf16.msra.mxu0 %v16734_v31 }
0x1bee   :  { %16754 = vmatprep.subr.bf16.mxu0 %v17124_v3 }
0x1bf0   :  { %15806 = vmatmul.mubr.f32.vlgmr.msra.gmra.mrb[70].mxu0 %v12869_v46 }
0x1bf1   :  { %16756 = vmatpush3.bf16.msra.mxu0 %v16755_v20  ;;  %15816 = vmatprep.mubr.msk.f32.mxu0 %vm17125_vm0, %v17126_v9 }
0x1bf2   :  { %16757 = vmatprep.subr.bf16.mxu0 %v17124_v3 }
0x1bf5   :  { %16759 = vmatpush3.bf16.msra.mxu0 %v16758_v21 }
0x1bf6   :  { %16760 = vmatprep.subr.bf16.mxu0 %v17124_v3 }
0x1bf8   :  { %15817 = vmatmul.mubr.f32.vlgmr.msra.gmra.mrb[70].mxu0 %v12867_v28 }
0x1bf9   :  { %16762 = vmatpush3.bf16.msra.mxu0 %v18575_v51  ;;  %15827 = vmatprep.mubr.msk.f32.mxu0 %vm17125_vm0, %v17126_v9 }
0x1bfa   :  { %16763 = vmatprep.subr.bf16.mxu0 %v17124_v3 }
0x1bfd   :  { %16765 = vmatpush3.bf16.msra.mxu0 %v16734_v31 }
0x1c00   :  { %15828 = vmatmul.mubr.f32.vlgmr.msra.gmra.mrb[70].mxu0 %v12867_v28 }
0x1c01   :  { %17071 = shalt.err (!%p17068_p7)
}
0x1c02   :  { %s17072_s29 = scalar_lea.hbm %s18639_s11, 128 }
0x1c03   :  { %p17073_p8 = scmp.ne.s32.totalorder %s18639_s11, %s17072_s29  ;;  %p17076_p9 = scmp.lt.u32.totalorder %s17072_s29, %s18639_s11 }
0x1c05   :  { %p17078_p10 = pnand %p17076_p9, %p17073_p8 }
0x1c07   :  { %17081 = shalt.err (!%p17078_p10)
}
0x1c08   :  { %13304 = dma.vmem_to_hbm [thread:$0]  %s13302_s18, 128, %s18639_s11, [#allocation16]   ;;  %v13333_v3 = vld [vmem:[#allocation13] ss:$0 sm:$0xff]  ;;  %vm13283_vm3 = vcmask 523264  }
0x1c09   :  { %s17130_s17 = smov [#allocation14]  }
0x1c0a   :  { %s13291_s2 = sshll.u32 %s17130_s17, 4  ;;  %s13292_s2 = int_to_ptr.vmem [resolvable:$true] %s13291_s2 }
0x1c0b   :  { %s17082_s19 = scalar_lea.vmem %s13292_s2, 128  ;;  %p17087_p12 = scmp.lt.s32.totalorder %s13292_s2, %s13292_s2 }
0x1c0c   :  { %p17083_p11 = scmp.ne.s32.totalorder %s13292_s2, %s17082_s19  ;;  %p17088_p13 = scmp.lt.s32.totalorder %s17082_s19, %s17082_s19 }
0x1c0e   :  { %p17089_p0 = por %p17088_p13, %p17087_p12 }
0x1c10   :  { %p17090_p1 = pnand %p17089_p0, %p17083_p11 }
0x1cd3   :  { %v13279_v9 = vpop.f32.mrb[70].mxu0 }
0x1cd4   :  { %v16768_v63 = vadd.f32 %v13333_v3, %v13279_v9  ;;  %v15829_v11 = vpop.f32.mrb[71].mxu0 }
0x1cd6   :  { %13284 = vst.msk [vmem:[#allocation14] sm:$0xff] %vm13283_vm3, %v16768_v63 }
0x1cd7   :  { %17093 = shalt.err (!%p17090_p1)
}
0x1cd8   :  { %s17094_s11 = scalar_lea.hbm %s18638_s10, 128 }
0x1cd9   :  { %p17095_p2 = scmp.ne.s32.totalorder %s18638_s10, %s17094_s11  ;;  %p17098_p3 = scmp.lt.u32.totalorder %s17094_s11, %s18638_s10 }
0x1cdb   :  { %p17100_p4 = pnand %p17098_p3, %p17095_p2 }
0x1cdd   :  { %17103 = shalt.err (!%p17100_p4)
}
0x1cde   :  { %13294 = dma.vmem_to_hbm [thread:$0]  %s13292_s2, 128, %s18638_s10, [#allocation5]  }
0x1cdf   :  { %17112 = dma.done.wait [#allocation5], 128  }
0x1ce0   :  { %17113 = vsyncadd [#allocation5], 4294967168 }
0x1ce1   :  { %17114 = dma.done.wait [#allocation16], 128  }
0x1ce2   :  { %17115 = vsyncadd [#allocation16], 4294967168 }
0x1ce3   :  { %13311 = vsyncpa [#allocation4], 1 }
0x1ce4   :  { %13312 = vsyncpa [#allocation9], 1 }
0x1ce5   :  { %13313 = vsyncpa [#allocation12], 1 }
0x1ce6   :  { %13314 = vsyncpa [#allocation5], 1 }
0x1ce7   :  { %13315 = vsyncpa [#allocation16], 1 }
0x1ce8   :  { %13316 = vsyncpa [#allocation6], 1 }

</bundles_post_ra>
